<compile_context>
chip_gen: v7x
topology: tpu7x:2x2x1
jax: 0.10.0
libtpu: 0.0.40
codegen_flags: <defaults>
</compile_context>

<pallas_src>
import jax
import jax.numpy as jnp
from jax.experimental import pallas as pl
from jax.experimental.pallas import tpu as pltpu


TILE_B = 128  # ids per grid step == lane width of one output block


def _round_up(x, m):
    return (x + m - 1) // m * m


def cf_kernel(uid_ref, mid_ref, u_tab_ref, m_tab_ref, out_ref, u_rows_ref, m_rows_ref):
    # uid_ref / mid_ref : SMEM (B_pad,) int32 (scalar prefetch)
    # u_tab_ref         : VMEM (NU_pad, Dp) f32 full user table  [emb | bias | 1 | 0]
    # m_tab_ref         : VMEM (NM_pad, Dp) f32 full movie table [emb | 1 | bias | 0]
    # out_ref           : VMEM (1, 1, TILE_B) f32 predictions for this tile
    # u_rows_ref / m_rows_ref : VMEM (TILE_B, Dp) f32 gather scratch
    tb = out_ref.shape[-1]
    base = pl.program_id(0) * tb

    # Gather TILE_B rows from each VMEM-resident table.
    # Destination row index is static (Python-unrolled), source row is a dynamic
    # single-row sublane slice of the resident table.
    for j in range(tb):
        uid = uid_ref[base + j]
        mid = mid_ref[base + j]
        u_rows_ref[pl.ds(j, 1), :] = u_tab_ref[pl.ds(uid, 1), :]
        m_rows_ref[pl.ds(j, 1), :] = m_tab_ref[pl.ds(mid, 1), :]

    # (TILE_B, Dp) elementwise product on the VPU, lane reduction on the XLU.
    # The two augmented columns carry the biases, so this is the full prediction.
    prod = u_rows_ref[...] * m_rows_ref[...]
    dots = jnp.sum(prod, axis=-1)                     # (TILE_B,)
    out_ref[0, 0, :] = dots.astype(out_ref.dtype)


def collaborative_filtering(user_ids, movie_ids, user_emb, movie_emb,
                            user_bias, movie_bias, tile_b=TILE_B):
    """Pallas equivalent of CollaborativeFiltering.forward -> (B,) float32."""
    B = user_ids.shape[0]
    NU, D = user_emb.shape
    NM = movie_emb.shape[0]
    f32 = jnp.float32

    # ---- one-time packing (wrapper side): augment + pad tables ----
    Dp = _round_up(D + 2, 128)                        # lane-pad to a multiple of 128
    pad_cols = Dp - (D + 2)
    u_aug = jnp.concatenate(
        [user_emb.astype(f32),
         user_bias.reshape(NU, 1).astype(f32),
         jnp.ones((NU, 1), f32),
         jnp.zeros((NU, pad_cols), f32)], axis=1)
    m_aug = jnp.concatenate(
        [movie_emb.astype(f32),
         jnp.ones((NM, 1), f32),
         movie_bias.reshape(NM, 1).astype(f32),
         jnp.zeros((NM, pad_cols), f32)], axis=1)
    NU_pad = _round_up(NU, 8)
    NM_pad = _round_up(NM, 8)
    u_aug = jnp.pad(u_aug, ((0, NU_pad - NU), (0, 0)))
    m_aug = jnp.pad(m_aug, ((0, NM_pad - NM), (0, 0)))

    # Clip ids to valid range (avoids OOB gathers) and pad the batch to a whole tile.
    B_pad = _round_up(max(B, 1), tile_b)
    uid = jnp.pad(jnp.clip(user_ids.astype(jnp.int32), 0, NU - 1), (0, B_pad - B))
    mid = jnp.pad(jnp.clip(movie_ids.astype(jnp.int32), 0, NM - 1), (0, B_pad - B))
    num_tiles = B_pad // tile_b

    # VMEM budget: (double-buffered) resident tables + gather scratch + output + headroom.
    # TODO(synk): tables that do not fit VMEM (especially v7x's 64 MiB) need a manual-DMA
    # gather fallback (memory_space=pl.ANY + pltpu.make_async_copy) instead of full residency.
    table_bytes = 4 * (u_aug.size + m_aug.size)
    vmem_needed = 2 * table_bytes + 2 * 4 * tile_b * Dp + 4 * 4 * tile_b + (4 << 20)
    vmem_limit = int(min(max(vmem_needed, 32 << 20), 64 << 20))

    out = pl.pallas_call(
        cf_kernel,
        out_shape=jax.ShapeDtypeStruct((num_tiles, 1, tile_b), jnp.float32),
        grid_spec=pltpu.PrefetchScalarGridSpec(
            num_scalar_prefetch=2,                    # uid, mid -> SMEM
            grid=(num_tiles,),
            in_specs=[
                # Full augmented tables, VMEM-resident (constant block index -> fetched once).
                pl.BlockSpec((NU_pad, Dp), lambda t, u, m: (0, 0)),
                pl.BlockSpec((NM_pad, Dp), lambda t, u, m: (0, 0)),
            ],
            out_specs=pl.BlockSpec((1, 1, tile_b), lambda t, u, m: (t, 0, 0)),
            scratch_shapes=[
                pltpu.VMEM((tile_b, Dp), jnp.float32),   # gathered user rows
                pltpu.VMEM((tile_b, Dp), jnp.float32),   # gathered movie rows
            ],
        ),
        compiler_params=pltpu.CompilerParams(
            dimension_semantics=("parallel",),        # independent tiles -> both TCs on v7x
            vmem_limit_bytes=vmem_limit,
        ),
    )(uid, mid, u_aug, m_aug)

    return out.reshape(-1)[:B]


if __name__ == "__main__":
    key = jax.random.PRNGKey(0)
    num_users, num_movies, embedding_dim = 32, 48, 50   # module default embedding_dim=50
    batch = 8

    k1, k2, k3, k4, k5, k6 = jax.random.split(key, 6)
    # PyTorch init: normal(std=0.1) embeddings, zero biases. Use small nonzero biases here
    # so the bias path of the forward is actually exercised by the check.
    user_emb = 0.1 * jax.random.normal(k1, (num_users, embedding_dim), jnp.float32)
    movie_emb = 0.1 * jax.random.normal(k2, (num_movies, embedding_dim), jnp.float32)
    user_bias = 0.1 * jax.random.normal(k5, (num_users,), jnp.float32)
    movie_bias = 0.1 * jax.random.normal(k6, (num_movies,), jnp.float32)

    user_ids = jax.random.randint(k3, (batch,), 0, num_users, dtype=jnp.int32)
    movie_ids = jax.random.randint(k4, (batch,), 0, num_movies, dtype=jnp.int32)

    out = collaborative_filtering(user_ids, movie_ids, user_emb, movie_emb,
                                  user_bias, movie_bias)
    out = jax.block_until_ready(out)

    # Pure-JAX reference of the PyTorch forward.
    ref = (jnp.sum(user_emb[user_ids] * movie_emb[movie_ids], axis=1)
           + user_bias[user_ids] + movie_bias[movie_ids])
    assert out.shape == (batch,)
    assert jnp.allclose(out, ref, atol=1e-5), (out, ref)

    print("KERNEL_OK")
</pallas_src>

<mosaic_0001>
module attributes {stable_mosaic.version = 11 : i64} {
  func.func @cf_kernel(%arg0: i32, %arg1: memref<128xi32, #tpu.memory_space<smem>>, %arg2: memref<128xi32, #tpu.memory_space<smem>>, %arg3: memref<32x128xf32, #tpu.memory_space<vmem>>, %arg4: memref<48x128xf32, #tpu.memory_space<vmem>>, %arg5: memref<1x1x128xf32, #tpu.memory_space<vmem>>, %arg6: memref<128x128xf32, #tpu.memory_space<vmem>>, %arg7: memref<128x128xf32, #tpu.memory_space<vmem>>) attributes {dimension_semantics = [#tpu.dimension_semantics<parallel>], iteration_bounds = array<i64: 1>, scalar_prefetch = 2 : i64, scratch_operands = 2 : i64, tpu.core_type = #tpu.core_type<tc>, window_params = [{pipeline_mode = #tpu.pipeline_mode<synchronous>, transform_indices = @transform_0, window_bounds = array<i64: 32, 128>}, {pipeline_mode = #tpu.pipeline_mode<synchronous>, transform_indices = @transform_1, window_bounds = array<i64: 48, 128>}, {transform_indices = @transform_2, window_bounds = array<i64: 1, 1, 128>}]} {
    %c128_i32 = arith.constant 128 : i32
    %0 = arith.muli %arg0, %c128_i32 : i32
    %c0_i32 = arith.constant 0 : i32
    %1 = arith.addi %0, %c0_i32 : i32
    %2 = arith.index_cast %1 : i32 to index
    %3 = memref.load %arg1[%2] : memref<128xi32, #tpu.memory_space<smem>>
    %c0_i32_0 = arith.constant 0 : i32
    %4 = arith.addi %0, %c0_i32_0 : i32
    %5 = arith.index_cast %4 : i32 to index
    %6 = memref.load %arg2[%5] : memref<128xi32, #tpu.memory_space<smem>>
    %7 = arith.index_cast %3 : i32 to index
    %c0 = arith.constant 0 : index
    %8 = vector.load %arg3[%7, %c0] : memref<32x128xf32, #tpu.memory_space<vmem>>, vector<1x128xf32>
    %c0_1 = arith.constant 0 : index
    %c0_2 = arith.constant 0 : index
    %9 = vector.load %arg6[%c0_1, %c0_2] : memref<128x128xf32, #tpu.memory_space<vmem>>, vector<1x128xf32>
    tpu.vector_store %arg6[%c0_1, %c0_2], %8 {strides = array<i32>} : memref<128x128xf32, #tpu.memory_space<vmem>>, vector<1x128xf32>,
    %10 = arith.index_cast %6 : i32 to index
    %c0_3 = arith.constant 0 : index
    %11 = vector.load %arg4[%10, %c0_3] : memref<48x128xf32, #tpu.memory_space<vmem>>, vector<1x128xf32>
    %c0_4 = arith.constant 0 : index
    %c0_5 = arith.constant 0 : index
    %12 = vector.load %arg7[%c0_4, %c0_5] : memref<128x128xf32, #tpu.memory_space<vmem>>, vector<1x128xf32>
    tpu.vector_store %arg7[%c0_4, %c0_5], %11 {strides = array<i32>} : memref<128x128xf32, #tpu.memory_space<vmem>>, vector<1x128xf32>,
    %c1_i32 = arith.constant 1 : i32
    %13 = arith.addi %0, %c1_i32 : i32
    %14 = arith.index_cast %13 : i32 to index
    %15 = memref.load %arg1[%14] : memref<128xi32, #tpu.memory_space<smem>>
    %c1_i32_6 = arith.constant 1 : i32
    %16 = arith.addi %0, %c1_i32_6 : i32
    %17 = arith.index_cast %16 : i32 to index
    %18 = memref.load %arg2[%17] : memref<128xi32, #tpu.memory_space<smem>>
    %19 = arith.index_cast %15 : i32 to index
    %c0_7 = arith.constant 0 : index
    %20 = vector.load %arg3[%19, %c0_7] : memref<32x128xf32, #tpu.memory_space<vmem>>, vector<1x128xf32>
    %c1 = arith.constant 1 : index
    %c0_8 = arith.constant 0 : index
    %21 = vector.load %arg6[%c1, %c0_8] : memref<128x128xf32, #tpu.memory_space<vmem>>, vector<1x128xf32>
    tpu.vector_store %arg6[%c1, %c0_8], %20 {strides = array<i32>} : memref<128x128xf32, #tpu.memory_space<vmem>>, vector<1x128xf32>,
    %22 = arith.index_cast %18 : i32 to index
    %c0_9 = arith.constant 0 : index
    %23 = vector.load %arg4[%22, %c0_9] : memref<48x128xf32, #tpu.memory_space<vmem>>, vector<1x128xf32>
    %c1_10 = arith.constant 1 : index
    %c0_11 = arith.constant 0 : index
    %24 = vector.load %arg7[%c1_10, %c0_11] : memref<128x128xf32, #tpu.memory_space<vmem>>, vector<1x128xf32>
    tpu.vector_store %arg7[%c1_10, %c0_11], %23 {strides = array<i32>} : memref<128x128xf32, #tpu.memory_space<vmem>>, vector<1x128xf32>,
    %c2_i32 = arith.constant 2 : i32
    %25 = arith.addi %0, %c2_i32 : i32
    %26 = arith.index_cast %25 : i32 to index
    %27 = memref.load %arg1[%26] : memref<128xi32, #tpu.memory_space<smem>>
    %c2_i32_12 = arith.constant 2 : i32
    %28 = arith.addi %0, %c2_i32_12 : i32
    %29 = arith.index_cast %28 : i32 to index
    %30 = memref.load %arg2[%29] : memref<128xi32, #tpu.memory_space<smem>>
    %31 = arith.index_cast %27 : i32 to index
    %c0_13 = arith.constant 0 : index
    %32 = vector.load %arg3[%31, %c0_13] : memref<32x128xf32, #tpu.memory_space<vmem>>, vector<1x128xf32>
    %c2 = arith.constant 2 : index
    %c0_14 = arith.constant 0 : index
    %33 = vector.load %arg6[%c2, %c0_14] : memref<128x128xf32, #tpu.memory_space<vmem>>, vector<1x128xf32>
    tpu.vector_store %arg6[%c2, %c0_14], %32 {strides = array<i32>} : memref<128x128xf32, #tpu.memory_space<vmem>>, vector<1x128xf32>,
    %34 = arith.index_cast %30 : i32 to index
    %c0_15 = arith.constant 0 : index
    %35 = vector.load %arg4[%34, %c0_15] : memref<48x128xf32, #tpu.memory_space<vmem>>, vector<1x128xf32>
    %c2_16 = arith.constant 2 : index
    %c0_17 = arith.constant 0 : index
    %36 = vector.load %arg7[%c2_16, %c0_17] : memref<128x128xf32, #tpu.memory_space<vmem>>, vector<1x128xf32>
    tpu.vector_store %arg7[%c2_16, %c0_17], %35 {strides = array<i32>} : memref<128x128xf32, #tpu.memory_space<vmem>>, vector<1x128xf32>,
    %c3_i32 = arith.constant 3 : i32
    %37 = arith.addi %0, %c3_i32 : i32
    %38 = arith.index_cast %37 : i32 to index
    %39 = memref.load %arg1[%38] : memref<128xi32, #tpu.memory_space<smem>>
    %c3_i32_18 = arith.constant 3 : i32
    %40 = arith.addi %0, %c3_i32_18 : i32
    %41 = arith.index_cast %40 : i32 to index
    %42 = memref.load %arg2[%41] : memref<128xi32, #tpu.memory_space<smem>>
    %43 = arith.index_cast %39 : i32 to index
    %c0_19 = arith.constant 0 : index
    %44 = vector.load %arg3[%43, %c0_19] : memref<32x128xf32, #tpu.memory_space<vmem>>, vector<1x128xf32>
    %c3 = arith.constant 3 : index
    %c0_20 = arith.constant 0 : index
    %45 = vector.load %arg6[%c3, %c0_20] : memref<128x128xf32, #tpu.memory_space<vmem>>, vector<1x128xf32>
    tpu.vector_store %arg6[%c3, %c0_20], %44 {strides = array<i32>} : memref<128x128xf32, #tpu.memory_space<vmem>>, vector<1x128xf32>,
    %46 = arith.index_cast %42 : i32 to index
    %c0_21 = arith.constant 0 : index
    %47 = vector.load %arg4[%46, %c0_21] : memref<48x128xf32, #tpu.memory_space<vmem>>, vector<1x128xf32>
    %c3_22 = arith.constant 3 : index
    %c0_23 = arith.constant 0 : index
    %48 = vector.load %arg7[%c3_22, %c0_23] : memref<128x128xf32, #tpu.memory_space<vmem>>, vector<1x128xf32>
    tpu.vector_store %arg7[%c3_22, %c0_23], %47 {strides = array<i32>} : memref<128x128xf32, #tpu.memory_space<vmem>>, vector<1x128xf32>,
    %c4_i32 = arith.constant 4 : i32
    %49 = arith.addi %0, %c4_i32 : i32
    %50 = arith.index_cast %49 : i32 to index
    %51 = memref.load %arg1[%50] : memref<128xi32, #tpu.memory_space<smem>>
    %c4_i32_24 = arith.constant 4 : i32
    %52 = arith.addi %0, %c4_i32_24 : i32
    %53 = arith.index_cast %52 : i32 to index
    %54 = memref.load %arg2[%53] : memref<128xi32, #tpu.memory_space<smem>>
    %55 = arith.index_cast %51 : i32 to index
    %c0_25 = arith.constant 0 : index
    %56 = vector.load %arg3[%55, %c0_25] : memref<32x128xf32, #tpu.memory_space<vmem>>, vector<1x128xf32>
    %c4 = arith.constant 4 : index
    %c0_26 = arith.constant 0 : index
    %57 = vector.load %arg6[%c4, %c0_26] : memref<128x128xf32, #tpu.memory_space<vmem>>, vector<1x128xf32>
    tpu.vector_store %arg6[%c4, %c0_26], %56 {strides = array<i32>} : memref<128x128xf32, #tpu.memory_space<vmem>>, vector<1x128xf32>,
    %58 = arith.index_cast %54 : i32 to index
    %c0_27 = arith.constant 0 : index
    %59 = vector.load %arg4[%58, %c0_27] : memref<48x128xf32, #tpu.memory_space<vmem>>, vector<1x128xf32>
    %c4_28 = arith.constant 4 : index
    %c0_29 = arith.constant 0 : index
    %60 = vector.load %arg7[%c4_28, %c0_29] : memref<128x128xf32, #tpu.memory_space<vmem>>, vector<1x128xf32>
    tpu.vector_store %arg7[%c4_28, %c0_29], %59 {strides = array<i32>} : memref<128x128xf32, #tpu.memory_space<vmem>>, vector<1x128xf32>,
    %c5_i32 = arith.constant 5 : i32
    %61 = arith.addi %0, %c5_i32 : i32
    %62 = arith.index_cast %61 : i32 to index
    %63 = memref.load %arg1[%62] : memref<128xi32, #tpu.memory_space<smem>>
    %c5_i32_30 = arith.constant 5 : i32
    %64 = arith.addi %0, %c5_i32_30 : i32
    %65 = arith.index_cast %64 : i32 to index
    %66 = memref.load %arg2[%65] : memref<128xi32, #tpu.memory_space<smem>>
    %67 = arith.index_cast %63 : i32 to index
    %c0_31 = arith.constant 0 : index
    %68 = vector.load %arg3[%67, %c0_31] : memref<32x128xf32, #tpu.memory_space<vmem>>, vector<1x128xf32>
    %c5 = arith.constant 5 : index
    %c0_32 = arith.constant 0 : index
    %69 = vector.load %arg6[%c5, %c0_32] : memref<128x128xf32, #tpu.memory_space<vmem>>, vector<1x128xf32>
    tpu.vector_store %arg6[%c5, %c0_32], %68 {strides = array<i32>} : memref<128x128xf32, #tpu.memory_space<vmem>>, vector<1x128xf32>,
    %70 = arith.index_cast %66 : i32 to index
    %c0_33 = arith.constant 0 : index
    %71 = vector.load %arg4[%70, %c0_33] : memref<48x128xf32, #tpu.memory_space<vmem>>, vector<1x128xf32>
    %c5_34 = arith.constant 5 : index
    %c0_35 = arith.constant 0 : index
    %72 = vector.load %arg7[%c5_34, %c0_35] : memref<128x128xf32, #tpu.memory_space<vmem>>, vector<1x128xf32>
    tpu.vector_store %arg7[%c5_34, %c0_35], %71 {strides = array<i32>} : memref<128x128xf32, #tpu.memory_space<vmem>>, vector<1x128xf32>,
    %c6_i32 = arith.constant 6 : i32
    %73 = arith.addi %0, %c6_i32 : i32
    %74 = arith.index_cast %73 : i32 to index
    %75 = memref.load %arg1[%74] : memref<128xi32, #tpu.memory_space<smem>>
    %c6_i32_36 = arith.constant 6 : i32
    %76 = arith.addi %0, %c6_i32_36 : i32
    %77 = arith.index_cast %76 : i32 to index
    %78 = memref.load %arg2[%77] : memref<128xi32, #tpu.memory_space<smem>>
    %79 = arith.index_cast %75 : i32 to index
    %c0_37 = arith.constant 0 : index
    %80 = vector.load %arg3[%79, %c0_37] : memref<32x128xf32, #tpu.memory_space<vmem>>, vector<1x128xf32>
    %c6 = arith.constant 6 : index
    %c0_38 = arith.constant 0 : index
    %81 = vector.load %arg6[%c6, %c0_38] : memref<128x128xf32, #tpu.memory_space<vmem>>, vector<1x128xf32>
    tpu.vector_store %arg6[%c6, %c0_38], %80 {strides = array<i32>} : memref<128x128xf32, #tpu.memory_space<vmem>>, vector<1x128xf32>,
    %82 = arith.index_cast %78 : i32 to index
    %c0_39 = arith.constant 0 : index
    %83 = vector.load %arg4[%82, %c0_39] : memref<48x128xf32, #tpu.memory_space<vmem>>, vector<1x128xf32>
    %c6_40 = arith.constant 6 : index
    %c0_41 = arith.constant 0 : index
    %84 = vector.load %arg7[%c6_40, %c0_41] : memref<128x128xf32, #tpu.memory_space<vmem>>, vector<1x128xf32>
    tpu.vector_store %arg7[%c6_40, %c0_41], %83 {strides = array<i32>} : memref<128x128xf32, #tpu.memory_space<vmem>>, vector<1x128xf32>,
    %c7_i32 = arith.constant 7 : i32
    %85 = arith.addi %0, %c7_i32 : i32
    %86 = arith.index_cast %85 : i32 to index
    %87 = memref.load %arg1[%86] : memref<128xi32, #tpu.memory_space<smem>>
    %c7_i32_42 = arith.constant 7 : i32
    %88 = arith.addi %0, %c7_i32_42 : i32
    %89 = arith.index_cast %88 : i32 to index
    %90 = memref.load %arg2[%89] : memref<128xi32, #tpu.memory_space<smem>>
    %91 = arith.index_cast %87 : i32 to index
    %c0_43 = arith.constant 0 : index
    %92 = vector.load %arg3[%91, %c0_43] : memref<32x128xf32, #tpu.memory_space<vmem>>, vector<1x128xf32>
    %c7 = arith.constant 7 : index
    %c0_44 = arith.constant 0 : index
    %93 = vector.load %arg6[%c7, %c0_44] : memref<128x128xf32, #tpu.memory_space<vmem>>, vector<1x128xf32>
    tpu.vector_store %arg6[%c7, %c0_44], %92 {strides = array<i32>} : memref<128x128xf32, #tpu.memory_space<vmem>>, vector<1x128xf32>,
    %94 = arith.index_cast %90 : i32 to index
    %c0_45 = arith.constant 0 : index
    %95 = vector.load %arg4[%94, %c0_45] : memref<48x128xf32, #tpu.memory_space<vmem>>, vector<1x128xf32>
    %c7_46 = arith.constant 7 : index
    %c0_47 = arith.constant 0 : index
    %96 = vector.load %arg7[%c7_46, %c0_47] : memref<128x128xf32, #tpu.memory_space<vmem>>, vector<1x128xf32>
    tpu.vector_store %arg7[%c7_46, %c0_47], %95 {strides = array<i32>} : memref<128x128xf32, #tpu.memory_space<vmem>>, vector<1x128xf32>,
    %c8_i32 = arith.constant 8 : i32
    %97 = arith.addi %0, %c8_i32 : i32
    %98 = arith.index_cast %97 : i32 to index
    %99 = memref.load %arg1[%98] : memref<128xi32, #tpu.memory_space<smem>>
    %c8_i32_48 = arith.constant 8 : i32
    %100 = arith.addi %0, %c8_i32_48 : i32
    %101 = arith.index_cast %100 : i32 to index
    %102 = memref.load %arg2[%101] : memref<128xi32, #tpu.memory_space<smem>>
    %103 = arith.index_cast %99 : i32 to index
    %c0_49 = arith.constant 0 : index
    %104 = vector.load %arg3[%103, %c0_49] : memref<32x128xf32, #tpu.memory_space<vmem>>, vector<1x128xf32>
    %c8 = arith.constant 8 : index
    %c0_50 = arith.constant 0 : index
    %105 = vector.load %arg6[%c8, %c0_50] : memref<128x128xf32, #tpu.memory_space<vmem>>, vector<1x128xf32>
    tpu.vector_store %arg6[%c8, %c0_50], %104 {strides = array<i32>} : memref<128x128xf32, #tpu.memory_space<vmem>>, vector<1x128xf32>,
    %106 = arith.index_cast %102 : i32 to index
    %c0_51 = arith.constant 0 : index
    %107 = vector.load %arg4[%106, %c0_51] : memref<48x128xf32, #tpu.memory_space<vmem>>, vector<1x128xf32>
    %c8_52 = arith.constant 8 : index
    %c0_53 = arith.constant 0 : index
    %108 = vector.load %arg7[%c8_52, %c0_53] : memref<128x128xf32, #tpu.memory_space<vmem>>, vector<1x128xf32>
    tpu.vector_store %arg7[%c8_52, %c0_53], %107 {strides = array<i32>} : memref<128x128xf32, #tpu.memory_space<vmem>>, vector<1x128xf32>,
    %c9_i32 = arith.constant 9 : i32
    %109 = arith.addi %0, %c9_i32 : i32
    %110 = arith.index_cast %109 : i32 to index
    %111 = memref.load %arg1[%110] : memref<128xi32, #tpu.memory_space<smem>>
    %c9_i32_54 = arith.constant 9 : i32
    %112 = arith.addi %0, %c9_i32_54 : i32
    %113 = arith.index_cast %112 : i32 to index
    %114 = memref.load %arg2[%113] : memref<128xi32, #tpu.memory_space<smem>>
    %115 = arith.index_cast %111 : i32 to index
    %c0_55 = arith.constant 0 : index
    %116 = vector.load %arg3[%115, %c0_55] : memref<32x128xf32, #tpu.memory_space<vmem>>, vector<1x128xf32>
    %c9 = arith.constant 9 : index
    %c0_56 = arith.constant 0 : index
    %117 = vector.load %arg6[%c9, %c0_56] : memref<128x128xf32, #tpu.memory_space<vmem>>, vector<1x128xf32>
    tpu.vector_store %arg6[%c9, %c0_56], %116 {strides = array<i32>} : memref<128x128xf32, #tpu.memory_space<vmem>>, vector<1x128xf32>,
    %118 = arith.index_cast %114 : i32 to index
    %c0_57 = arith.constant 0 : index
    %119 = vector.load %arg4[%118, %c0_57] : memref<48x128xf32, #tpu.memory_space<vmem>>, vector<1x128xf32>
    %c9_58 = arith.constant 9 : index
    %c0_59 = arith.constant 0 : index
    %120 = vector.load %arg7[%c9_58, %c0_59] : memref<128x128xf32, #tpu.memory_space<vmem>>, vector<1x128xf32>
    tpu.vector_store %arg7[%c9_58, %c0_59], %119 {strides = array<i32>} : memref<128x128xf32, #tpu.memory_space<vmem>>, vector<1x128xf32>,
    %c10_i32 = arith.constant 10 : i32
    %121 = arith.addi %0, %c10_i32 : i32
    %122 = arith.index_cast %121 : i32 to index
    %123 = memref.load %arg1[%122] : memref<128xi32, #tpu.memory_space<smem>>
    %c10_i32_60 = arith.constant 10 : i32
    %124 = arith.addi %0, %c10_i32_60 : i32
    %125 = arith.index_cast %124 : i32 to index
    %126 = memref.load %arg2[%125] : memref<128xi32, #tpu.memory_space<smem>>
    %127 = arith.index_cast %123 : i32 to index
    %c0_61 = arith.constant 0 : index
    %128 = vector.load %arg3[%127, %c0_61] : memref<32x128xf32, #tpu.memory_space<vmem>>, vector<1x128xf32>
    %c10 = arith.constant 10 : index
    %c0_62 = arith.constant 0 : index
    %129 = vector.load %arg6[%c10, %c0_62] : memref<128x128xf32, #tpu.memory_space<vmem>>, vector<1x128xf32>
    tpu.vector_store %arg6[%c10, %c0_62], %128 {strides = array<i32>} : memref<128x128xf32, #tpu.memory_space<vmem>>, vector<1x128xf32>,
    %130 = arith.index_cast %126 : i32 to index
    %c0_63 = arith.constant 0 : index
    %131 = vector.load %arg4[%130, %c0_63] : memref<48x128xf32, #tpu.memory_space<vmem>>, vector<1x128xf32>
    %c10_64 = arith.constant 10 : index
    %c0_65 = arith.constant 0 : index
    %132 = vector.load %arg7[%c10_64, %c0_65] : memref<128x128xf32, #tpu.memory_space<vmem>>, vector<1x128xf32>
    tpu.vector_store %arg7[%c10_64, %c0_65], %131 {strides = array<i32>} : memref<128x128xf32, #tpu.memory_space<vmem>>, vector<1x128xf32>,
    %c11_i32 = arith.constant 11 : i32
    %133 = arith.addi %0, %c11_i32 : i32
    %134 = arith.index_cast %133 : i32 to index
    %135 = memref.load %arg1[%134] : memref<128xi32, #tpu.memory_space<smem>>
    %c11_i32_66 = arith.constant 11 : i32
    %136 = arith.addi %0, %c11_i32_66 : i32
    %137 = arith.index_cast %136 : i32 to index
    %138 = memref.load %arg2[%137] : memref<128xi32, #tpu.memory_space<smem>>
    %139 = arith.index_cast %135 : i32 to index
    %c0_67 = arith.constant 0 : index
    %140 = vector.load %arg3[%139, %c0_67] : memref<32x128xf32, #tpu.memory_space<vmem>>, vector<1x128xf32>
    %c11 = arith.constant 11 : index
    %c0_68 = arith.constant 0 : index
    %141 = vector.load %arg6[%c11, %c0_68] : memref<128x128xf32, #tpu.memory_space<vmem>>, vector<1x128xf32>
    tpu.vector_store %arg6[%c11, %c0_68], %140 {strides = array<i32>} : memref<128x128xf32, #tpu.memory_space<vmem>>, vector<1x128xf32>,
    %142 = arith.index_cast %138 : i32 to index
    %c0_69 = arith.constant 0 : index
    %143 = vector.load %arg4[%142, %c0_69] : memref<48x128xf32, #tpu.memory_space<vmem>>, vector<1x128xf32>
    %c11_70 = arith.constant 11 : index
    %c0_71 = arith.constant 0 : index
    %144 = vector.load %arg7[%c11_70, %c0_71] : memref<128x128xf32, #tpu.memory_space<vmem>>, vector<1x128xf32>
    tpu.vector_store %arg7[%c11_70, %c0_71], %143 {strides = array<i32>} : memref<128x128xf32, #tpu.memory_space<vmem>>, vector<1x128xf32>,
    %c12_i32 = arith.constant 12 : i32
    %145 = arith.addi %0, %c12_i32 : i32
    %146 = arith.index_cast %145 : i32 to index
    %147 = memref.load %arg1[%146] : memref<128xi32, #tpu.memory_space<smem>>
    %c12_i32_72 = arith.constant 12 : i32
    %148 = arith.addi %0, %c12_i32_72 : i32
    %149 = arith.index_cast %148 : i32 to index
    %150 = memref.load %arg2[%149] : memref<128xi32, #tpu.memory_space<smem>>
    %151 = arith.index_cast %147 : i32 to index
    %c0_73 = arith.constant 0 : index
    %152 = vector.load %arg3[%151, %c0_73] : memref<32x128xf32, #tpu.memory_space<vmem>>, vector<1x128xf32>
    %c12 = arith.constant 12 : index
    %c0_74 = arith.constant 0 : index
    %153 = vector.load %arg6[%c12, %c0_74] : memref<128x128xf32, #tpu.memory_space<vmem>>, vector<1x128xf32>
    tpu.vector_store %arg6[%c12, %c0_74], %152 {strides = array<i32>} : memref<128x128xf32, #tpu.memory_space<vmem>>, vector<1x128xf32>,
    %154 = arith.index_cast %150 : i32 to index
    %c0_75 = arith.constant 0 : index
    %155 = vector.load %arg4[%154, %c0_75] : memref<48x128xf32, #tpu.memory_space<vmem>>, vector<1x128xf32>
    %c12_76 = arith.constant 12 : index
    %c0_77 = arith.constant 0 : index
    %156 = vector.load %arg7[%c12_76, %c0_77] : memref<128x128xf32, #tpu.memory_space<vmem>>, vector<1x128xf32>
    tpu.vector_store %arg7[%c12_76, %c0_77], %155 {strides = array<i32>} : memref<128x128xf32, #tpu.memory_space<vmem>>, vector<1x128xf32>,
    %c13_i32 = arith.constant 13 : i32
    %157 = arith.addi %0, %c13_i32 : i32
    %158 = arith.index_cast %157 : i32 to index
    %159 = memref.load %arg1[%158] : memref<128xi32, #tpu.memory_space<smem>>
    %c13_i32_78 = arith.constant 13 : i32
    %160 = arith.addi %0, %c13_i32_78 : i32
    %161 = arith.index_cast %160 : i32 to index
    %162 = memref.load %arg2[%161] : memref<128xi32, #tpu.memory_space<smem>>
    %163 = arith.index_cast %159 : i32 to index
    %c0_79 = arith.constant 0 : index
    %164 = vector.load %arg3[%163, %c0_79] : memref<32x128xf32, #tpu.memory_space<vmem>>, vector<1x128xf32>
    %c13 = arith.constant 13 : index
    %c0_80 = arith.constant 0 : index
    %165 = vector.load %arg6[%c13, %c0_80] : memref<128x128xf32, #tpu.memory_space<vmem>>, vector<1x128xf32>
    tpu.vector_store %arg6[%c13, %c0_80], %164 {strides = array<i32>} : memref<128x128xf32, #tpu.memory_space<vmem>>, vector<1x128xf32>,
    %166 = arith.index_cast %162 : i32 to index
    %c0_81 = arith.constant 0 : index
    %167 = vector.load %arg4[%166, %c0_81] : memref<48x128xf32, #tpu.memory_space<vmem>>, vector<1x128xf32>
    %c13_82 = arith.constant 13 : index
    %c0_83 = arith.constant 0 : index
    %168 = vector.load %arg7[%c13_82, %c0_83] : memref<128x128xf32, #tpu.memory_space<vmem>>, vector<1x128xf32>
    tpu.vector_store %arg7[%c13_82, %c0_83], %167 {strides = array<i32>} : memref<128x128xf32, #tpu.memory_space<vmem>>, vector<1x128xf32>,
    %c14_i32 = arith.constant 14 : i32
    %169 = arith.addi %0, %c14_i32 : i32
    %170 = arith.index_cast %169 : i32 to index
    %171 = memref.load %arg1[%170] : memref<128xi32, #tpu.memory_space<smem>>
    %c14_i32_84 = arith.constant 14 : i32
    %172 = arith.addi %0, %c14_i32_84 : i32
    %173 = arith.index_cast %172 : i32 to index
    %174 = memref.load %arg2[%173] : memref<128xi32, #tpu.memory_space<smem>>
    %175 = arith.index_cast %171 : i32 to index
    %c0_85 = arith.constant 0 : index
    %176 = vector.load %arg3[%175, %c0_85] : memref<32x128xf32, #tpu.memory_space<vmem>>, vector<1x128xf32>
    %c14 = arith.constant 14 : index
    %c0_86 = arith.constant 0 : index
    %177 = vector.load %arg6[%c14, %c0_86] : memref<128x128xf32, #tpu.memory_space<vmem>>, vector<1x128xf32>
    tpu.vector_store %arg6[%c14, %c0_86], %176 {strides = array<i32>} : memref<128x128xf32, #tpu.memory_space<vmem>>, vector<1x128xf32>,
    %178 = arith.index_cast %174 : i32 to index
    %c0_87 = arith.constant 0 : index
    %179 = vector.load %arg4[%178, %c0_87] : memref<48x128xf32, #tpu.memory_space<vmem>>, vector<1x128xf32>
    %c14_88 = arith.constant 14 : index
    %c0_89 = arith.constant 0 : index
    %180 = vector.load %arg7[%c14_88, %c0_89] : memref<128x128xf32, #tpu.memory_space<vmem>>, vector<1x128xf32>
    tpu.vector_store %arg7[%c14_88, %c0_89], %179 {strides = array<i32>} : memref<128x128xf32, #tpu.memory_space<vmem>>, vector<1x128xf32>,
    %c15_i32 = arith.constant 15 : i32
    %181 = arith.addi %0, %c15_i32 : i32
    %182 = arith.index_cast %181 : i32 to index
    %183 = memref.load %arg1[%182] : memref<128xi32, #tpu.memory_space<smem>>
    %c15_i32_90 = arith.constant 15 : i32
    %184 = arith.addi %0, %c15_i32_90 : i32
    %185 = arith.index_cast %184 : i32 to index
    %186 = memref.load %arg2[%185] : memref<128xi32, #tpu.memory_space<smem>>
    %187 = arith.index_cast %183 : i32 to index
    %c0_91 = arith.constant 0 : index
    %188 = vector.load %arg3[%187, %c0_91] : memref<32x128xf32, #tpu.memory_space<vmem>>, vector<1x128xf32>
    %c15 = arith.constant 15 : index
    %c0_92 = arith.constant 0 : index
    %189 = vector.load %arg6[%c15, %c0_92] : memref<128x128xf32, #tpu.memory_space<vmem>>, vector<1x128xf32>
    tpu.vector_store %arg6[%c15, %c0_92], %188 {strides = array<i32>} : memref<128x128xf32, #tpu.memory_space<vmem>>, vector<1x128xf32>,
    %190 = arith.index_cast %186 : i32 to index
    %c0_93 = arith.constant 0 : index
    %191 = vector.load %arg4[%190, %c0_93] : memref<48x128xf32, #tpu.memory_space<vmem>>, vector<1x128xf32>
    %c15_94 = arith.constant 15 : index
    %c0_95 = arith.constant 0 : index
    %192 = vector.load %arg7[%c15_94, %c0_95] : memref<128x128xf32, #tpu.memory_space<vmem>>, vector<1x128xf32>
    tpu.vector_store %arg7[%c15_94, %c0_95], %191 {strides = array<i32>} : memref<128x128xf32, #tpu.memory_space<vmem>>, vector<1x128xf32>,
    %c16_i32 = arith.constant 16 : i32
    %193 = arith.addi %0, %c16_i32 : i32
    %194 = arith.index_cast %193 : i32 to index
    %195 = memref.load %arg1[%194] : memref<128xi32, #tpu.memory_space<smem>>
    %c16_i32_96 = arith.constant 16 : i32
    %196 = arith.addi %0, %c16_i32_96 : i32
    %197 = arith.index_cast %196 : i32 to index
    %198 = memref.load %arg2[%197] : memref<128xi32, #tpu.memory_space<smem>>
    %199 = arith.index_cast %195 : i32 to index
    %c0_97 = arith.constant 0 : index
    %200 = vector.load %arg3[%199, %c0_97] : memref<32x128xf32, #tpu.memory_space<vmem>>, vector<1x128xf32>
    %c16 = arith.constant 16 : index
    %c0_98 = arith.constant 0 : index
    %201 = vector.load %arg6[%c16, %c0_98] : memref<128x128xf32, #tpu.memory_space<vmem>>, vector<1x128xf32>
    tpu.vector_store %arg6[%c16, %c0_98], %200 {strides = array<i32>} : memref<128x128xf32, #tpu.memory_space<vmem>>, vector<1x128xf32>,
    %202 = arith.index_cast %198 : i32 to index
    %c0_99 = arith.constant 0 : index
    %203 = vector.load %arg4[%202, %c0_99] : memref<48x128xf32, #tpu.memory_space<vmem>>, vector<1x128xf32>
    %c16_100 = arith.constant 16 : index
    %c0_101 = arith.constant 0 : index
    %204 = vector.load %arg7[%c16_100, %c0_101] : memref<128x128xf32, #tpu.memory_space<vmem>>, vector<1x128xf32>
    tpu.vector_store %arg7[%c16_100, %c0_101], %203 {strides = array<i32>} : memref<128x128xf32, #tpu.memory_space<vmem>>, vector<1x128xf32>,
    %c17_i32 = arith.constant 17 : i32
    %205 = arith.addi %0, %c17_i32 : i32
    %206 = arith.index_cast %205 : i32 to index
    %207 = memref.load %arg1[%206] : memref<128xi32, #tpu.memory_space<smem>>
    %c17_i32_102 = arith.constant 17 : i32
    %208 = arith.addi %0, %c17_i32_102 : i32
    %209 = arith.index_cast %208 : i32 to index
    %210 = memref.load %arg2[%209] : memref<128xi32, #tpu.memory_space<smem>>
    %211 = arith.index_cast %207 : i32 to index
    %c0_103 = arith.constant 0 : index
    %212 = vector.load %arg3[%211, %c0_103] : memref<32x128xf32, #tpu.memory_space<vmem>>, vector<1x128xf32>
    %c17 = arith.constant 17 : index
    %c0_104 = arith.constant 0 : index
    %213 = vector.load %arg6[%c17, %c0_104] : memref<128x128xf32, #tpu.memory_space<vmem>>, vector<1x128xf32>
    tpu.vector_store %arg6[%c17, %c0_104], %212 {strides = array<i32>} : memref<128x128xf32, #tpu.memory_space<vmem>>, vector<1x128xf32>,
    %214 = arith.index_cast %210 : i32 to index
    %c0_105 = arith.constant 0 : index
    %215 = vector.load %arg4[%214, %c0_105] : memref<48x128xf32, #tpu.memory_space<vmem>>, vector<1x128xf32>
    %c17_106 = arith.constant 17 : index
    %c0_107 = arith.constant 0 : index
    %216 = vector.load %arg7[%c17_106, %c0_107] : memref<128x128xf32, #tpu.memory_space<vmem>>, vector<1x128xf32>
    tpu.vector_store %arg7[%c17_106, %c0_107], %215 {strides = array<i32>} : memref<128x128xf32, #tpu.memory_space<vmem>>, vector<1x128xf32>,
    %c18_i32 = arith.constant 18 : i32
    %217 = arith.addi %0, %c18_i32 : i32
    %218 = arith.index_cast %217 : i32 to index
    %219 = memref.load %arg1[%218] : memref<128xi32, #tpu.memory_space<smem>>
    %c18_i32_108 = arith.constant 18 : i32
    %220 = arith.addi %0, %c18_i32_108 : i32
    %221 = arith.index_cast %220 : i32 to index
    %222 = memref.load %arg2[%221] : memref<128xi32, #tpu.memory_space<smem>>
    %223 = arith.index_cast %219 : i32 to index
    %c0_109 = arith.constant 0 : index
    %224 = vector.load %arg3[%223, %c0_109] : memref<32x128xf32, #tpu.memory_space<vmem>>, vector<1x128xf32>
    %c18 = arith.constant 18 : index
    %c0_110 = arith.constant 0 : index
    %225 = vector.load %arg6[%c18, %c0_110] : memref<128x128xf32, #tpu.memory_space<vmem>>, vector<1x128xf32>
    tpu.vector_store %arg6[%c18, %c0_110], %224 {strides = array<i32>} : memref<128x128xf32, #tpu.memory_space<vmem>>, vector<1x128xf32>,
    %226 = arith.index_cast %222 : i32 to index
    %c0_111 = arith.constant 0 : index
    %227 = vector.load %arg4[%226, %c0_111] : memref<48x128xf32, #tpu.memory_space<vmem>>, vector<1x128xf32>
    %c18_112 = arith.constant 18 : index
    %c0_113 = arith.constant 0 : index
    %228 = vector.load %arg7[%c18_112, %c0_113] : memref<128x128xf32, #tpu.memory_space<vmem>>, vector<1x128xf32>
    tpu.vector_store %arg7[%c18_112, %c0_113], %227 {strides = array<i32>} : memref<128x128xf32, #tpu.memory_space<vmem>>, vector<1x128xf32>,
    %c19_i32 = arith.constant 19 : i32
    %229 = arith.addi %0, %c19_i32 : i32
    %230 = arith.index_cast %229 : i32 to index
    %231 = memref.load %arg1[%230] : memref<128xi32, #tpu.memory_space<smem>>
    %c19_i32_114 = arith.constant 19 : i32
    %232 = arith.addi %0, %c19_i32_114 : i32
    %233 = arith.index_cast %232 : i32 to index
    %234 = memref.load %arg2[%233] : memref<128xi32, #tpu.memory_space<smem>>
    %235 = arith.index_cast %231 : i32 to index
    %c0_115 = arith.constant 0 : index
    %236 = vector.load %arg3[%235, %c0_115] : memref<32x128xf32, #tpu.memory_space<vmem>>, vector<1x128xf32>
    %c19 = arith.constant 19 : index
    %c0_116 = arith.constant 0 : index
    %237 = vector.load %arg6[%c19, %c0_116] : memref<128x128xf32, #tpu.memory_space<vmem>>, vector<1x128xf32>
    tpu.vector_store %arg6[%c19, %c0_116], %236 {strides = array<i32>} : memref<128x128xf32, #tpu.memory_space<vmem>>, vector<1x128xf32>,
    %238 = arith.index_cast %234 : i32 to index
    %c0_117 = arith.constant 0 : index
    %239 = vector.load %arg4[%238, %c0_117] : memref<48x128xf32, #tpu.memory_space<vmem>>, vector<1x128xf32>
    %c19_118 = arith.constant 19 : index
    %c0_119 = arith.constant 0 : index
    %240 = vector.load %arg7[%c19_118, %c0_119] : memref<128x128xf32, #tpu.memory_space<vmem>>, vector<1x128xf32>
    tpu.vector_store %arg7[%c19_118, %c0_119], %239 {strides = array<i32>} : memref<128x128xf32, #tpu.memory_space<vmem>>, vector<1x128xf32>,
    %c20_i32 = arith.constant 20 : i32
    %241 = arith.addi %0, %c20_i32 : i32
    %242 = arith.index_cast %241 : i32 to index
    %243 = memref.load %arg1[%242] : memref<128xi32, #tpu.memory_space<smem>>
    %c20_i32_120 = arith.constant 20 : i32
    %244 = arith.addi %0, %c20_i32_120 : i32
    %245 = arith.index_cast %244 : i32 to index
    %246 = memref.load %arg2[%245] : memref<128xi32, #tpu.memory_space<smem>>
    %247 = arith.index_cast %243 : i32 to index
    %c0_121 = arith.constant 0 : index
    %248 = vector.load %arg3[%247, %c0_121] : memref<32x128xf32, #tpu.memory_space<vmem>>, vector<1x128xf32>
    %c20 = arith.constant 20 : index
    %c0_122 = arith.constant 0 : index
    %249 = vector.load %arg6[%c20, %c0_122] : memref<128x128xf32, #tpu.memory_space<vmem>>, vector<1x128xf32>
    tpu.vector_store %arg6[%c20, %c0_122], %248 {strides = array<i32>} : memref<128x128xf32, #tpu.memory_space<vmem>>, vector<1x128xf32>,
    %250 = arith.index_cast %246 : i32 to index
    %c0_123 = arith.constant 0 : index
    %251 = vector.load %arg4[%250, %c0_123] : memref<48x128xf32, #tpu.memory_space<vmem>>, vector<1x128xf32>
    %c20_124 = arith.constant 20 : index
    %c0_125 = arith.constant 0 : index
    %252 = vector.load %arg7[%c20_124, %c0_125] : memref<128x128xf32, #tpu.memory_space<vmem>>, vector<1x128xf32>
    tpu.vector_store %arg7[%c20_124, %c0_125], %251 {strides = array<i32>} : memref<128x128xf32, #tpu.memory_space<vmem>>, vector<1x128xf32>,
    %c21_i32 = arith.constant 21 : i32
    %253 = arith.addi %0, %c21_i32 : i32
    %254 = arith.index_cast %253 : i32 to index
    %255 = memref.load %arg1[%254] : memref<128xi32, #tpu.memory_space<smem>>
    %c21_i32_126 = arith.constant 21 : i32
    %256 = arith.addi %0, %c21_i32_126 : i32
    %257 = arith.index_cast %256 : i32 to index
    %258 = memref.load %arg2[%257] : memref<128xi32, #tpu.memory_space<smem>>
    %259 = arith.index_cast %255 : i32 to index
    %c0_127 = arith.constant 0 : index
    %260 = vector.load %arg3[%259, %c0_127] : memref<32x128xf32, #tpu.memory_space<vmem>>, vector<1x128xf32>
    %c21 = arith.constant 21 : index
    %c0_128 = arith.constant 0 : index
    %261 = vector.load %arg6[%c21, %c0_128] : memref<128x128xf32, #tpu.memory_space<vmem>>, vector<1x128xf32>
    tpu.vector_store %arg6[%c21, %c0_128], %260 {strides = array<i32>} : memref<128x128xf32, #tpu.memory_space<vmem>>, vector<1x128xf32>,
    %262 = arith.index_cast %258 : i32 to index
    %c0_129 = arith.constant 0 : index
    %263 = vector.load %arg4[%262, %c0_129] : memref<48x128xf32, #tpu.memory_space<vmem>>, vector<1x128xf32>
    %c21_130 = arith.constant 21 : index
    %c0_131 = arith.constant 0 : index
    %264 = vector.load %arg7[%c21_130, %c0_131] : memref<128x128xf32, #tpu.memory_space<vmem>>, vector<1x128xf32>
    tpu.vector_store %arg7[%c21_130, %c0_131], %263 {strides = array<i32>} : memref<128x128xf32, #tpu.memory_space<vmem>>, vector<1x128xf32>,
    %c22_i32 = arith.constant 22 : i32
    %265 = arith.addi %0, %c22_i32 : i32
    %266 = arith.index_cast %265 : i32 to index
    %267 = memref.load %arg1[%266] : memref<128xi32, #tpu.memory_space<smem>>
    %c22_i32_132 = arith.constant 22 : i32
    %268 = arith.addi %0, %c22_i32_132 : i32
    %269 = arith.index_cast %268 : i32 to index
    %270 = memref.load %arg2[%269] : memref<128xi32, #tpu.memory_space<smem>>
    %271 = arith.index_cast %267 : i32 to index
    %c0_133 = arith.constant 0 : index
    %272 = vector.load %arg3[%271, %c0_133] : memref<32x128xf32, #tpu.memory_space<vmem>>, vector<1x128xf32>
    %c22 = arith.constant 22 : index
    %c0_134 = arith.constant 0 : index
    %273 = vector.load %arg6[%c22, %c0_134] : memref<128x128xf32, #tpu.memory_space<vmem>>, vector<1x128xf32>
    tpu.vector_store %arg6[%c22, %c0_134], %272 {strides = array<i32>} : memref<128x128xf32, #tpu.memory_space<vmem>>, vector<1x128xf32>,
    %274 = arith.index_cast %270 : i32 to index
    %c0_135 = arith.constant 0 : index
    %275 = vector.load %arg4[%274, %c0_135] : memref<48x128xf32, #tpu.memory_space<vmem>>, vector<1x128xf32>
    %c22_136 = arith.constant 22 : index
    %c0_137 = arith.constant 0 : index
    %276 = vector.load %arg7[%c22_136, %c0_137] : memref<128x128xf32, #tpu.memory_space<vmem>>, vector<1x128xf32>
    tpu.vector_store %arg7[%c22_136, %c0_137], %275 {strides = array<i32>} : memref<128x128xf32, #tpu.memory_space<vmem>>, vector<1x128xf32>,
    %c23_i32 = arith.constant 23 : i32
    %277 = arith.addi %0, %c23_i32 : i32
    %278 = arith.index_cast %277 : i32 to index
    %279 = memref.load %arg1[%278] : memref<128xi32, #tpu.memory_space<smem>>
    %c23_i32_138 = arith.constant 23 : i32
    %280 = arith.addi %0, %c23_i32_138 : i32
    %281 = arith.index_cast %280 : i32 to index
    %282 = memref.load %arg2[%281] : memref<128xi32, #tpu.memory_space<smem>>
    %283 = arith.index_cast %279 : i32 to index
    %c0_139 = arith.constant 0 : index
    %284 = vector.load %arg3[%283, %c0_139] : memref<32x128xf32, #tpu.memory_space<vmem>>, vector<1x128xf32>
    %c23 = arith.constant 23 : index
    %c0_140 = arith.constant 0 : index
    %285 = vector.load %arg6[%c23, %c0_140] : memref<128x128xf32, #tpu.memory_space<vmem>>, vector<1x128xf32>
    tpu.vector_store %arg6[%c23, %c0_140], %284 {strides = array<i32>} : memref<128x128xf32, #tpu.memory_space<vmem>>, vector<1x128xf32>,
    %286 = arith.index_cast %282 : i32 to index
    %c0_141 = arith.constant 0 : index
    %287 = vector.load %arg4[%286, %c0_141] : memref<48x128xf32, #tpu.memory_space<vmem>>, vector<1x128xf32>
    %c23_142 = arith.constant 23 : index
    %c0_143 = arith.constant 0 : index
    %288 = vector.load %arg7[%c23_142, %c0_143] : memref<128x128xf32, #tpu.memory_space<vmem>>, vector<1x128xf32>
    tpu.vector_store %arg7[%c23_142, %c0_143], %287 {strides = array<i32>} : memref<128x128xf32, #tpu.memory_space<vmem>>, vector<1x128xf32>,
    %c24_i32 = arith.constant 24 : i32
    %289 = arith.addi %0, %c24_i32 : i32
    %290 = arith.index_cast %289 : i32 to index
    %291 = memref.load %arg1[%290] : memref<128xi32, #tpu.memory_space<smem>>
    %c24_i32_144 = arith.constant 24 : i32
    %292 = arith.addi %0, %c24_i32_144 : i32
    %293 = arith.index_cast %292 : i32 to index
    %294 = memref.load %arg2[%293] : memref<128xi32, #tpu.memory_space<smem>>
    %295 = arith.index_cast %291 : i32 to index
    %c0_145 = arith.constant 0 : index
    %296 = vector.load %arg3[%295, %c0_145] : memref<32x128xf32, #tpu.memory_space<vmem>>, vector<1x128xf32>
    %c24 = arith.constant 24 : index
    %c0_146 = arith.constant 0 : index
    %297 = vector.load %arg6[%c24, %c0_146] : memref<128x128xf32, #tpu.memory_space<vmem>>, vector<1x128xf32>
    tpu.vector_store %arg6[%c24, %c0_146], %296 {strides = array<i32>} : memref<128x128xf32, #tpu.memory_space<vmem>>, vector<1x128xf32>,
    %298 = arith.index_cast %294 : i32 to index
    %c0_147 = arith.constant 0 : index
    %299 = vector.load %arg4[%298, %c0_147] : memref<48x128xf32, #tpu.memory_space<vmem>>, vector<1x128xf32>
    %c24_148 = arith.constant 24 : index
    %c0_149 = arith.constant 0 : index
    %300 = vector.load %arg7[%c24_148, %c0_149] : memref<128x128xf32, #tpu.memory_space<vmem>>, vector<1x128xf32>
    tpu.vector_store %arg7[%c24_148, %c0_149], %299 {strides = array<i32>} : memref<128x128xf32, #tpu.memory_space<vmem>>, vector<1x128xf32>,
    %c25_i32 = arith.constant 25 : i32
    %301 = arith.addi %0, %c25_i32 : i32
    %302 = arith.index_cast %301 : i32 to index
    %303 = memref.load %arg1[%302] : memref<128xi32, #tpu.memory_space<smem>>
    %c25_i32_150 = arith.constant 25 : i32
    %304 = arith.addi %0, %c25_i32_150 : i32
    %305 = arith.index_cast %304 : i32 to index
    %306 = memref.load %arg2[%305] : memref<128xi32, #tpu.memory_space<smem>>
    %307 = arith.index_cast %303 : i32 to index
    %c0_151 = arith.constant 0 : index
    %308 = vector.load %arg3[%307, %c0_151] : memref<32x128xf32, #tpu.memory_space<vmem>>, vector<1x128xf32>
    %c25 = arith.constant 25 : index
    %c0_152 = arith.constant 0 : index
    %309 = vector.load %arg6[%c25, %c0_152] : memref<128x128xf32, #tpu.memory_space<vmem>>, vector<1x128xf32>
    tpu.vector_store %arg6[%c25, %c0_152], %308 {strides = array<i32>} : memref<128x128xf32, #tpu.memory_space<vmem>>, vector<1x128xf32>,
    %310 = arith.index_cast %306 : i32 to index
    %c0_153 = arith.constant 0 : index
    %311 = vector.load %arg4[%310, %c0_153] : memref<48x128xf32, #tpu.memory_space<vmem>>, vector<1x128xf32>
    %c25_154 = arith.constant 25 : index
    %c0_155 = arith.constant 0 : index
    %312 = vector.load %arg7[%c25_154, %c0_155] : memref<128x128xf32, #tpu.memory_space<vmem>>, vector<1x128xf32>
    tpu.vector_store %arg7[%c25_154, %c0_155], %311 {strides = array<i32>} : memref<128x128xf32, #tpu.memory_space<vmem>>, vector<1x128xf32>,
    %c26_i32 = arith.constant 26 : i32
    %313 = arith.addi %0, %c26_i32 : i32
    %314 = arith.index_cast %313 : i32 to index
    %315 = memref.load %arg1[%314] : memref<128xi32, #tpu.memory_space<smem>>
    %c26_i32_156 = arith.constant 26 : i32
    %316 = arith.addi %0, %c26_i32_156 : i32
    %317 = arith.index_cast %316 : i32 to index
    %318 = memref.load %arg2[%317] : memref<128xi32, #tpu.memory_space<smem>>
    %319 = arith.index_cast %315 : i32 to index
    %c0_157 = arith.constant 0 : index
    %320 = vector.load %arg3[%319, %c0_157] : memref<32x128xf32, #tpu.memory_space<vmem>>, vector<1x128xf32>
    %c26 = arith.constant 26 : index
    %c0_158 = arith.constant 0 : index
    %321 = vector.load %arg6[%c26, %c0_158] : memref<128x128xf32, #tpu.memory_space<vmem>>, vector<1x128xf32>
    tpu.vector_store %arg6[%c26, %c0_158], %320 {strides = array<i32>} : memref<128x128xf32, #tpu.memory_space<vmem>>, vector<1x128xf32>,
    %322 = arith.index_cast %318 : i32 to index
    %c0_159 = arith.constant 0 : index
    %323 = vector.load %arg4[%322, %c0_159] : memref<48x128xf32, #tpu.memory_space<vmem>>, vector<1x128xf32>
    %c26_160 = arith.constant 26 : index
    %c0_161 = arith.constant 0 : index
    %324 = vector.load %arg7[%c26_160, %c0_161] : memref<128x128xf32, #tpu.memory_space<vmem>>, vector<1x128xf32>
    tpu.vector_store %arg7[%c26_160, %c0_161], %323 {strides = array<i32>} : memref<128x128xf32, #tpu.memory_space<vmem>>, vector<1x128xf32>,
    %c27_i32 = arith.constant 27 : i32
    %325 = arith.addi %0, %c27_i32 : i32
    %326 = arith.index_cast %325 : i32 to index
    %327 = memref.load %arg1[%326] : memref<128xi32, #tpu.memory_space<smem>>
    %c27_i32_162 = arith.constant 27 : i32
    %328 = arith.addi %0, %c27_i32_162 : i32
    %329 = arith.index_cast %328 : i32 to index
    %330 = memref.load %arg2[%329] : memref<128xi32, #tpu.memory_space<smem>>
    %331 = arith.index_cast %327 : i32 to index
    %c0_163 = arith.constant 0 : index
    %332 = vector.load %arg3[%331, %c0_163] : memref<32x128xf32, #tpu.memory_space<vmem>>, vector<1x128xf32>
    %c27 = arith.constant 27 : index
    %c0_164 = arith.constant 0 : index
    %333 = vector.load %arg6[%c27, %c0_164] : memref<128x128xf32, #tpu.memory_space<vmem>>, vector<1x128xf32>
    tpu.vector_store %arg6[%c27, %c0_164], %332 {strides = array<i32>} : memref<128x128xf32, #tpu.memory_space<vmem>>, vector<1x128xf32>,
    %334 = arith.index_cast %330 : i32 to index
    %c0_165 = arith.constant 0 : index
    %335 = vector.load %arg4[%334, %c0_165] : memref<48x128xf32, #tpu.memory_space<vmem>>, vector<1x128xf32>
    %c27_166 = arith.constant 27 : index
    %c0_167 = arith.constant 0 : index
    %336 = vector.load %arg7[%c27_166, %c0_167] : memref<128x128xf32, #tpu.memory_space<vmem>>, vector<1x128xf32>
    tpu.vector_store %arg7[%c27_166, %c0_167], %335 {strides = array<i32>} : memref<128x128xf32, #tpu.memory_space<vmem>>, vector<1x128xf32>,
    %c28_i32 = arith.constant 28 : i32
    %337 = arith.addi %0, %c28_i32 : i32
    %338 = arith.index_cast %337 : i32 to index
    %339 = memref.load %arg1[%338] : memref<128xi32, #tpu.memory_space<smem>>
    %c28_i32_168 = arith.constant 28 : i32
    %340 = arith.addi %0, %c28_i32_168 : i32
    %341 = arith.index_cast %340 : i32 to index
    %342 = memref.load %arg2[%341] : memref<128xi32, #tpu.memory_space<smem>>
    %343 = arith.index_cast %339 : i32 to index
    %c0_169 = arith.constant 0 : index
    %344 = vector.load %arg3[%343, %c0_169] : memref<32x128xf32, #tpu.memory_space<vmem>>, vector<1x128xf32>
    %c28 = arith.constant 28 : index
    %c0_170 = arith.constant 0 : index
    %345 = vector.load %arg6[%c28, %c0_170] : memref<128x128xf32, #tpu.memory_space<vmem>>, vector<1x128xf32>
    tpu.vector_store %arg6[%c28, %c0_170], %344 {strides = array<i32>} : memref<128x128xf32, #tpu.memory_space<vmem>>, vector<1x128xf32>,
    %346 = arith.index_cast %342 : i32 to index
    %c0_171 = arith.constant 0 : index
    %347 = vector.load %arg4[%346, %c0_171] : memref<48x128xf32, #tpu.memory_space<vmem>>, vector<1x128xf32>
    %c28_172 = arith.constant 28 : index
    %c0_173 = arith.constant 0 : index
    %348 = vector.load %arg7[%c28_172, %c0_173] : memref<128x128xf32, #tpu.memory_space<vmem>>, vector<1x128xf32>
    tpu.vector_store %arg7[%c28_172, %c0_173], %347 {strides = array<i32>} : memref<128x128xf32, #tpu.memory_space<vmem>>, vector<1x128xf32>,
    %c29_i32 = arith.constant 29 : i32
    %349 = arith.addi %0, %c29_i32 : i32
    %350 = arith.index_cast %349 : i32 to index
    %351 = memref.load %arg1[%350] : memref<128xi32, #tpu.memory_space<smem>>
    %c29_i32_174 = arith.constant 29 : i32
    %352 = arith.addi %0, %c29_i32_174 : i32
    %353 = arith.index_cast %352 : i32 to index
    %354 = memref.load %arg2[%353] : memref<128xi32, #tpu.memory_space<smem>>
    %355 = arith.index_cast %351 : i32 to index
    %c0_175 = arith.constant 0 : index
    %356 = vector.load %arg3[%355, %c0_175] : memref<32x128xf32, #tpu.memory_space<vmem>>, vector<1x128xf32>
    %c29 = arith.constant 29 : index
    %c0_176 = arith.constant 0 : index
    %357 = vector.load %arg6[%c29, %c0_176] : memref<128x128xf32, #tpu.memory_space<vmem>>, vector<1x128xf32>
    tpu.vector_store %arg6[%c29, %c0_176], %356 {strides = array<i32>} : memref<128x128xf32, #tpu.memory_space<vmem>>, vector<1x128xf32>,
    %358 = arith.index_cast %354 : i32 to index
    %c0_177 = arith.constant 0 : index
    %359 = vector.load %arg4[%358, %c0_177] : memref<48x128xf32, #tpu.memory_space<vmem>>, vector<1x128xf32>
    %c29_178 = arith.constant 29 : index
    %c0_179 = arith.constant 0 : index
    %360 = vector.load %arg7[%c29_178, %c0_179] : memref<128x128xf32, #tpu.memory_space<vmem>>, vector<1x128xf32>
    tpu.vector_store %arg7[%c29_178, %c0_179], %359 {strides = array<i32>} : memref<128x128xf32, #tpu.memory_space<vmem>>, vector<1x128xf32>,
    %c30_i32 = arith.constant 30 : i32
    %361 = arith.addi %0, %c30_i32 : i32
    %362 = arith.index_cast %361 : i32 to index
    %363 = memref.load %arg1[%362] : memref<128xi32, #tpu.memory_space<smem>>
    %c30_i32_180 = arith.constant 30 : i32
    %364 = arith.addi %0, %c30_i32_180 : i32
    %365 = arith.index_cast %364 : i32 to index
    %366 = memref.load %arg2[%365] : memref<128xi32, #tpu.memory_space<smem>>
    %367 = arith.index_cast %363 : i32 to index
    %c0_181 = arith.constant 0 : index
    %368 = vector.load %arg3[%367, %c0_181] : memref<32x128xf32, #tpu.memory_space<vmem>>, vector<1x128xf32>
    %c30 = arith.constant 30 : index
    %c0_182 = arith.constant 0 : index
    %369 = vector.load %arg6[%c30, %c0_182] : memref<128x128xf32, #tpu.memory_space<vmem>>, vector<1x128xf32>
    tpu.vector_store %arg6[%c30, %c0_182], %368 {strides = array<i32>} : memref<128x128xf32, #tpu.memory_space<vmem>>, vector<1x128xf32>,
    %370 = arith.index_cast %366 : i32 to index
    %c0_183 = arith.constant 0 : index
    %371 = vector.load %arg4[%370, %c0_183] : memref<48x128xf32, #tpu.memory_space<vmem>>, vector<1x128xf32>
    %c30_184 = arith.constant 30 : index
    %c0_185 = arith.constant 0 : index
    %372 = vector.load %arg7[%c30_184, %c0_185] : memref<128x128xf32, #tpu.memory_space<vmem>>, vector<1x128xf32>
    tpu.vector_store %arg7[%c30_184, %c0_185], %371 {strides = array<i32>} : memref<128x128xf32, #tpu.memory_space<vmem>>, vector<1x128xf32>,
    %c31_i32 = arith.constant 31 : i32
    %373 = arith.addi %0, %c31_i32 : i32
    %374 = arith.index_cast %373 : i32 to index
    %375 = memref.load %arg1[%374] : memref<128xi32, #tpu.memory_space<smem>>
    %c31_i32_186 = arith.constant 31 : i32
    %376 = arith.addi %0, %c31_i32_186 : i32
    %377 = arith.index_cast %376 : i32 to index
    %378 = memref.load %arg2[%377] : memref<128xi32, #tpu.memory_space<smem>>
    %379 = arith.index_cast %375 : i32 to index
    %c0_187 = arith.constant 0 : index
    %380 = vector.load %arg3[%379, %c0_187] : memref<32x128xf32, #tpu.memory_space<vmem>>, vector<1x128xf32>
    %c31 = arith.constant 31 : index
    %c0_188 = arith.constant 0 : index
    %381 = vector.load %arg6[%c31, %c0_188] : memref<128x128xf32, #tpu.memory_space<vmem>>, vector<1x128xf32>
    tpu.vector_store %arg6[%c31, %c0_188], %380 {strides = array<i32>} : memref<128x128xf32, #tpu.memory_space<vmem>>, vector<1x128xf32>,
    %382 = arith.index_cast %378 : i32 to index
    %c0_189 = arith.constant 0 : index
    %383 = vector.load %arg4[%382, %c0_189] : memref<48x128xf32, #tpu.memory_space<vmem>>, vector<1x128xf32>
    %c31_190 = arith.constant 31 : index
    %c0_191 = arith.constant 0 : index
    %384 = vector.load %arg7[%c31_190, %c0_191] : memref<128x128xf32, #tpu.memory_space<vmem>>, vector<1x128xf32>
    tpu.vector_store %arg7[%c31_190, %c0_191], %383 {strides = array<i32>} : memref<128x128xf32, #tpu.memory_space<vmem>>, vector<1x128xf32>,
    %c32_i32 = arith.constant 32 : i32
    %385 = arith.addi %0, %c32_i32 : i32
    %386 = arith.index_cast %385 : i32 to index
    %387 = memref.load %arg1[%386] : memref<128xi32, #tpu.memory_space<smem>>
    %c32_i32_192 = arith.constant 32 : i32
    %388 = arith.addi %0, %c32_i32_192 : i32
    %389 = arith.index_cast %388 : i32 to index
    %390 = memref.load %arg2[%389] : memref<128xi32, #tpu.memory_space<smem>>
    %391 = arith.index_cast %387 : i32 to index
    %c0_193 = arith.constant 0 : index
    %392 = vector.load %arg3[%391, %c0_193] : memref<32x128xf32, #tpu.memory_space<vmem>>, vector<1x128xf32>
    %c32 = arith.constant 32 : index
    %c0_194 = arith.constant 0 : index
    %393 = vector.load %arg6[%c32, %c0_194] : memref<128x128xf32, #tpu.memory_space<vmem>>, vector<1x128xf32>
    tpu.vector_store %arg6[%c32, %c0_194], %392 {strides = array<i32>} : memref<128x128xf32, #tpu.memory_space<vmem>>, vector<1x128xf32>,
    %394 = arith.index_cast %390 : i32 to index
    %c0_195 = arith.constant 0 : index
    %395 = vector.load %arg4[%394, %c0_195] : memref<48x128xf32, #tpu.memory_space<vmem>>, vector<1x128xf32>
    %c32_196 = arith.constant 32 : index
    %c0_197 = arith.constant 0 : index
    %396 = vector.load %arg7[%c32_196, %c0_197] : memref<128x128xf32, #tpu.memory_space<vmem>>, vector<1x128xf32>
    tpu.vector_store %arg7[%c32_196, %c0_197], %395 {strides = array<i32>} : memref<128x128xf32, #tpu.memory_space<vmem>>, vector<1x128xf32>,
    %c33_i32 = arith.constant 33 : i32
    %397 = arith.addi %0, %c33_i32 : i32
    %398 = arith.index_cast %397 : i32 to index
    %399 = memref.load %arg1[%398] : memref<128xi32, #tpu.memory_space<smem>>
    %c33_i32_198 = arith.constant 33 : i32
    %400 = arith.addi %0, %c33_i32_198 : i32
    %401 = arith.index_cast %400 : i32 to index
    %402 = memref.load %arg2[%401] : memref<128xi32, #tpu.memory_space<smem>>
    %403 = arith.index_cast %399 : i32 to index
    %c0_199 = arith.constant 0 : index
    %404 = vector.load %arg3[%403, %c0_199] : memref<32x128xf32, #tpu.memory_space<vmem>>, vector<1x128xf32>
    %c33 = arith.constant 33 : index
    %c0_200 = arith.constant 0 : index
    %405 = vector.load %arg6[%c33, %c0_200] : memref<128x128xf32, #tpu.memory_space<vmem>>, vector<1x128xf32>
    tpu.vector_store %arg6[%c33, %c0_200], %404 {strides = array<i32>} : memref<128x128xf32, #tpu.memory_space<vmem>>, vector<1x128xf32>,
    %406 = arith.index_cast %402 : i32 to index
    %c0_201 = arith.constant 0 : index
    %407 = vector.load %arg4[%406, %c0_201] : memref<48x128xf32, #tpu.memory_space<vmem>>, vector<1x128xf32>
    %c33_202 = arith.constant 33 : index
    %c0_203 = arith.constant 0 : index
    %408 = vector.load %arg7[%c33_202, %c0_203] : memref<128x128xf32, #tpu.memory_space<vmem>>, vector<1x128xf32>
    tpu.vector_store %arg7[%c33_202, %c0_203], %407 {strides = array<i32>} : memref<128x128xf32, #tpu.memory_space<vmem>>, vector<1x128xf32>,
    %c34_i32 = arith.constant 34 : i32
    %409 = arith.addi %0, %c34_i32 : i32
    %410 = arith.index_cast %409 : i32 to index
    %411 = memref.load %arg1[%410] : memref<128xi32, #tpu.memory_space<smem>>
    %c34_i32_204 = arith.constant 34 : i32
    %412 = arith.addi %0, %c34_i32_204 : i32
    %413 = arith.index_cast %412 : i32 to index
    %414 = memref.load %arg2[%413] : memref<128xi32, #tpu.memory_space<smem>>
    %415 = arith.index_cast %411 : i32 to index
    %c0_205 = arith.constant 0 : index
    %416 = vector.load %arg3[%415, %c0_205] : memref<32x128xf32, #tpu.memory_space<vmem>>, vector<1x128xf32>
    %c34 = arith.constant 34 : index
    %c0_206 = arith.constant 0 : index
    %417 = vector.load %arg6[%c34, %c0_206] : memref<128x128xf32, #tpu.memory_space<vmem>>, vector<1x128xf32>
    tpu.vector_store %arg6[%c34, %c0_206], %416 {strides = array<i32>} : memref<128x128xf32, #tpu.memory_space<vmem>>, vector<1x128xf32>,
    %418 = arith.index_cast %414 : i32 to index
    %c0_207 = arith.constant 0 : index
    %419 = vector.load %arg4[%418, %c0_207] : memref<48x128xf32, #tpu.memory_space<vmem>>, vector<1x128xf32>
    %c34_208 = arith.constant 34 : index
    %c0_209 = arith.constant 0 : index
    %420 = vector.load %arg7[%c34_208, %c0_209] : memref<128x128xf32, #tpu.memory_space<vmem>>, vector<1x128xf32>
    tpu.vector_store %arg7[%c34_208, %c0_209], %419 {strides = array<i32>} : memref<128x128xf32, #tpu.memory_space<vmem>>, vector<1x128xf32>,
    %c35_i32 = arith.constant 35 : i32
    %421 = arith.addi %0, %c35_i32 : i32
    %422 = arith.index_cast %421 : i32 to index
    %423 = memref.load %arg1[%422] : memref<128xi32, #tpu.memory_space<smem>>
    %c35_i32_210 = arith.constant 35 : i32
    %424 = arith.addi %0, %c35_i32_210 : i32
    %425 = arith.index_cast %424 : i32 to index
    %426 = memref.load %arg2[%425] : memref<128xi32, #tpu.memory_space<smem>>
    %427 = arith.index_cast %423 : i32 to index
    %c0_211 = arith.constant 0 : index
    %428 = vector.load %arg3[%427, %c0_211] : memref<32x128xf32, #tpu.memory_space<vmem>>, vector<1x128xf32>
    %c35 = arith.constant 35 : index
    %c0_212 = arith.constant 0 : index
    %429 = vector.load %arg6[%c35, %c0_212] : memref<128x128xf32, #tpu.memory_space<vmem>>, vector<1x128xf32>
    tpu.vector_store %arg6[%c35, %c0_212], %428 {strides = array<i32>} : memref<128x128xf32, #tpu.memory_space<vmem>>, vector<1x128xf32>,
    %430 = arith.index_cast %426 : i32 to index
    %c0_213 = arith.constant 0 : index
    %431 = vector.load %arg4[%430, %c0_213] : memref<48x128xf32, #tpu.memory_space<vmem>>, vector<1x128xf32>
    %c35_214 = arith.constant 35 : index
    %c0_215 = arith.constant 0 : index
    %432 = vector.load %arg7[%c35_214, %c0_215] : memref<128x128xf32, #tpu.memory_space<vmem>>, vector<1x128xf32>
    tpu.vector_store %arg7[%c35_214, %c0_215], %431 {strides = array<i32>} : memref<128x128xf32, #tpu.memory_space<vmem>>, vector<1x128xf32>,
    %c36_i32 = arith.constant 36 : i32
    %433 = arith.addi %0, %c36_i32 : i32
    %434 = arith.index_cast %433 : i32 to index
    %435 = memref.load %arg1[%434] : memref<128xi32, #tpu.memory_space<smem>>
    %c36_i32_216 = arith.constant 36 : i32
    %436 = arith.addi %0, %c36_i32_216 : i32
    %437 = arith.index_cast %436 : i32 to index
    %438 = memref.load %arg2[%437] : memref<128xi32, #tpu.memory_space<smem>>
    %439 = arith.index_cast %435 : i32 to index
    %c0_217 = arith.constant 0 : index
    %440 = vector.load %arg3[%439, %c0_217] : memref<32x128xf32, #tpu.memory_space<vmem>>, vector<1x128xf32>
    %c36 = arith.constant 36 : index
    %c0_218 = arith.constant 0 : index
    %441 = vector.load %arg6[%c36, %c0_218] : memref<128x128xf32, #tpu.memory_space<vmem>>, vector<1x128xf32>
    tpu.vector_store %arg6[%c36, %c0_218], %440 {strides = array<i32>} : memref<128x128xf32, #tpu.memory_space<vmem>>, vector<1x128xf32>,
    %442 = arith.index_cast %438 : i32 to index
    %c0_219 = arith.constant 0 : index
    %443 = vector.load %arg4[%442, %c0_219] : memref<48x128xf32, #tpu.memory_space<vmem>>, vector<1x128xf32>
    %c36_220 = arith.constant 36 : index
    %c0_221 = arith.constant 0 : index
    %444 = vector.load %arg7[%c36_220, %c0_221] : memref<128x128xf32, #tpu.memory_space<vmem>>, vector<1x128xf32>
    tpu.vector_store %arg7[%c36_220, %c0_221], %443 {strides = array<i32>} : memref<128x128xf32, #tpu.memory_space<vmem>>, vector<1x128xf32>,
    %c37_i32 = arith.constant 37 : i32
    %445 = arith.addi %0, %c37_i32 : i32
    %446 = arith.index_cast %445 : i32 to index
    %447 = memref.load %arg1[%446] : memref<128xi32, #tpu.memory_space<smem>>
    %c37_i32_222 = arith.constant 37 : i32
    %448 = arith.addi %0, %c37_i32_222 : i32
    %449 = arith.index_cast %448 : i32 to index
    %450 = memref.load %arg2[%449] : memref<128xi32, #tpu.memory_space<smem>>
    %451 = arith.index_cast %447 : i32 to index
    %c0_223 = arith.constant 0 : index
    %452 = vector.load %arg3[%451, %c0_223] : memref<32x128xf32, #tpu.memory_space<vmem>>, vector<1x128xf32>
    %c37 = arith.constant 37 : index
    %c0_224 = arith.constant 0 : index
    %453 = vector.load %arg6[%c37, %c0_224] : memref<128x128xf32, #tpu.memory_space<vmem>>, vector<1x128xf32>
    tpu.vector_store %arg6[%c37, %c0_224], %452 {strides = array<i32>} : memref<128x128xf32, #tpu.memory_space<vmem>>, vector<1x128xf32>,
    %454 = arith.index_cast %450 : i32 to index
    %c0_225 = arith.constant 0 : index
    %455 = vector.load %arg4[%454, %c0_225] : memref<48x128xf32, #tpu.memory_space<vmem>>, vector<1x128xf32>
    %c37_226 = arith.constant 37 : index
    %c0_227 = arith.constant 0 : index
    %456 = vector.load %arg7[%c37_226, %c0_227] : memref<128x128xf32, #tpu.memory_space<vmem>>, vector<1x128xf32>
    tpu.vector_store %arg7[%c37_226, %c0_227], %455 {strides = array<i32>} : memref<128x128xf32, #tpu.memory_space<vmem>>, vector<1x128xf32>,
    %c38_i32 = arith.constant 38 : i32
    %457 = arith.addi %0, %c38_i32 : i32
    %458 = arith.index_cast %457 : i32 to index
    %459 = memref.load %arg1[%458] : memref<128xi32, #tpu.memory_space<smem>>
    %c38_i32_228 = arith.constant 38 : i32
    %460 = arith.addi %0, %c38_i32_228 : i32
    %461 = arith.index_cast %460 : i32 to index
    %462 = memref.load %arg2[%461] : memref<128xi32, #tpu.memory_space<smem>>
    %463 = arith.index_cast %459 : i32 to index
    %c0_229 = arith.constant 0 : index
    %464 = vector.load %arg3[%463, %c0_229] : memref<32x128xf32, #tpu.memory_space<vmem>>, vector<1x128xf32>
    %c38 = arith.constant 38 : index
    %c0_230 = arith.constant 0 : index
    %465 = vector.load %arg6[%c38, %c0_230] : memref<128x128xf32, #tpu.memory_space<vmem>>, vector<1x128xf32>
    tpu.vector_store %arg6[%c38, %c0_230], %464 {strides = array<i32>} : memref<128x128xf32, #tpu.memory_space<vmem>>, vector<1x128xf32>,
    %466 = arith.index_cast %462 : i32 to index
    %c0_231 = arith.constant 0 : index
    %467 = vector.load %arg4[%466, %c0_231] : memref<48x128xf32, #tpu.memory_space<vmem>>, vector<1x128xf32>
    %c38_232 = arith.constant 38 : index
    %c0_233 = arith.constant 0 : index
    %468 = vector.load %arg7[%c38_232, %c0_233] : memref<128x128xf32, #tpu.memory_space<vmem>>, vector<1x128xf32>
    tpu.vector_store %arg7[%c38_232, %c0_233], %467 {strides = array<i32>} : memref<128x128xf32, #tpu.memory_space<vmem>>, vector<1x128xf32>,
    %c39_i32 = arith.constant 39 : i32
    %469 = arith.addi %0, %c39_i32 : i32
    %470 = arith.index_cast %469 : i32 to index
    %471 = memref.load %arg1[%470] : memref<128xi32, #tpu.memory_space<smem>>
    %c39_i32_234 = arith.constant 39 : i32
    %472 = arith.addi %0, %c39_i32_234 : i32
    %473 = arith.index_cast %472 : i32 to index
    %474 = memref.load %arg2[%473] : memref<128xi32, #tpu.memory_space<smem>>
    %475 = arith.index_cast %471 : i32 to index
    %c0_235 = arith.constant 0 : index
    %476 = vector.load %arg3[%475, %c0_235] : memref<32x128xf32, #tpu.memory_space<vmem>>, vector<1x128xf32>
    %c39 = arith.constant 39 : index
    %c0_236 = arith.constant 0 : index
    %477 = vector.load %arg6[%c39, %c0_236] : memref<128x128xf32, #tpu.memory_space<vmem>>, vector<1x128xf32>
    tpu.vector_store %arg6[%c39, %c0_236], %476 {strides = array<i32>} : memref<128x128xf32, #tpu.memory_space<vmem>>, vector<1x128xf32>,
    %478 = arith.index_cast %474 : i32 to index
    %c0_237 = arith.constant 0 : index
    %479 = vector.load %arg4[%478, %c0_237] : memref<48x128xf32, #tpu.memory_space<vmem>>, vector<1x128xf32>
    %c39_238 = arith.constant 39 : index
    %c0_239 = arith.constant 0 : index
    %480 = vector.load %arg7[%c39_238, %c0_239] : memref<128x128xf32, #tpu.memory_space<vmem>>, vector<1x128xf32>
    tpu.vector_store %arg7[%c39_238, %c0_239], %479 {strides = array<i32>} : memref<128x128xf32, #tpu.memory_space<vmem>>, vector<1x128xf32>,
    %c40_i32 = arith.constant 40 : i32
    %481 = arith.addi %0, %c40_i32 : i32
    %482 = arith.index_cast %481 : i32 to index
    %483 = memref.load %arg1[%482] : memref<128xi32, #tpu.memory_space<smem>>
    %c40_i32_240 = arith.constant 40 : i32
    %484 = arith.addi %0, %c40_i32_240 : i32
    %485 = arith.index_cast %484 : i32 to index
    %486 = memref.load %arg2[%485] : memref<128xi32, #tpu.memory_space<smem>>
    %487 = arith.index_cast %483 : i32 to index
    %c0_241 = arith.constant 0 : index
    %488 = vector.load %arg3[%487, %c0_241] : memref<32x128xf32, #tpu.memory_space<vmem>>, vector<1x128xf32>
    %c40 = arith.constant 40 : index
    %c0_242 = arith.constant 0 : index
    %489 = vector.load %arg6[%c40, %c0_242] : memref<128x128xf32, #tpu.memory_space<vmem>>, vector<1x128xf32>
    tpu.vector_store %arg6[%c40, %c0_242], %488 {strides = array<i32>} : memref<128x128xf32, #tpu.memory_space<vmem>>, vector<1x128xf32>,
    %490 = arith.index_cast %486 : i32 to index
    %c0_243 = arith.constant 0 : index
    %491 = vector.load %arg4[%490, %c0_243] : memref<48x128xf32, #tpu.memory_space<vmem>>, vector<1x128xf32>
    %c40_244 = arith.constant 40 : index
    %c0_245 = arith.constant 0 : index
    %492 = vector.load %arg7[%c40_244, %c0_245] : memref<128x128xf32, #tpu.memory_space<vmem>>, vector<1x128xf32>
    tpu.vector_store %arg7[%c40_244, %c0_245], %491 {strides = array<i32>} : memref<128x128xf32, #tpu.memory_space<vmem>>, vector<1x128xf32>,
    %c41_i32 = arith.constant 41 : i32
    %493 = arith.addi %0, %c41_i32 : i32
    %494 = arith.index_cast %493 : i32 to index
    %495 = memref.load %arg1[%494] : memref<128xi32, #tpu.memory_space<smem>>
    %c41_i32_246 = arith.constant 41 : i32
    %496 = arith.addi %0, %c41_i32_246 : i32
    %497 = arith.index_cast %496 : i32 to index
    %498 = memref.load %arg2[%497] : memref<128xi32, #tpu.memory_space<smem>>
    %499 = arith.index_cast %495 : i32 to index
    %c0_247 = arith.constant 0 : index
    %500 = vector.load %arg3[%499, %c0_247] : memref<32x128xf32, #tpu.memory_space<vmem>>, vector<1x128xf32>
    %c41 = arith.constant 41 : index
    %c0_248 = arith.constant 0 : index
    %501 = vector.load %arg6[%c41, %c0_248] : memref<128x128xf32, #tpu.memory_space<vmem>>, vector<1x128xf32>
    tpu.vector_store %arg6[%c41, %c0_248], %500 {strides = array<i32>} : memref<128x128xf32, #tpu.memory_space<vmem>>, vector<1x128xf32>,
    %502 = arith.index_cast %498 : i32 to index
    %c0_249 = arith.constant 0 : index
    %503 = vector.load %arg4[%502, %c0_249] : memref<48x128xf32, #tpu.memory_space<vmem>>, vector<1x128xf32>
    %c41_250 = arith.constant 41 : index
    %c0_251 = arith.constant 0 : index
    %504 = vector.load %arg7[%c41_250, %c0_251] : memref<128x128xf32, #tpu.memory_space<vmem>>, vector<1x128xf32>
    tpu.vector_store %arg7[%c41_250, %c0_251], %503 {strides = array<i32>} : memref<128x128xf32, #tpu.memory_space<vmem>>, vector<1x128xf32>,
    %c42_i32 = arith.constant 42 : i32
    %505 = arith.addi %0, %c42_i32 : i32
    %506 = arith.index_cast %505 : i32 to index
    %507 = memref.load %arg1[%506] : memref<128xi32, #tpu.memory_space<smem>>
    %c42_i32_252 = arith.constant 42 : i32
    %508 = arith.addi %0, %c42_i32_252 : i32
    %509 = arith.index_cast %508 : i32 to index
    %510 = memref.load %arg2[%509] : memref<128xi32, #tpu.memory_space<smem>>
    %511 = arith.index_cast %507 : i32 to index
    %c0_253 = arith.constant 0 : index
    %512 = vector.load %arg3[%511, %c0_253] : memref<32x128xf32, #tpu.memory_space<vmem>>, vector<1x128xf32>
    %c42 = arith.constant 42 : index
    %c0_254 = arith.constant 0 : index
    %513 = vector.load %arg6[%c42, %c0_254] : memref<128x128xf32, #tpu.memory_space<vmem>>, vector<1x128xf32>
    tpu.vector_store %arg6[%c42, %c0_254], %512 {strides = array<i32>} : memref<128x128xf32, #tpu.memory_space<vmem>>, vector<1x128xf32>,
    %514 = arith.index_cast %510 : i32 to index
    %c0_255 = arith.constant 0 : index
    %515 = vector.load %arg4[%514, %c0_255] : memref<48x128xf32, #tpu.memory_space<vmem>>, vector<1x128xf32>
    %c42_256 = arith.constant 42 : index
    %c0_257 = arith.constant 0 : index
    %516 = vector.load %arg7[%c42_256, %c0_257] : memref<128x128xf32, #tpu.memory_space<vmem>>, vector<1x128xf32>
    tpu.vector_store %arg7[%c42_256, %c0_257], %515 {strides = array<i32>} : memref<128x128xf32, #tpu.memory_space<vmem>>, vector<1x128xf32>,
    %c43_i32 = arith.constant 43 : i32
    %517 = arith.addi %0, %c43_i32 : i32
    %518 = arith.index_cast %517 : i32 to index
    %519 = memref.load %arg1[%518] : memref<128xi32, #tpu.memory_space<smem>>
    %c43_i32_258 = arith.constant 43 : i32
    %520 = arith.addi %0, %c43_i32_258 : i32
    %521 = arith.index_cast %520 : i32 to index
    %522 = memref.load %arg2[%521] : memref<128xi32, #tpu.memory_space<smem>>
    %523 = arith.index_cast %519 : i32 to index
    %c0_259 = arith.constant 0 : index
    %524 = vector.load %arg3[%523, %c0_259] : memref<32x128xf32, #tpu.memory_space<vmem>>, vector<1x128xf32>
    %c43 = arith.constant 43 : index
    %c0_260 = arith.constant 0 : index
    %525 = vector.load %arg6[%c43, %c0_260] : memref<128x128xf32, #tpu.memory_space<vmem>>, vector<1x128xf32>
    tpu.vector_store %arg6[%c43, %c0_260], %524 {strides = array<i32>} : memref<128x128xf32, #tpu.memory_space<vmem>>, vector<1x128xf32>,
    %526 = arith.index_cast %522 : i32 to index
    %c0_261 = arith.constant 0 : index
    %527 = vector.load %arg4[%526, %c0_261] : memref<48x128xf32, #tpu.memory_space<vmem>>, vector<1x128xf32>
    %c43_262 = arith.constant 43 : index
    %c0_263 = arith.constant 0 : index
    %528 = vector.load %arg7[%c43_262, %c0_263] : memref<128x128xf32, #tpu.memory_space<vmem>>, vector<1x128xf32>
    tpu.vector_store %arg7[%c43_262, %c0_263], %527 {strides = array<i32>} : memref<128x128xf32, #tpu.memory_space<vmem>>, vector<1x128xf32>,
    %c44_i32 = arith.constant 44 : i32
    %529 = arith.addi %0, %c44_i32 : i32
    %530 = arith.index_cast %529 : i32 to index
    %531 = memref.load %arg1[%530] : memref<128xi32, #tpu.memory_space<smem>>
    %c44_i32_264 = arith.constant 44 : i32
    %532 = arith.addi %0, %c44_i32_264 : i32
    %533 = arith.index_cast %532 : i32 to index
    %534 = memref.load %arg2[%533] : memref<128xi32, #tpu.memory_space<smem>>
    %535 = arith.index_cast %531 : i32 to index
    %c0_265 = arith.constant 0 : index
    %536 = vector.load %arg3[%535, %c0_265] : memref<32x128xf32, #tpu.memory_space<vmem>>, vector<1x128xf32>
    %c44 = arith.constant 44 : index
    %c0_266 = arith.constant 0 : index
    %537 = vector.load %arg6[%c44, %c0_266] : memref<128x128xf32, #tpu.memory_space<vmem>>, vector<1x128xf32>
    tpu.vector_store %arg6[%c44, %c0_266], %536 {strides = array<i32>} : memref<128x128xf32, #tpu.memory_space<vmem>>, vector<1x128xf32>,
    %538 = arith.index_cast %534 : i32 to index
    %c0_267 = arith.constant 0 : index
    %539 = vector.load %arg4[%538, %c0_267] : memref<48x128xf32, #tpu.memory_space<vmem>>, vector<1x128xf32>
    %c44_268 = arith.constant 44 : index
    %c0_269 = arith.constant 0 : index
    %540 = vector.load %arg7[%c44_268, %c0_269] : memref<128x128xf32, #tpu.memory_space<vmem>>, vector<1x128xf32>
    tpu.vector_store %arg7[%c44_268, %c0_269], %539 {strides = array<i32>} : memref<128x128xf32, #tpu.memory_space<vmem>>, vector<1x128xf32>,
    %c45_i32 = arith.constant 45 : i32
    %541 = arith.addi %0, %c45_i32 : i32
    %542 = arith.index_cast %541 : i32 to index
    %543 = memref.load %arg1[%542] : memref<128xi32, #tpu.memory_space<smem>>
    %c45_i32_270 = arith.constant 45 : i32
    %544 = arith.addi %0, %c45_i32_270 : i32
    %545 = arith.index_cast %544 : i32 to index
    %546 = memref.load %arg2[%545] : memref<128xi32, #tpu.memory_space<smem>>
    %547 = arith.index_cast %543 : i32 to index
    %c0_271 = arith.constant 0 : index
    %548 = vector.load %arg3[%547, %c0_271] : memref<32x128xf32, #tpu.memory_space<vmem>>, vector<1x128xf32>
    %c45 = arith.constant 45 : index
    %c0_272 = arith.constant 0 : index
    %549 = vector.load %arg6[%c45, %c0_272] : memref<128x128xf32, #tpu.memory_space<vmem>>, vector<1x128xf32>
    tpu.vector_store %arg6[%c45, %c0_272], %548 {strides = array<i32>} : memref<128x128xf32, #tpu.memory_space<vmem>>, vector<1x128xf32>,
    %550 = arith.index_cast %546 : i32 to index
    %c0_273 = arith.constant 0 : index
    %551 = vector.load %arg4[%550, %c0_273] : memref<48x128xf32, #tpu.memory_space<vmem>>, vector<1x128xf32>
    %c45_274 = arith.constant 45 : index
    %c0_275 = arith.constant 0 : index
    %552 = vector.load %arg7[%c45_274, %c0_275] : memref<128x128xf32, #tpu.memory_space<vmem>>, vector<1x128xf32>
    tpu.vector_store %arg7[%c45_274, %c0_275], %551 {strides = array<i32>} : memref<128x128xf32, #tpu.memory_space<vmem>>, vector<1x128xf32>,
    %c46_i32 = arith.constant 46 : i32
    %553 = arith.addi %0, %c46_i32 : i32
    %554 = arith.index_cast %553 : i32 to index
    %555 = memref.load %arg1[%554] : memref<128xi32, #tpu.memory_space<smem>>
    %c46_i32_276 = arith.constant 46 : i32
    %556 = arith.addi %0, %c46_i32_276 : i32
    %557 = arith.index_cast %556 : i32 to index
    %558 = memref.load %arg2[%557] : memref<128xi32, #tpu.memory_space<smem>>
    %559 = arith.index_cast %555 : i32 to index
    %c0_277 = arith.constant 0 : index
    %560 = vector.load %arg3[%559, %c0_277] : memref<32x128xf32, #tpu.memory_space<vmem>>, vector<1x128xf32>
    %c46 = arith.constant 46 : index
    %c0_278 = arith.constant 0 : index
    %561 = vector.load %arg6[%c46, %c0_278] : memref<128x128xf32, #tpu.memory_space<vmem>>, vector<1x128xf32>
    tpu.vector_store %arg6[%c46, %c0_278], %560 {strides = array<i32>} : memref<128x128xf32, #tpu.memory_space<vmem>>, vector<1x128xf32>,
    %562 = arith.index_cast %558 : i32 to index
    %c0_279 = arith.constant 0 : index
    %563 = vector.load %arg4[%562, %c0_279] : memref<48x128xf32, #tpu.memory_space<vmem>>, vector<1x128xf32>
    %c46_280 = arith.constant 46 : index
    %c0_281 = arith.constant 0 : index
    %564 = vector.load %arg7[%c46_280, %c0_281] : memref<128x128xf32, #tpu.memory_space<vmem>>, vector<1x128xf32>
    tpu.vector_store %arg7[%c46_280, %c0_281], %563 {strides = array<i32>} : memref<128x128xf32, #tpu.memory_space<vmem>>, vector<1x128xf32>,
    %c47_i32 = arith.constant 47 : i32
    %565 = arith.addi %0, %c47_i32 : i32
    %566 = arith.index_cast %565 : i32 to index
    %567 = memref.load %arg1[%566] : memref<128xi32, #tpu.memory_space<smem>>
    %c47_i32_282 = arith.constant 47 : i32
    %568 = arith.addi %0, %c47_i32_282 : i32
    %569 = arith.index_cast %568 : i32 to index
    %570 = memref.load %arg2[%569] : memref<128xi32, #tpu.memory_space<smem>>
    %571 = arith.index_cast %567 : i32 to index
    %c0_283 = arith.constant 0 : index
    %572 = vector.load %arg3[%571, %c0_283] : memref<32x128xf32, #tpu.memory_space<vmem>>, vector<1x128xf32>
    %c47 = arith.constant 47 : index
    %c0_284 = arith.constant 0 : index
    %573 = vector.load %arg6[%c47, %c0_284] : memref<128x128xf32, #tpu.memory_space<vmem>>, vector<1x128xf32>
    tpu.vector_store %arg6[%c47, %c0_284], %572 {strides = array<i32>} : memref<128x128xf32, #tpu.memory_space<vmem>>, vector<1x128xf32>,
    %574 = arith.index_cast %570 : i32 to index
    %c0_285 = arith.constant 0 : index
    %575 = vector.load %arg4[%574, %c0_285] : memref<48x128xf32, #tpu.memory_space<vmem>>, vector<1x128xf32>
    %c47_286 = arith.constant 47 : index
    %c0_287 = arith.constant 0 : index
    %576 = vector.load %arg7[%c47_286, %c0_287] : memref<128x128xf32, #tpu.memory_space<vmem>>, vector<1x128xf32>
    tpu.vector_store %arg7[%c47_286, %c0_287], %575 {strides = array<i32>} : memref<128x128xf32, #tpu.memory_space<vmem>>, vector<1x128xf32>,
    %c48_i32 = arith.constant 48 : i32
    %577 = arith.addi %0, %c48_i32 : i32
    %578 = arith.index_cast %577 : i32 to index
    %579 = memref.load %arg1[%578] : memref<128xi32, #tpu.memory_space<smem>>
    %c48_i32_288 = arith.constant 48 : i32
    %580 = arith.addi %0, %c48_i32_288 : i32
    %581 = arith.index_cast %580 : i32 to index
    %582 = memref.load %arg2[%581] : memref<128xi32, #tpu.memory_space<smem>>
    %583 = arith.index_cast %579 : i32 to index
    %c0_289 = arith.constant 0 : index
    %584 = vector.load %arg3[%583, %c0_289] : memref<32x128xf32, #tpu.memory_space<vmem>>, vector<1x128xf32>
    %c48 = arith.constant 48 : index
    %c0_290 = arith.constant 0 : index
    %585 = vector.load %arg6[%c48, %c0_290] : memref<128x128xf32, #tpu.memory_space<vmem>>, vector<1x128xf32>
    tpu.vector_store %arg6[%c48, %c0_290], %584 {strides = array<i32>} : memref<128x128xf32, #tpu.memory_space<vmem>>, vector<1x128xf32>,
    %586 = arith.index_cast %582 : i32 to index
    %c0_291 = arith.constant 0 : index
    %587 = vector.load %arg4[%586, %c0_291] : memref<48x128xf32, #tpu.memory_space<vmem>>, vector<1x128xf32>
    %c48_292 = arith.constant 48 : index
    %c0_293 = arith.constant 0 : index
    %588 = vector.load %arg7[%c48_292, %c0_293] : memref<128x128xf32, #tpu.memory_space<vmem>>, vector<1x128xf32>
    tpu.vector_store %arg7[%c48_292, %c0_293], %587 {strides = array<i32>} : memref<128x128xf32, #tpu.memory_space<vmem>>, vector<1x128xf32>,
    %c49_i32 = arith.constant 49 : i32
    %589 = arith.addi %0, %c49_i32 : i32
    %590 = arith.index_cast %589 : i32 to index
    %591 = memref.load %arg1[%590] : memref<128xi32, #tpu.memory_space<smem>>
    %c49_i32_294 = arith.constant 49 : i32
    %592 = arith.addi %0, %c49_i32_294 : i32
    %593 = arith.index_cast %592 : i32 to index
    %594 = memref.load %arg2[%593] : memref<128xi32, #tpu.memory_space<smem>>
    %595 = arith.index_cast %591 : i32 to index
    %c0_295 = arith.constant 0 : index
    %596 = vector.load %arg3[%595, %c0_295] : memref<32x128xf32, #tpu.memory_space<vmem>>, vector<1x128xf32>
    %c49 = arith.constant 49 : index
    %c0_296 = arith.constant 0 : index
    %597 = vector.load %arg6[%c49, %c0_296] : memref<128x128xf32, #tpu.memory_space<vmem>>, vector<1x128xf32>
    tpu.vector_store %arg6[%c49, %c0_296], %596 {strides = array<i32>} : memref<128x128xf32, #tpu.memory_space<vmem>>, vector<1x128xf32>,
    %598 = arith.index_cast %594 : i32 to index
    %c0_297 = arith.constant 0 : index
    %599 = vector.load %arg4[%598, %c0_297] : memref<48x128xf32, #tpu.memory_space<vmem>>, vector<1x128xf32>
    %c49_298 = arith.constant 49 : index
    %c0_299 = arith.constant 0 : index
    %600 = vector.load %arg7[%c49_298, %c0_299] : memref<128x128xf32, #tpu.memory_space<vmem>>, vector<1x128xf32>
    tpu.vector_store %arg7[%c49_298, %c0_299], %599 {strides = array<i32>} : memref<128x128xf32, #tpu.memory_space<vmem>>, vector<1x128xf32>,
    %c50_i32 = arith.constant 50 : i32
    %601 = arith.addi %0, %c50_i32 : i32
    %602 = arith.index_cast %601 : i32 to index
    %603 = memref.load %arg1[%602] : memref<128xi32, #tpu.memory_space<smem>>
    %c50_i32_300 = arith.constant 50 : i32
    %604 = arith.addi %0, %c50_i32_300 : i32
    %605 = arith.index_cast %604 : i32 to index
    %606 = memref.load %arg2[%605] : memref<128xi32, #tpu.memory_space<smem>>
    %607 = arith.index_cast %603 : i32 to index
    %c0_301 = arith.constant 0 : index
    %608 = vector.load %arg3[%607, %c0_301] : memref<32x128xf32, #tpu.memory_space<vmem>>, vector<1x128xf32>
    %c50 = arith.constant 50 : index
    %c0_302 = arith.constant 0 : index
    %609 = vector.load %arg6[%c50, %c0_302] : memref<128x128xf32, #tpu.memory_space<vmem>>, vector<1x128xf32>
    tpu.vector_store %arg6[%c50, %c0_302], %608 {strides = array<i32>} : memref<128x128xf32, #tpu.memory_space<vmem>>, vector<1x128xf32>,
    %610 = arith.index_cast %606 : i32 to index
    %c0_303 = arith.constant 0 : index
    %611 = vector.load %arg4[%610, %c0_303] : memref<48x128xf32, #tpu.memory_space<vmem>>, vector<1x128xf32>
    %c50_304 = arith.constant 50 : index
    %c0_305 = arith.constant 0 : index
    %612 = vector.load %arg7[%c50_304, %c0_305] : memref<128x128xf32, #tpu.memory_space<vmem>>, vector<1x128xf32>
    tpu.vector_store %arg7[%c50_304, %c0_305], %611 {strides = array<i32>} : memref<128x128xf32, #tpu.memory_space<vmem>>, vector<1x128xf32>,
    %c51_i32 = arith.constant 51 : i32
    %613 = arith.addi %0, %c51_i32 : i32
    %614 = arith.index_cast %613 : i32 to index
    %615 = memref.load %arg1[%614] : memref<128xi32, #tpu.memory_space<smem>>
    %c51_i32_306 = arith.constant 51 : i32
    %616 = arith.addi %0, %c51_i32_306 : i32
    %617 = arith.index_cast %616 : i32 to index
    %618 = memref.load %arg2[%617] : memref<128xi32, #tpu.memory_space<smem>>
    %619 = arith.index_cast %615 : i32 to index
    %c0_307 = arith.constant 0 : index
    %620 = vector.load %arg3[%619, %c0_307] : memref<32x128xf32, #tpu.memory_space<vmem>>, vector<1x128xf32>
    %c51 = arith.constant 51 : index
    %c0_308 = arith.constant 0 : index
    %621 = vector.load %arg6[%c51, %c0_308] : memref<128x128xf32, #tpu.memory_space<vmem>>, vector<1x128xf32>
    tpu.vector_store %arg6[%c51, %c0_308], %620 {strides = array<i32>} : memref<128x128xf32, #tpu.memory_space<vmem>>, vector<1x128xf32>,
    %622 = arith.index_cast %618 : i32 to index
    %c0_309 = arith.constant 0 : index
    %623 = vector.load %arg4[%622, %c0_309] : memref<48x128xf32, #tpu.memory_space<vmem>>, vector<1x128xf32>
    %c51_310 = arith.constant 51 : index
    %c0_311 = arith.constant 0 : index
    %624 = vector.load %arg7[%c51_310, %c0_311] : memref<128x128xf32, #tpu.memory_space<vmem>>, vector<1x128xf32>
    tpu.vector_store %arg7[%c51_310, %c0_311], %623 {strides = array<i32>} : memref<128x128xf32, #tpu.memory_space<vmem>>, vector<1x128xf32>,
    %c52_i32 = arith.constant 52 : i32
    %625 = arith.addi %0, %c52_i32 : i32
    %626 = arith.index_cast %625 : i32 to index
    %627 = memref.load %arg1[%626] : memref<128xi32, #tpu.memory_space<smem>>
    %c52_i32_312 = arith.constant 52 : i32
    %628 = arith.addi %0, %c52_i32_312 : i32
    %629 = arith.index_cast %628 : i32 to index
    %630 = memref.load %arg2[%629] : memref<128xi32, #tpu.memory_space<smem>>
    %631 = arith.index_cast %627 : i32 to index
    %c0_313 = arith.constant 0 : index
    %632 = vector.load %arg3[%631, %c0_313] : memref<32x128xf32, #tpu.memory_space<vmem>>, vector<1x128xf32>
    %c52 = arith.constant 52 : index
    %c0_314 = arith.constant 0 : index
    %633 = vector.load %arg6[%c52, %c0_314] : memref<128x128xf32, #tpu.memory_space<vmem>>, vector<1x128xf32>
    tpu.vector_store %arg6[%c52, %c0_314], %632 {strides = array<i32>} : memref<128x128xf32, #tpu.memory_space<vmem>>, vector<1x128xf32>,
    %634 = arith.index_cast %630 : i32 to index
    %c0_315 = arith.constant 0 : index
    %635 = vector.load %arg4[%634, %c0_315] : memref<48x128xf32, #tpu.memory_space<vmem>>, vector<1x128xf32>
    %c52_316 = arith.constant 52 : index
    %c0_317 = arith.constant 0 : index
    %636 = vector.load %arg7[%c52_316, %c0_317] : memref<128x128xf32, #tpu.memory_space<vmem>>, vector<1x128xf32>
    tpu.vector_store %arg7[%c52_316, %c0_317], %635 {strides = array<i32>} : memref<128x128xf32, #tpu.memory_space<vmem>>, vector<1x128xf32>,
    %c53_i32 = arith.constant 53 : i32
    %637 = arith.addi %0, %c53_i32 : i32
    %638 = arith.index_cast %637 : i32 to index
    %639 = memref.load %arg1[%638] : memref<128xi32, #tpu.memory_space<smem>>
    %c53_i32_318 = arith.constant 53 : i32
    %640 = arith.addi %0, %c53_i32_318 : i32
    %641 = arith.index_cast %640 : i32 to index
    %642 = memref.load %arg2[%641] : memref<128xi32, #tpu.memory_space<smem>>
    %643 = arith.index_cast %639 : i32 to index
    %c0_319 = arith.constant 0 : index
    %644 = vector.load %arg3[%643, %c0_319] : memref<32x128xf32, #tpu.memory_space<vmem>>, vector<1x128xf32>
    %c53 = arith.constant 53 : index
    %c0_320 = arith.constant 0 : index
    %645 = vector.load %arg6[%c53, %c0_320] : memref<128x128xf32, #tpu.memory_space<vmem>>, vector<1x128xf32>
    tpu.vector_store %arg6[%c53, %c0_320], %644 {strides = array<i32>} : memref<128x128xf32, #tpu.memory_space<vmem>>, vector<1x128xf32>,
    %646 = arith.index_cast %642 : i32 to index
    %c0_321 = arith.constant 0 : index
    %647 = vector.load %arg4[%646, %c0_321] : memref<48x128xf32, #tpu.memory_space<vmem>>, vector<1x128xf32>
    %c53_322 = arith.constant 53 : index
    %c0_323 = arith.constant 0 : index
    %648 = vector.load %arg7[%c53_322, %c0_323] : memref<128x128xf32, #tpu.memory_space<vmem>>, vector<1x128xf32>
    tpu.vector_store %arg7[%c53_322, %c0_323], %647 {strides = array<i32>} : memref<128x128xf32, #tpu.memory_space<vmem>>, vector<1x128xf32>,
    %c54_i32 = arith.constant 54 : i32
    %649 = arith.addi %0, %c54_i32 : i32
    %650 = arith.index_cast %649 : i32 to index
    %651 = memref.load %arg1[%650] : memref<128xi32, #tpu.memory_space<smem>>
    %c54_i32_324 = arith.constant 54 : i32
    %652 = arith.addi %0, %c54_i32_324 : i32
    %653 = arith.index_cast %652 : i32 to index
    %654 = memref.load %arg2[%653] : memref<128xi32, #tpu.memory_space<smem>>
    %655 = arith.index_cast %651 : i32 to index
    %c0_325 = arith.constant 0 : index
    %656 = vector.load %arg3[%655, %c0_325] : memref<32x128xf32, #tpu.memory_space<vmem>>, vector<1x128xf32>
    %c54 = arith.constant 54 : index
    %c0_326 = arith.constant 0 : index
    %657 = vector.load %arg6[%c54, %c0_326] : memref<128x128xf32, #tpu.memory_space<vmem>>, vector<1x128xf32>
    tpu.vector_store %arg6[%c54, %c0_326], %656 {strides = array<i32>} : memref<128x128xf32, #tpu.memory_space<vmem>>, vector<1x128xf32>,
    %658 = arith.index_cast %654 : i32 to index
    %c0_327 = arith.constant 0 : index
    %659 = vector.load %arg4[%658, %c0_327] : memref<48x128xf32, #tpu.memory_space<vmem>>, vector<1x128xf32>
    %c54_328 = arith.constant 54 : index
    %c0_329 = arith.constant 0 : index
    %660 = vector.load %arg7[%c54_328, %c0_329] : memref<128x128xf32, #tpu.memory_space<vmem>>, vector<1x128xf32>
    tpu.vector_store %arg7[%c54_328, %c0_329], %659 {strides = array<i32>} : memref<128x128xf32, #tpu.memory_space<vmem>>, vector<1x128xf32>,
    %c55_i32 = arith.constant 55 : i32
    %661 = arith.addi %0, %c55_i32 : i32
    %662 = arith.index_cast %661 : i32 to index
    %663 = memref.load %arg1[%662] : memref<128xi32, #tpu.memory_space<smem>>
    %c55_i32_330 = arith.constant 55 : i32
    %664 = arith.addi %0, %c55_i32_330 : i32
    %665 = arith.index_cast %664 : i32 to index
    %666 = memref.load %arg2[%665] : memref<128xi32, #tpu.memory_space<smem>>
    %667 = arith.index_cast %663 : i32 to index
    %c0_331 = arith.constant 0 : index
    %668 = vector.load %arg3[%667, %c0_331] : memref<32x128xf32, #tpu.memory_space<vmem>>, vector<1x128xf32>
    %c55 = arith.constant 55 : index
    %c0_332 = arith.constant 0 : index
    %669 = vector.load %arg6[%c55, %c0_332] : memref<128x128xf32, #tpu.memory_space<vmem>>, vector<1x128xf32>
    tpu.vector_store %arg6[%c55, %c0_332], %668 {strides = array<i32>} : memref<128x128xf32, #tpu.memory_space<vmem>>, vector<1x128xf32>,
    %670 = arith.index_cast %666 : i32 to index
    %c0_333 = arith.constant 0 : index
    %671 = vector.load %arg4[%670, %c0_333] : memref<48x128xf32, #tpu.memory_space<vmem>>, vector<1x128xf32>
    %c55_334 = arith.constant 55 : index
    %c0_335 = arith.constant 0 : index
    %672 = vector.load %arg7[%c55_334, %c0_335] : memref<128x128xf32, #tpu.memory_space<vmem>>, vector<1x128xf32>
    tpu.vector_store %arg7[%c55_334, %c0_335], %671 {strides = array<i32>} : memref<128x128xf32, #tpu.memory_space<vmem>>, vector<1x128xf32>,
    %c56_i32 = arith.constant 56 : i32
    %673 = arith.addi %0, %c56_i32 : i32
    %674 = arith.index_cast %673 : i32 to index
    %675 = memref.load %arg1[%674] : memref<128xi32, #tpu.memory_space<smem>>
    %c56_i32_336 = arith.constant 56 : i32
    %676 = arith.addi %0, %c56_i32_336 : i32
    %677 = arith.index_cast %676 : i32 to index
    %678 = memref.load %arg2[%677] : memref<128xi32, #tpu.memory_space<smem>>
    %679 = arith.index_cast %675 : i32 to index
    %c0_337 = arith.constant 0 : index
    %680 = vector.load %arg3[%679, %c0_337] : memref<32x128xf32, #tpu.memory_space<vmem>>, vector<1x128xf32>
    %c56 = arith.constant 56 : index
    %c0_338 = arith.constant 0 : index
    %681 = vector.load %arg6[%c56, %c0_338] : memref<128x128xf32, #tpu.memory_space<vmem>>, vector<1x128xf32>
    tpu.vector_store %arg6[%c56, %c0_338], %680 {strides = array<i32>} : memref<128x128xf32, #tpu.memory_space<vmem>>, vector<1x128xf32>,
    %682 = arith.index_cast %678 : i32 to index
    %c0_339 = arith.constant 0 : index
    %683 = vector.load %arg4[%682, %c0_339] : memref<48x128xf32, #tpu.memory_space<vmem>>, vector<1x128xf32>
    %c56_340 = arith.constant 56 : index
    %c0_341 = arith.constant 0 : index
    %684 = vector.load %arg7[%c56_340, %c0_341] : memref<128x128xf32, #tpu.memory_space<vmem>>, vector<1x128xf32>
    tpu.vector_store %arg7[%c56_340, %c0_341], %683 {strides = array<i32>} : memref<128x128xf32, #tpu.memory_space<vmem>>, vector<1x128xf32>,
    %c57_i32 = arith.constant 57 : i32
    %685 = arith.addi %0, %c57_i32 : i32
    %686 = arith.index_cast %685 : i32 to index
    %687 = memref.load %arg1[%686] : memref<128xi32, #tpu.memory_space<smem>>
    %c57_i32_342 = arith.constant 57 : i32
    %688 = arith.addi %0, %c57_i32_342 : i32
    %689 = arith.index_cast %688 : i32 to index
    %690 = memref.load %arg2[%689] : memref<128xi32, #tpu.memory_space<smem>>
    %691 = arith.index_cast %687 : i32 to index
    %c0_343 = arith.constant 0 : index
    %692 = vector.load %arg3[%691, %c0_343] : memref<32x128xf32, #tpu.memory_space<vmem>>, vector<1x128xf32>
    %c57 = arith.constant 57 : index
    %c0_344 = arith.constant 0 : index
    %693 = vector.load %arg6[%c57, %c0_344] : memref<128x128xf32, #tpu.memory_space<vmem>>, vector<1x128xf32>
    tpu.vector_store %arg6[%c57, %c0_344], %692 {strides = array<i32>} : memref<128x128xf32, #tpu.memory_space<vmem>>, vector<1x128xf32>,
    %694 = arith.index_cast %690 : i32 to index
    %c0_345 = arith.constant 0 : index
    %695 = vector.load %arg4[%694, %c0_345] : memref<48x128xf32, #tpu.memory_space<vmem>>, vector<1x128xf32>
    %c57_346 = arith.constant 57 : index
    %c0_347 = arith.constant 0 : index
    %696 = vector.load %arg7[%c57_346, %c0_347] : memref<128x128xf32, #tpu.memory_space<vmem>>, vector<1x128xf32>
    tpu.vector_store %arg7[%c57_346, %c0_347], %695 {strides = array<i32>} : memref<128x128xf32, #tpu.memory_space<vmem>>, vector<1x128xf32>,
    %c58_i32 = arith.constant 58 : i32
    %697 = arith.addi %0, %c58_i32 : i32
    %698 = arith.index_cast %697 : i32 to index
    %699 = memref.load %arg1[%698] : memref<128xi32, #tpu.memory_space<smem>>
    %c58_i32_348 = arith.constant 58 : i32
    %700 = arith.addi %0, %c58_i32_348 : i32
    %701 = arith.index_cast %700 : i32 to index
    %702 = memref.load %arg2[%701] : memref<128xi32, #tpu.memory_space<smem>>
    %703 = arith.index_cast %699 : i32 to index
    %c0_349 = arith.constant 0 : index
    %704 = vector.load %arg3[%703, %c0_349] : memref<32x128xf32, #tpu.memory_space<vmem>>, vector<1x128xf32>
    %c58 = arith.constant 58 : index
    %c0_350 = arith.constant 0 : index
    %705 = vector.load %arg6[%c58, %c0_350] : memref<128x128xf32, #tpu.memory_space<vmem>>, vector<1x128xf32>
    tpu.vector_store %arg6[%c58, %c0_350], %704 {strides = array<i32>} : memref<128x128xf32, #tpu.memory_space<vmem>>, vector<1x128xf32>,
    %706 = arith.index_cast %702 : i32 to index
    %c0_351 = arith.constant 0 : index
    %707 = vector.load %arg4[%706, %c0_351] : memref<48x128xf32, #tpu.memory_space<vmem>>, vector<1x128xf32>
    %c58_352 = arith.constant 58 : index
    %c0_353 = arith.constant 0 : index
    %708 = vector.load %arg7[%c58_352, %c0_353] : memref<128x128xf32, #tpu.memory_space<vmem>>, vector<1x128xf32>
    tpu.vector_store %arg7[%c58_352, %c0_353], %707 {strides = array<i32>} : memref<128x128xf32, #tpu.memory_space<vmem>>, vector<1x128xf32>,
    %c59_i32 = arith.constant 59 : i32
    %709 = arith.addi %0, %c59_i32 : i32
    %710 = arith.index_cast %709 : i32 to index
    %711 = memref.load %arg1[%710] : memref<128xi32, #tpu.memory_space<smem>>
    %c59_i32_354 = arith.constant 59 : i32
    %712 = arith.addi %0, %c59_i32_354 : i32
    %713 = arith.index_cast %712 : i32 to index
    %714 = memref.load %arg2[%713] : memref<128xi32, #tpu.memory_space<smem>>
    %715 = arith.index_cast %711 : i32 to index
    %c0_355 = arith.constant 0 : index
    %716 = vector.load %arg3[%715, %c0_355] : memref<32x128xf32, #tpu.memory_space<vmem>>, vector<1x128xf32>
    %c59 = arith.constant 59 : index
    %c0_356 = arith.constant 0 : index
    %717 = vector.load %arg6[%c59, %c0_356] : memref<128x128xf32, #tpu.memory_space<vmem>>, vector<1x128xf32>
    tpu.vector_store %arg6[%c59, %c0_356], %716 {strides = array<i32>} : memref<128x128xf32, #tpu.memory_space<vmem>>, vector<1x128xf32>,
    %718 = arith.index_cast %714 : i32 to index
    %c0_357 = arith.constant 0 : index
    %719 = vector.load %arg4[%718, %c0_357] : memref<48x128xf32, #tpu.memory_space<vmem>>, vector<1x128xf32>
    %c59_358 = arith.constant 59 : index
    %c0_359 = arith.constant 0 : index
    %720 = vector.load %arg7[%c59_358, %c0_359] : memref<128x128xf32, #tpu.memory_space<vmem>>, vector<1x128xf32>
    tpu.vector_store %arg7[%c59_358, %c0_359], %719 {strides = array<i32>} : memref<128x128xf32, #tpu.memory_space<vmem>>, vector<1x128xf32>,
    %c60_i32 = arith.constant 60 : i32
    %721 = arith.addi %0, %c60_i32 : i32
    %722 = arith.index_cast %721 : i32 to index
    %723 = memref.load %arg1[%722] : memref<128xi32, #tpu.memory_space<smem>>
    %c60_i32_360 = arith.constant 60 : i32
    %724 = arith.addi %0, %c60_i32_360 : i32
    %725 = arith.index_cast %724 : i32 to index
    %726 = memref.load %arg2[%725] : memref<128xi32, #tpu.memory_space<smem>>
    %727 = arith.index_cast %723 : i32 to index
    %c0_361 = arith.constant 0 : index
    %728 = vector.load %arg3[%727, %c0_361] : memref<32x128xf32, #tpu.memory_space<vmem>>, vector<1x128xf32>
    %c60 = arith.constant 60 : index
    %c0_362 = arith.constant 0 : index
    %729 = vector.load %arg6[%c60, %c0_362] : memref<128x128xf32, #tpu.memory_space<vmem>>, vector<1x128xf32>
    tpu.vector_store %arg6[%c60, %c0_362], %728 {strides = array<i32>} : memref<128x128xf32, #tpu.memory_space<vmem>>, vector<1x128xf32>,
    %730 = arith.index_cast %726 : i32 to index
    %c0_363 = arith.constant 0 : index
    %731 = vector.load %arg4[%730, %c0_363] : memref<48x128xf32, #tpu.memory_space<vmem>>, vector<1x128xf32>
    %c60_364 = arith.constant 60 : index
    %c0_365 = arith.constant 0 : index
    %732 = vector.load %arg7[%c60_364, %c0_365] : memref<128x128xf32, #tpu.memory_space<vmem>>, vector<1x128xf32>
    tpu.vector_store %arg7[%c60_364, %c0_365], %731 {strides = array<i32>} : memref<128x128xf32, #tpu.memory_space<vmem>>, vector<1x128xf32>,
    %c61_i32 = arith.constant 61 : i32
    %733 = arith.addi %0, %c61_i32 : i32
    %734 = arith.index_cast %733 : i32 to index
    %735 = memref.load %arg1[%734] : memref<128xi32, #tpu.memory_space<smem>>
    %c61_i32_366 = arith.constant 61 : i32
    %736 = arith.addi %0, %c61_i32_366 : i32
    %737 = arith.index_cast %736 : i32 to index
    %738 = memref.load %arg2[%737] : memref<128xi32, #tpu.memory_space<smem>>
    %739 = arith.index_cast %735 : i32 to index
    %c0_367 = arith.constant 0 : index
    %740 = vector.load %arg3[%739, %c0_367] : memref<32x128xf32, #tpu.memory_space<vmem>>, vector<1x128xf32>
    %c61 = arith.constant 61 : index
    %c0_368 = arith.constant 0 : index
    %741 = vector.load %arg6[%c61, %c0_368] : memref<128x128xf32, #tpu.memory_space<vmem>>, vector<1x128xf32>
    tpu.vector_store %arg6[%c61, %c0_368], %740 {strides = array<i32>} : memref<128x128xf32, #tpu.memory_space<vmem>>, vector<1x128xf32>,
    %742 = arith.index_cast %738 : i32 to index
    %c0_369 = arith.constant 0 : index
    %743 = vector.load %arg4[%742, %c0_369] : memref<48x128xf32, #tpu.memory_space<vmem>>, vector<1x128xf32>
    %c61_370 = arith.constant 61 : index
    %c0_371 = arith.constant 0 : index
    %744 = vector.load %arg7[%c61_370, %c0_371] : memref<128x128xf32, #tpu.memory_space<vmem>>, vector<1x128xf32>
    tpu.vector_store %arg7[%c61_370, %c0_371], %743 {strides = array<i32>} : memref<128x128xf32, #tpu.memory_space<vmem>>, vector<1x128xf32>,
    %c62_i32 = arith.constant 62 : i32
    %745 = arith.addi %0, %c62_i32 : i32
    %746 = arith.index_cast %745 : i32 to index
    %747 = memref.load %arg1[%746] : memref<128xi32, #tpu.memory_space<smem>>
    %c62_i32_372 = arith.constant 62 : i32
    %748 = arith.addi %0, %c62_i32_372 : i32
    %749 = arith.index_cast %748 : i32 to index
    %750 = memref.load %arg2[%749] : memref<128xi32, #tpu.memory_space<smem>>
    %751 = arith.index_cast %747 : i32 to index
    %c0_373 = arith.constant 0 : index
    %752 = vector.load %arg3[%751, %c0_373] : memref<32x128xf32, #tpu.memory_space<vmem>>, vector<1x128xf32>
    %c62 = arith.constant 62 : index
    %c0_374 = arith.constant 0 : index
    %753 = vector.load %arg6[%c62, %c0_374] : memref<128x128xf32, #tpu.memory_space<vmem>>, vector<1x128xf32>
    tpu.vector_store %arg6[%c62, %c0_374], %752 {strides = array<i32>} : memref<128x128xf32, #tpu.memory_space<vmem>>, vector<1x128xf32>,
    %754 = arith.index_cast %750 : i32 to index
    %c0_375 = arith.constant 0 : index
    %755 = vector.load %arg4[%754, %c0_375] : memref<48x128xf32, #tpu.memory_space<vmem>>, vector<1x128xf32>
    %c62_376 = arith.constant 62 : index
    %c0_377 = arith.constant 0 : index
    %756 = vector.load %arg7[%c62_376, %c0_377] : memref<128x128xf32, #tpu.memory_space<vmem>>, vector<1x128xf32>
    tpu.vector_store %arg7[%c62_376, %c0_377], %755 {strides = array<i32>} : memref<128x128xf32, #tpu.memory_space<vmem>>, vector<1x128xf32>,
    %c63_i32 = arith.constant 63 : i32
    %757 = arith.addi %0, %c63_i32 : i32
    %758 = arith.index_cast %757 : i32 to index
    %759 = memref.load %arg1[%758] : memref<128xi32, #tpu.memory_space<smem>>
    %c63_i32_378 = arith.constant 63 : i32
    %760 = arith.addi %0, %c63_i32_378 : i32
    %761 = arith.index_cast %760 : i32 to index
    %762 = memref.load %arg2[%761] : memref<128xi32, #tpu.memory_space<smem>>
    %763 = arith.index_cast %759 : i32 to index
    %c0_379 = arith.constant 0 : index
    %764 = vector.load %arg3[%763, %c0_379] : memref<32x128xf32, #tpu.memory_space<vmem>>, vector<1x128xf32>
    %c63 = arith.constant 63 : index
    %c0_380 = arith.constant 0 : index
    %765 = vector.load %arg6[%c63, %c0_380] : memref<128x128xf32, #tpu.memory_space<vmem>>, vector<1x128xf32>
    tpu.vector_store %arg6[%c63, %c0_380], %764 {strides = array<i32>} : memref<128x128xf32, #tpu.memory_space<vmem>>, vector<1x128xf32>,
    %766 = arith.index_cast %762 : i32 to index
    %c0_381 = arith.constant 0 : index
    %767 = vector.load %arg4[%766, %c0_381] : memref<48x128xf32, #tpu.memory_space<vmem>>, vector<1x128xf32>
    %c63_382 = arith.constant 63 : index
    %c0_383 = arith.constant 0 : index
    %768 = vector.load %arg7[%c63_382, %c0_383] : memref<128x128xf32, #tpu.memory_space<vmem>>, vector<1x128xf32>
    tpu.vector_store %arg7[%c63_382, %c0_383], %767 {strides = array<i32>} : memref<128x128xf32, #tpu.memory_space<vmem>>, vector<1x128xf32>,
    %c64_i32 = arith.constant 64 : i32
    %769 = arith.addi %0, %c64_i32 : i32
    %770 = arith.index_cast %769 : i32 to index
    %771 = memref.load %arg1[%770] : memref<128xi32, #tpu.memory_space<smem>>
    %c64_i32_384 = arith.constant 64 : i32
    %772 = arith.addi %0, %c64_i32_384 : i32
    %773 = arith.index_cast %772 : i32 to index
    %774 = memref.load %arg2[%773] : memref<128xi32, #tpu.memory_space<smem>>
    %775 = arith.index_cast %771 : i32 to index
    %c0_385 = arith.constant 0 : index
    %776 = vector.load %arg3[%775, %c0_385] : memref<32x128xf32, #tpu.memory_space<vmem>>, vector<1x128xf32>
    %c64 = arith.constant 64 : index
    %c0_386 = arith.constant 0 : index
    %777 = vector.load %arg6[%c64, %c0_386] : memref<128x128xf32, #tpu.memory_space<vmem>>, vector<1x128xf32>
    tpu.vector_store %arg6[%c64, %c0_386], %776 {strides = array<i32>} : memref<128x128xf32, #tpu.memory_space<vmem>>, vector<1x128xf32>,
    %778 = arith.index_cast %774 : i32 to index
    %c0_387 = arith.constant 0 : index
    %779 = vector.load %arg4[%778, %c0_387] : memref<48x128xf32, #tpu.memory_space<vmem>>, vector<1x128xf32>
    %c64_388 = arith.constant 64 : index
    %c0_389 = arith.constant 0 : index
    %780 = vector.load %arg7[%c64_388, %c0_389] : memref<128x128xf32, #tpu.memory_space<vmem>>, vector<1x128xf32>
    tpu.vector_store %arg7[%c64_388, %c0_389], %779 {strides = array<i32>} : memref<128x128xf32, #tpu.memory_space<vmem>>, vector<1x128xf32>,
    %c65_i32 = arith.constant 65 : i32
    %781 = arith.addi %0, %c65_i32 : i32
    %782 = arith.index_cast %781 : i32 to index
    %783 = memref.load %arg1[%782] : memref<128xi32, #tpu.memory_space<smem>>
    %c65_i32_390 = arith.constant 65 : i32
    %784 = arith.addi %0, %c65_i32_390 : i32
    %785 = arith.index_cast %784 : i32 to index
    %786 = memref.load %arg2[%785] : memref<128xi32, #tpu.memory_space<smem>>
    %787 = arith.index_cast %783 : i32 to index
    %c0_391 = arith.constant 0 : index
    %788 = vector.load %arg3[%787, %c0_391] : memref<32x128xf32, #tpu.memory_space<vmem>>, vector<1x128xf32>
    %c65 = arith.constant 65 : index
    %c0_392 = arith.constant 0 : index
    %789 = vector.load %arg6[%c65, %c0_392] : memref<128x128xf32, #tpu.memory_space<vmem>>, vector<1x128xf32>
    tpu.vector_store %arg6[%c65, %c0_392], %788 {strides = array<i32>} : memref<128x128xf32, #tpu.memory_space<vmem>>, vector<1x128xf32>,
    %790 = arith.index_cast %786 : i32 to index
    %c0_393 = arith.constant 0 : index
    %791 = vector.load %arg4[%790, %c0_393] : memref<48x128xf32, #tpu.memory_space<vmem>>, vector<1x128xf32>
    %c65_394 = arith.constant 65 : index
    %c0_395 = arith.constant 0 : index
    %792 = vector.load %arg7[%c65_394, %c0_395] : memref<128x128xf32, #tpu.memory_space<vmem>>, vector<1x128xf32>
    tpu.vector_store %arg7[%c65_394, %c0_395], %791 {strides = array<i32>} : memref<128x128xf32, #tpu.memory_space<vmem>>, vector<1x128xf32>,
    %c66_i32 = arith.constant 66 : i32
    %793 = arith.addi %0, %c66_i32 : i32
    %794 = arith.index_cast %793 : i32 to index
    %795 = memref.load %arg1[%794] : memref<128xi32, #tpu.memory_space<smem>>
    %c66_i32_396 = arith.constant 66 : i32
    %796 = arith.addi %0, %c66_i32_396 : i32
    %797 = arith.index_cast %796 : i32 to index
    %798 = memref.load %arg2[%797] : memref<128xi32, #tpu.memory_space<smem>>
    %799 = arith.index_cast %795 : i32 to index
    %c0_397 = arith.constant 0 : index
    %800 = vector.load %arg3[%799, %c0_397] : memref<32x128xf32, #tpu.memory_space<vmem>>, vector<1x128xf32>
    %c66 = arith.constant 66 : index
    %c0_398 = arith.constant 0 : index
    %801 = vector.load %arg6[%c66, %c0_398] : memref<128x128xf32, #tpu.memory_space<vmem>>, vector<1x128xf32>
    tpu.vector_store %arg6[%c66, %c0_398], %800 {strides = array<i32>} : memref<128x128xf32, #tpu.memory_space<vmem>>, vector<1x128xf32>,
    %802 = arith.index_cast %798 : i32 to index
    %c0_399 = arith.constant 0 : index
    %803 = vector.load %arg4[%802, %c0_399] : memref<48x128xf32, #tpu.memory_space<vmem>>, vector<1x128xf32>
    %c66_400 = arith.constant 66 : index
    %c0_401 = arith.constant 0 : index
    %804 = vector.load %arg7[%c66_400, %c0_401] : memref<128x128xf32, #tpu.memory_space<vmem>>, vector<1x128xf32>
    tpu.vector_store %arg7[%c66_400, %c0_401], %803 {strides = array<i32>} : memref<128x128xf32, #tpu.memory_space<vmem>>, vector<1x128xf32>,
    %c67_i32 = arith.constant 67 : i32
    %805 = arith.addi %0, %c67_i32 : i32
    %806 = arith.index_cast %805 : i32 to index
    %807 = memref.load %arg1[%806] : memref<128xi32, #tpu.memory_space<smem>>
    %c67_i32_402 = arith.constant 67 : i32
    %808 = arith.addi %0, %c67_i32_402 : i32
    %809 = arith.index_cast %808 : i32 to index
    %810 = memref.load %arg2[%809] : memref<128xi32, #tpu.memory_space<smem>>
    %811 = arith.index_cast %807 : i32 to index
    %c0_403 = arith.constant 0 : index
    %812 = vector.load %arg3[%811, %c0_403] : memref<32x128xf32, #tpu.memory_space<vmem>>, vector<1x128xf32>
    %c67 = arith.constant 67 : index
    %c0_404 = arith.constant 0 : index
    %813 = vector.load %arg6[%c67, %c0_404] : memref<128x128xf32, #tpu.memory_space<vmem>>, vector<1x128xf32>
    tpu.vector_store %arg6[%c67, %c0_404], %812 {strides = array<i32>} : memref<128x128xf32, #tpu.memory_space<vmem>>, vector<1x128xf32>,
    %814 = arith.index_cast %810 : i32 to index
    %c0_405 = arith.constant 0 : index
    %815 = vector.load %arg4[%814, %c0_405] : memref<48x128xf32, #tpu.memory_space<vmem>>, vector<1x128xf32>
    %c67_406 = arith.constant 67 : index
    %c0_407 = arith.constant 0 : index
    %816 = vector.load %arg7[%c67_406, %c0_407] : memref<128x128xf32, #tpu.memory_space<vmem>>, vector<1x128xf32>
    tpu.vector_store %arg7[%c67_406, %c0_407], %815 {strides = array<i32>} : memref<128x128xf32, #tpu.memory_space<vmem>>, vector<1x128xf32>,
    %c68_i32 = arith.constant 68 : i32
    %817 = arith.addi %0, %c68_i32 : i32
    %818 = arith.index_cast %817 : i32 to index
    %819 = memref.load %arg1[%818] : memref<128xi32, #tpu.memory_space<smem>>
    %c68_i32_408 = arith.constant 68 : i32
    %820 = arith.addi %0, %c68_i32_408 : i32
    %821 = arith.index_cast %820 : i32 to index
    %822 = memref.load %arg2[%821] : memref<128xi32, #tpu.memory_space<smem>>
    %823 = arith.index_cast %819 : i32 to index
    %c0_409 = arith.constant 0 : index
    %824 = vector.load %arg3[%823, %c0_409] : memref<32x128xf32, #tpu.memory_space<vmem>>, vector<1x128xf32>
    %c68 = arith.constant 68 : index
    %c0_410 = arith.constant 0 : index
    %825 = vector.load %arg6[%c68, %c0_410] : memref<128x128xf32, #tpu.memory_space<vmem>>, vector<1x128xf32>
    tpu.vector_store %arg6[%c68, %c0_410], %824 {strides = array<i32>} : memref<128x128xf32, #tpu.memory_space<vmem>>, vector<1x128xf32>,
    %826 = arith.index_cast %822 : i32 to index
    %c0_411 = arith.constant 0 : index
    %827 = vector.load %arg4[%826, %c0_411] : memref<48x128xf32, #tpu.memory_space<vmem>>, vector<1x128xf32>
    %c68_412 = arith.constant 68 : index
    %c0_413 = arith.constant 0 : index
    %828 = vector.load %arg7[%c68_412, %c0_413] : memref<128x128xf32, #tpu.memory_space<vmem>>, vector<1x128xf32>
    tpu.vector_store %arg7[%c68_412, %c0_413], %827 {strides = array<i32>} : memref<128x128xf32, #tpu.memory_space<vmem>>, vector<1x128xf32>,
    %c69_i32 = arith.constant 69 : i32
    %829 = arith.addi %0, %c69_i32 : i32
    %830 = arith.index_cast %829 : i32 to index
    %831 = memref.load %arg1[%830] : memref<128xi32, #tpu.memory_space<smem>>
    %c69_i32_414 = arith.constant 69 : i32
    %832 = arith.addi %0, %c69_i32_414 : i32
    %833 = arith.index_cast %832 : i32 to index
    %834 = memref.load %arg2[%833] : memref<128xi32, #tpu.memory_space<smem>>
    %835 = arith.index_cast %831 : i32 to index
    %c0_415 = arith.constant 0 : index
    %836 = vector.load %arg3[%835, %c0_415] : memref<32x128xf32, #tpu.memory_space<vmem>>, vector<1x128xf32>
    %c69 = arith.constant 69 : index
    %c0_416 = arith.constant 0 : index
    %837 = vector.load %arg6[%c69, %c0_416] : memref<128x128xf32, #tpu.memory_space<vmem>>, vector<1x128xf32>
    tpu.vector_store %arg6[%c69, %c0_416], %836 {strides = array<i32>} : memref<128x128xf32, #tpu.memory_space<vmem>>, vector<1x128xf32>,
    %838 = arith.index_cast %834 : i32 to index
    %c0_417 = arith.constant 0 : index
    %839 = vector.load %arg4[%838, %c0_417] : memref<48x128xf32, #tpu.memory_space<vmem>>, vector<1x128xf32>
    %c69_418 = arith.constant 69 : index
    %c0_419 = arith.constant 0 : index
    %840 = vector.load %arg7[%c69_418, %c0_419] : memref<128x128xf32, #tpu.memory_space<vmem>>, vector<1x128xf32>
    tpu.vector_store %arg7[%c69_418, %c0_419], %839 {strides = array<i32>} : memref<128x128xf32, #tpu.memory_space<vmem>>, vector<1x128xf32>,
    %c70_i32 = arith.constant 70 : i32
    %841 = arith.addi %0, %c70_i32 : i32
    %842 = arith.index_cast %841 : i32 to index
    %843 = memref.load %arg1[%842] : memref<128xi32, #tpu.memory_space<smem>>
    %c70_i32_420 = arith.constant 70 : i32
    %844 = arith.addi %0, %c70_i32_420 : i32
    %845 = arith.index_cast %844 : i32 to index
    %846 = memref.load %arg2[%845] : memref<128xi32, #tpu.memory_space<smem>>
    %847 = arith.index_cast %843 : i32 to index
    %c0_421 = arith.constant 0 : index
    %848 = vector.load %arg3[%847, %c0_421] : memref<32x128xf32, #tpu.memory_space<vmem>>, vector<1x128xf32>
    %c70 = arith.constant 70 : index
    %c0_422 = arith.constant 0 : index
    %849 = vector.load %arg6[%c70, %c0_422] : memref<128x128xf32, #tpu.memory_space<vmem>>, vector<1x128xf32>
    tpu.vector_store %arg6[%c70, %c0_422], %848 {strides = array<i32>} : memref<128x128xf32, #tpu.memory_space<vmem>>, vector<1x128xf32>,
    %850 = arith.index_cast %846 : i32 to index
    %c0_423 = arith.constant 0 : index
    %851 = vector.load %arg4[%850, %c0_423] : memref<48x128xf32, #tpu.memory_space<vmem>>, vector<1x128xf32>
    %c70_424 = arith.constant 70 : index
    %c0_425 = arith.constant 0 : index
    %852 = vector.load %arg7[%c70_424, %c0_425] : memref<128x128xf32, #tpu.memory_space<vmem>>, vector<1x128xf32>
    tpu.vector_store %arg7[%c70_424, %c0_425], %851 {strides = array<i32>} : memref<128x128xf32, #tpu.memory_space<vmem>>, vector<1x128xf32>,
    %c71_i32 = arith.constant 71 : i32
    %853 = arith.addi %0, %c71_i32 : i32
    %854 = arith.index_cast %853 : i32 to index
    %855 = memref.load %arg1[%854] : memref<128xi32, #tpu.memory_space<smem>>
    %c71_i32_426 = arith.constant 71 : i32
    %856 = arith.addi %0, %c71_i32_426 : i32
    %857 = arith.index_cast %856 : i32 to index
    %858 = memref.load %arg2[%857] : memref<128xi32, #tpu.memory_space<smem>>
    %859 = arith.index_cast %855 : i32 to index
    %c0_427 = arith.constant 0 : index
    %860 = vector.load %arg3[%859, %c0_427] : memref<32x128xf32, #tpu.memory_space<vmem>>, vector<1x128xf32>
    %c71 = arith.constant 71 : index
    %c0_428 = arith.constant 0 : index
    %861 = vector.load %arg6[%c71, %c0_428] : memref<128x128xf32, #tpu.memory_space<vmem>>, vector<1x128xf32>
    tpu.vector_store %arg6[%c71, %c0_428], %860 {strides = array<i32>} : memref<128x128xf32, #tpu.memory_space<vmem>>, vector<1x128xf32>,
    %862 = arith.index_cast %858 : i32 to index
    %c0_429 = arith.constant 0 : index
    %863 = vector.load %arg4[%862, %c0_429] : memref<48x128xf32, #tpu.memory_space<vmem>>, vector<1x128xf32>
    %c71_430 = arith.constant 71 : index
    %c0_431 = arith.constant 0 : index
    %864 = vector.load %arg7[%c71_430, %c0_431] : memref<128x128xf32, #tpu.memory_space<vmem>>, vector<1x128xf32>
    tpu.vector_store %arg7[%c71_430, %c0_431], %863 {strides = array<i32>} : memref<128x128xf32, #tpu.memory_space<vmem>>, vector<1x128xf32>,
    %c72_i32 = arith.constant 72 : i32
    %865 = arith.addi %0, %c72_i32 : i32
    %866 = arith.index_cast %865 : i32 to index
    %867 = memref.load %arg1[%866] : memref<128xi32, #tpu.memory_space<smem>>
    %c72_i32_432 = arith.constant 72 : i32
    %868 = arith.addi %0, %c72_i32_432 : i32
    %869 = arith.index_cast %868 : i32 to index
    %870 = memref.load %arg2[%869] : memref<128xi32, #tpu.memory_space<smem>>
    %871 = arith.index_cast %867 : i32 to index
    %c0_433 = arith.constant 0 : index
    %872 = vector.load %arg3[%871, %c0_433] : memref<32x128xf32, #tpu.memory_space<vmem>>, vector<1x128xf32>
    %c72 = arith.constant 72 : index
    %c0_434 = arith.constant 0 : index
    %873 = vector.load %arg6[%c72, %c0_434] : memref<128x128xf32, #tpu.memory_space<vmem>>, vector<1x128xf32>
    tpu.vector_store %arg6[%c72, %c0_434], %872 {strides = array<i32>} : memref<128x128xf32, #tpu.memory_space<vmem>>, vector<1x128xf32>,
    %874 = arith.index_cast %870 : i32 to index
    %c0_435 = arith.constant 0 : index
    %875 = vector.load %arg4[%874, %c0_435] : memref<48x128xf32, #tpu.memory_space<vmem>>, vector<1x128xf32>
    %c72_436 = arith.constant 72 : index
    %c0_437 = arith.constant 0 : index
    %876 = vector.load %arg7[%c72_436, %c0_437] : memref<128x128xf32, #tpu.memory_space<vmem>>, vector<1x128xf32>
    tpu.vector_store %arg7[%c72_436, %c0_437], %875 {strides = array<i32>} : memref<128x128xf32, #tpu.memory_space<vmem>>, vector<1x128xf32>,
    %c73_i32 = arith.constant 73 : i32
    %877 = arith.addi %0, %c73_i32 : i32
    %878 = arith.index_cast %877 : i32 to index
    %879 = memref.load %arg1[%878] : memref<128xi32, #tpu.memory_space<smem>>
    %c73_i32_438 = arith.constant 73 : i32
    %880 = arith.addi %0, %c73_i32_438 : i32
    %881 = arith.index_cast %880 : i32 to index
    %882 = memref.load %arg2[%881] : memref<128xi32, #tpu.memory_space<smem>>
    %883 = arith.index_cast %879 : i32 to index
    %c0_439 = arith.constant 0 : index
    %884 = vector.load %arg3[%883, %c0_439] : memref<32x128xf32, #tpu.memory_space<vmem>>, vector<1x128xf32>
    %c73 = arith.constant 73 : index
    %c0_440 = arith.constant 0 : index
    %885 = vector.load %arg6[%c73, %c0_440] : memref<128x128xf32, #tpu.memory_space<vmem>>, vector<1x128xf32>
    tpu.vector_store %arg6[%c73, %c0_440], %884 {strides = array<i32>} : memref<128x128xf32, #tpu.memory_space<vmem>>, vector<1x128xf32>,
    %886 = arith.index_cast %882 : i32 to index
    %c0_441 = arith.constant 0 : index
    %887 = vector.load %arg4[%886, %c0_441] : memref<48x128xf32, #tpu.memory_space<vmem>>, vector<1x128xf32>
    %c73_442 = arith.constant 73 : index
    %c0_443 = arith.constant 0 : index
    %888 = vector.load %arg7[%c73_442, %c0_443] : memref<128x128xf32, #tpu.memory_space<vmem>>, vector<1x128xf32>
    tpu.vector_store %arg7[%c73_442, %c0_443], %887 {strides = array<i32>} : memref<128x128xf32, #tpu.memory_space<vmem>>, vector<1x128xf32>,
    %c74_i32 = arith.constant 74 : i32
    %889 = arith.addi %0, %c74_i32 : i32
    %890 = arith.index_cast %889 : i32 to index
    %891 = memref.load %arg1[%890] : memref<128xi32, #tpu.memory_space<smem>>
    %c74_i32_444 = arith.constant 74 : i32
    %892 = arith.addi %0, %c74_i32_444 : i32
    %893 = arith.index_cast %892 : i32 to index
    %894 = memref.load %arg2[%893] : memref<128xi32, #tpu.memory_space<smem>>
    %895 = arith.index_cast %891 : i32 to index
    %c0_445 = arith.constant 0 : index
    %896 = vector.load %arg3[%895, %c0_445] : memref<32x128xf32, #tpu.memory_space<vmem>>, vector<1x128xf32>
    %c74 = arith.constant 74 : index
    %c0_446 = arith.constant 0 : index
    %897 = vector.load %arg6[%c74, %c0_446] : memref<128x128xf32, #tpu.memory_space<vmem>>, vector<1x128xf32>
    tpu.vector_store %arg6[%c74, %c0_446], %896 {strides = array<i32>} : memref<128x128xf32, #tpu.memory_space<vmem>>, vector<1x128xf32>,
    %898 = arith.index_cast %894 : i32 to index
    %c0_447 = arith.constant 0 : index
    %899 = vector.load %arg4[%898, %c0_447] : memref<48x128xf32, #tpu.memory_space<vmem>>, vector<1x128xf32>
    %c74_448 = arith.constant 74 : index
    %c0_449 = arith.constant 0 : index
    %900 = vector.load %arg7[%c74_448, %c0_449] : memref<128x128xf32, #tpu.memory_space<vmem>>, vector<1x128xf32>
    tpu.vector_store %arg7[%c74_448, %c0_449], %899 {strides = array<i32>} : memref<128x128xf32, #tpu.memory_space<vmem>>, vector<1x128xf32>,
    %c75_i32 = arith.constant 75 : i32
    %901 = arith.addi %0, %c75_i32 : i32
    %902 = arith.index_cast %901 : i32 to index
    %903 = memref.load %arg1[%902] : memref<128xi32, #tpu.memory_space<smem>>
    %c75_i32_450 = arith.constant 75 : i32
    %904 = arith.addi %0, %c75_i32_450 : i32
    %905 = arith.index_cast %904 : i32 to index
    %906 = memref.load %arg2[%905] : memref<128xi32, #tpu.memory_space<smem>>
    %907 = arith.index_cast %903 : i32 to index
    %c0_451 = arith.constant 0 : index
    %908 = vector.load %arg3[%907, %c0_451] : memref<32x128xf32, #tpu.memory_space<vmem>>, vector<1x128xf32>
    %c75 = arith.constant 75 : index
    %c0_452 = arith.constant 0 : index
    %909 = vector.load %arg6[%c75, %c0_452] : memref<128x128xf32, #tpu.memory_space<vmem>>, vector<1x128xf32>
    tpu.vector_store %arg6[%c75, %c0_452], %908 {strides = array<i32>} : memref<128x128xf32, #tpu.memory_space<vmem>>, vector<1x128xf32>,
    %910 = arith.index_cast %906 : i32 to index
    %c0_453 = arith.constant 0 : index
    %911 = vector.load %arg4[%910, %c0_453] : memref<48x128xf32, #tpu.memory_space<vmem>>, vector<1x128xf32>
    %c75_454 = arith.constant 75 : index
    %c0_455 = arith.constant 0 : index
    %912 = vector.load %arg7[%c75_454, %c0_455] : memref<128x128xf32, #tpu.memory_space<vmem>>, vector<1x128xf32>
    tpu.vector_store %arg7[%c75_454, %c0_455], %911 {strides = array<i32>} : memref<128x128xf32, #tpu.memory_space<vmem>>, vector<1x128xf32>,
    %c76_i32 = arith.constant 76 : i32
    %913 = arith.addi %0, %c76_i32 : i32
    %914 = arith.index_cast %913 : i32 to index
    %915 = memref.load %arg1[%914] : memref<128xi32, #tpu.memory_space<smem>>
    %c76_i32_456 = arith.constant 76 : i32
    %916 = arith.addi %0, %c76_i32_456 : i32
    %917 = arith.index_cast %916 : i32 to index
    %918 = memref.load %arg2[%917] : memref<128xi32, #tpu.memory_space<smem>>
    %919 = arith.index_cast %915 : i32 to index
    %c0_457 = arith.constant 0 : index
    %920 = vector.load %arg3[%919, %c0_457] : memref<32x128xf32, #tpu.memory_space<vmem>>, vector<1x128xf32>
    %c76 = arith.constant 76 : index
    %c0_458 = arith.constant 0 : index
    %921 = vector.load %arg6[%c76, %c0_458] : memref<128x128xf32, #tpu.memory_space<vmem>>, vector<1x128xf32>
    tpu.vector_store %arg6[%c76, %c0_458], %920 {strides = array<i32>} : memref<128x128xf32, #tpu.memory_space<vmem>>, vector<1x128xf32>,
    %922 = arith.index_cast %918 : i32 to index
    %c0_459 = arith.constant 0 : index
    %923 = vector.load %arg4[%922, %c0_459] : memref<48x128xf32, #tpu.memory_space<vmem>>, vector<1x128xf32>
    %c76_460 = arith.constant 76 : index
    %c0_461 = arith.constant 0 : index
    %924 = vector.load %arg7[%c76_460, %c0_461] : memref<128x128xf32, #tpu.memory_space<vmem>>, vector<1x128xf32>
    tpu.vector_store %arg7[%c76_460, %c0_461], %923 {strides = array<i32>} : memref<128x128xf32, #tpu.memory_space<vmem>>, vector<1x128xf32>,
    %c77_i32 = arith.constant 77 : i32
    %925 = arith.addi %0, %c77_i32 : i32
    %926 = arith.index_cast %925 : i32 to index
    %927 = memref.load %arg1[%926] : memref<128xi32, #tpu.memory_space<smem>>
    %c77_i32_462 = arith.constant 77 : i32
    %928 = arith.addi %0, %c77_i32_462 : i32
    %929 = arith.index_cast %928 : i32 to index
    %930 = memref.load %arg2[%929] : memref<128xi32, #tpu.memory_space<smem>>
    %931 = arith.index_cast %927 : i32 to index
    %c0_463 = arith.constant 0 : index
    %932 = vector.load %arg3[%931, %c0_463] : memref<32x128xf32, #tpu.memory_space<vmem>>, vector<1x128xf32>
    %c77 = arith.constant 77 : index
    %c0_464 = arith.constant 0 : index
    %933 = vector.load %arg6[%c77, %c0_464] : memref<128x128xf32, #tpu.memory_space<vmem>>, vector<1x128xf32>
    tpu.vector_store %arg6[%c77, %c0_464], %932 {strides = array<i32>} : memref<128x128xf32, #tpu.memory_space<vmem>>, vector<1x128xf32>,
    %934 = arith.index_cast %930 : i32 to index
    %c0_465 = arith.constant 0 : index
    %935 = vector.load %arg4[%934, %c0_465] : memref<48x128xf32, #tpu.memory_space<vmem>>, vector<1x128xf32>
    %c77_466 = arith.constant 77 : index
    %c0_467 = arith.constant 0 : index
    %936 = vector.load %arg7[%c77_466, %c0_467] : memref<128x128xf32, #tpu.memory_space<vmem>>, vector<1x128xf32>
    tpu.vector_store %arg7[%c77_466, %c0_467], %935 {strides = array<i32>} : memref<128x128xf32, #tpu.memory_space<vmem>>, vector<1x128xf32>,
    %c78_i32 = arith.constant 78 : i32
    %937 = arith.addi %0, %c78_i32 : i32
    %938 = arith.index_cast %937 : i32 to index
    %939 = memref.load %arg1[%938] : memref<128xi32, #tpu.memory_space<smem>>
    %c78_i32_468 = arith.constant 78 : i32
    %940 = arith.addi %0, %c78_i32_468 : i32
    %941 = arith.index_cast %940 : i32 to index
    %942 = memref.load %arg2[%941] : memref<128xi32, #tpu.memory_space<smem>>
    %943 = arith.index_cast %939 : i32 to index
    %c0_469 = arith.constant 0 : index
    %944 = vector.load %arg3[%943, %c0_469] : memref<32x128xf32, #tpu.memory_space<vmem>>, vector<1x128xf32>
    %c78 = arith.constant 78 : index
    %c0_470 = arith.constant 0 : index
    %945 = vector.load %arg6[%c78, %c0_470] : memref<128x128xf32, #tpu.memory_space<vmem>>, vector<1x128xf32>
    tpu.vector_store %arg6[%c78, %c0_470], %944 {strides = array<i32>} : memref<128x128xf32, #tpu.memory_space<vmem>>, vector<1x128xf32>,
    %946 = arith.index_cast %942 : i32 to index
    %c0_471 = arith.constant 0 : index
    %947 = vector.load %arg4[%946, %c0_471] : memref<48x128xf32, #tpu.memory_space<vmem>>, vector<1x128xf32>
    %c78_472 = arith.constant 78 : index
    %c0_473 = arith.constant 0 : index
    %948 = vector.load %arg7[%c78_472, %c0_473] : memref<128x128xf32, #tpu.memory_space<vmem>>, vector<1x128xf32>
    tpu.vector_store %arg7[%c78_472, %c0_473], %947 {strides = array<i32>} : memref<128x128xf32, #tpu.memory_space<vmem>>, vector<1x128xf32>,
    %c79_i32 = arith.constant 79 : i32
    %949 = arith.addi %0, %c79_i32 : i32
    %950 = arith.index_cast %949 : i32 to index
    %951 = memref.load %arg1[%950] : memref<128xi32, #tpu.memory_space<smem>>
    %c79_i32_474 = arith.constant 79 : i32
    %952 = arith.addi %0, %c79_i32_474 : i32
    %953 = arith.index_cast %952 : i32 to index
    %954 = memref.load %arg2[%953] : memref<128xi32, #tpu.memory_space<smem>>
    %955 = arith.index_cast %951 : i32 to index
    %c0_475 = arith.constant 0 : index
    %956 = vector.load %arg3[%955, %c0_475] : memref<32x128xf32, #tpu.memory_space<vmem>>, vector<1x128xf32>
    %c79 = arith.constant 79 : index
    %c0_476 = arith.constant 0 : index
    %957 = vector.load %arg6[%c79, %c0_476] : memref<128x128xf32, #tpu.memory_space<vmem>>, vector<1x128xf32>
    tpu.vector_store %arg6[%c79, %c0_476], %956 {strides = array<i32>} : memref<128x128xf32, #tpu.memory_space<vmem>>, vector<1x128xf32>,
    %958 = arith.index_cast %954 : i32 to index
    %c0_477 = arith.constant 0 : index
    %959 = vector.load %arg4[%958, %c0_477] : memref<48x128xf32, #tpu.memory_space<vmem>>, vector<1x128xf32>
    %c79_478 = arith.constant 79 : index
    %c0_479 = arith.constant 0 : index
    %960 = vector.load %arg7[%c79_478, %c0_479] : memref<128x128xf32, #tpu.memory_space<vmem>>, vector<1x128xf32>
    tpu.vector_store %arg7[%c79_478, %c0_479], %959 {strides = array<i32>} : memref<128x128xf32, #tpu.memory_space<vmem>>, vector<1x128xf32>,
    %c80_i32 = arith.constant 80 : i32
    %961 = arith.addi %0, %c80_i32 : i32
    %962 = arith.index_cast %961 : i32 to index
    %963 = memref.load %arg1[%962] : memref<128xi32, #tpu.memory_space<smem>>
    %c80_i32_480 = arith.constant 80 : i32
    %964 = arith.addi %0, %c80_i32_480 : i32
    %965 = arith.index_cast %964 : i32 to index
    %966 = memref.load %arg2[%965] : memref<128xi32, #tpu.memory_space<smem>>
    %967 = arith.index_cast %963 : i32 to index
    %c0_481 = arith.constant 0 : index
    %968 = vector.load %arg3[%967, %c0_481] : memref<32x128xf32, #tpu.memory_space<vmem>>, vector<1x128xf32>
    %c80 = arith.constant 80 : index
    %c0_482 = arith.constant 0 : index
    %969 = vector.load %arg6[%c80, %c0_482] : memref<128x128xf32, #tpu.memory_space<vmem>>, vector<1x128xf32>
    tpu.vector_store %arg6[%c80, %c0_482], %968 {strides = array<i32>} : memref<128x128xf32, #tpu.memory_space<vmem>>, vector<1x128xf32>,
    %970 = arith.index_cast %966 : i32 to index
    %c0_483 = arith.constant 0 : index
    %971 = vector.load %arg4[%970, %c0_483] : memref<48x128xf32, #tpu.memory_space<vmem>>, vector<1x128xf32>
    %c80_484 = arith.constant 80 : index
    %c0_485 = arith.constant 0 : index
    %972 = vector.load %arg7[%c80_484, %c0_485] : memref<128x128xf32, #tpu.memory_space<vmem>>, vector<1x128xf32>
    tpu.vector_store %arg7[%c80_484, %c0_485], %971 {strides = array<i32>} : memref<128x128xf32, #tpu.memory_space<vmem>>, vector<1x128xf32>,
    %c81_i32 = arith.constant 81 : i32
    %973 = arith.addi %0, %c81_i32 : i32
    %974 = arith.index_cast %973 : i32 to index
    %975 = memref.load %arg1[%974] : memref<128xi32, #tpu.memory_space<smem>>
    %c81_i32_486 = arith.constant 81 : i32
    %976 = arith.addi %0, %c81_i32_486 : i32
    %977 = arith.index_cast %976 : i32 to index
    %978 = memref.load %arg2[%977] : memref<128xi32, #tpu.memory_space<smem>>
    %979 = arith.index_cast %975 : i32 to index
    %c0_487 = arith.constant 0 : index
    %980 = vector.load %arg3[%979, %c0_487] : memref<32x128xf32, #tpu.memory_space<vmem>>, vector<1x128xf32>
    %c81 = arith.constant 81 : index
    %c0_488 = arith.constant 0 : index
    %981 = vector.load %arg6[%c81, %c0_488] : memref<128x128xf32, #tpu.memory_space<vmem>>, vector<1x128xf32>
    tpu.vector_store %arg6[%c81, %c0_488], %980 {strides = array<i32>} : memref<128x128xf32, #tpu.memory_space<vmem>>, vector<1x128xf32>,
    %982 = arith.index_cast %978 : i32 to index
    %c0_489 = arith.constant 0 : index
    %983 = vector.load %arg4[%982, %c0_489] : memref<48x128xf32, #tpu.memory_space<vmem>>, vector<1x128xf32>
    %c81_490 = arith.constant 81 : index
    %c0_491 = arith.constant 0 : index
    %984 = vector.load %arg7[%c81_490, %c0_491] : memref<128x128xf32, #tpu.memory_space<vmem>>, vector<1x128xf32>
    tpu.vector_store %arg7[%c81_490, %c0_491], %983 {strides = array<i32>} : memref<128x128xf32, #tpu.memory_space<vmem>>, vector<1x128xf32>,
    %c82_i32 = arith.constant 82 : i32
    %985 = arith.addi %0, %c82_i32 : i32
    %986 = arith.index_cast %985 : i32 to index
    %987 = memref.load %arg1[%986] : memref<128xi32, #tpu.memory_space<smem>>
    %c82_i32_492 = arith.constant 82 : i32
    %988 = arith.addi %0, %c82_i32_492 : i32
    %989 = arith.index_cast %988 : i32 to index
    %990 = memref.load %arg2[%989] : memref<128xi32, #tpu.memory_space<smem>>
    %991 = arith.index_cast %987 : i32 to index
    %c0_493 = arith.constant 0 : index
    %992 = vector.load %arg3[%991, %c0_493] : memref<32x128xf32, #tpu.memory_space<vmem>>, vector<1x128xf32>
    %c82 = arith.constant 82 : index
    %c0_494 = arith.constant 0 : index
    %993 = vector.load %arg6[%c82, %c0_494] : memref<128x128xf32, #tpu.memory_space<vmem>>, vector<1x128xf32>
    tpu.vector_store %arg6[%c82, %c0_494], %992 {strides = array<i32>} : memref<128x128xf32, #tpu.memory_space<vmem>>, vector<1x128xf32>,
    %994 = arith.index_cast %990 : i32 to index
    %c0_495 = arith.constant 0 : index
    %995 = vector.load %arg4[%994, %c0_495] : memref<48x128xf32, #tpu.memory_space<vmem>>, vector<1x128xf32>
    %c82_496 = arith.constant 82 : index
    %c0_497 = arith.constant 0 : index
    %996 = vector.load %arg7[%c82_496, %c0_497] : memref<128x128xf32, #tpu.memory_space<vmem>>, vector<1x128xf32>
    tpu.vector_store %arg7[%c82_496, %c0_497], %995 {strides = array<i32>} : memref<128x128xf32, #tpu.memory_space<vmem>>, vector<1x128xf32>,
    %c83_i32 = arith.constant 83 : i32
    %997 = arith.addi %0, %c83_i32 : i32
    %998 = arith.index_cast %997 : i32 to index
    %999 = memref.load %arg1[%998] : memref<128xi32, #tpu.memory_space<smem>>
    %c83_i32_498 = arith.constant 83 : i32
    %1000 = arith.addi %0, %c83_i32_498 : i32
    %1001 = arith.index_cast %1000 : i32 to index
    %1002 = memref.load %arg2[%1001] : memref<128xi32, #tpu.memory_space<smem>>
    %1003 = arith.index_cast %999 : i32 to index
    %c0_499 = arith.constant 0 : index
    %1004 = vector.load %arg3[%1003, %c0_499] : memref<32x128xf32, #tpu.memory_space<vmem>>, vector<1x128xf32>
    %c83 = arith.constant 83 : index
    %c0_500 = arith.constant 0 : index
    %1005 = vector.load %arg6[%c83, %c0_500] : memref<128x128xf32, #tpu.memory_space<vmem>>, vector<1x128xf32>
    tpu.vector_store %arg6[%c83, %c0_500], %1004 {strides = array<i32>} : memref<128x128xf32, #tpu.memory_space<vmem>>, vector<1x128xf32>,
    %1006 = arith.index_cast %1002 : i32 to index
    %c0_501 = arith.constant 0 : index
    %1007 = vector.load %arg4[%1006, %c0_501] : memref<48x128xf32, #tpu.memory_space<vmem>>, vector<1x128xf32>
    %c83_502 = arith.constant 83 : index
    %c0_503 = arith.constant 0 : index
    %1008 = vector.load %arg7[%c83_502, %c0_503] : memref<128x128xf32, #tpu.memory_space<vmem>>, vector<1x128xf32>
    tpu.vector_store %arg7[%c83_502, %c0_503], %1007 {strides = array<i32>} : memref<128x128xf32, #tpu.memory_space<vmem>>, vector<1x128xf32>,
    %c84_i32 = arith.constant 84 : i32
    %1009 = arith.addi %0, %c84_i32 : i32
    %1010 = arith.index_cast %1009 : i32 to index
    %1011 = memref.load %arg1[%1010] : memref<128xi32, #tpu.memory_space<smem>>
    %c84_i32_504 = arith.constant 84 : i32
    %1012 = arith.addi %0, %c84_i32_504 : i32
    %1013 = arith.index_cast %1012 : i32 to index
    %1014 = memref.load %arg2[%1013] : memref<128xi32, #tpu.memory_space<smem>>
    %1015 = arith.index_cast %1011 : i32 to index
    %c0_505 = arith.constant 0 : index
    %1016 = vector.load %arg3[%1015, %c0_505] : memref<32x128xf32, #tpu.memory_space<vmem>>, vector<1x128xf32>
    %c84 = arith.constant 84 : index
    %c0_506 = arith.constant 0 : index
    %1017 = vector.load %arg6[%c84, %c0_506] : memref<128x128xf32, #tpu.memory_space<vmem>>, vector<1x128xf32>
    tpu.vector_store %arg6[%c84, %c0_506], %1016 {strides = array<i32>} : memref<128x128xf32, #tpu.memory_space<vmem>>, vector<1x128xf32>,
    %1018 = arith.index_cast %1014 : i32 to index
    %c0_507 = arith.constant 0 : index
    %1019 = vector.load %arg4[%1018, %c0_507] : memref<48x128xf32, #tpu.memory_space<vmem>>, vector<1x128xf32>
    %c84_508 = arith.constant 84 : index
    %c0_509 = arith.constant 0 : index
    %1020 = vector.load %arg7[%c84_508, %c0_509] : memref<128x128xf32, #tpu.memory_space<vmem>>, vector<1x128xf32>
    tpu.vector_store %arg7[%c84_508, %c0_509], %1019 {strides = array<i32>} : memref<128x128xf32, #tpu.memory_space<vmem>>, vector<1x128xf32>,
    %c85_i32 = arith.constant 85 : i32
    %1021 = arith.addi %0, %c85_i32 : i32
    %1022 = arith.index_cast %1021 : i32 to index
    %1023 = memref.load %arg1[%1022] : memref<128xi32, #tpu.memory_space<smem>>
    %c85_i32_510 = arith.constant 85 : i32
    %1024 = arith.addi %0, %c85_i32_510 : i32
    %1025 = arith.index_cast %1024 : i32 to index
    %1026 = memref.load %arg2[%1025] : memref<128xi32, #tpu.memory_space<smem>>
    %1027 = arith.index_cast %1023 : i32 to index
    %c0_511 = arith.constant 0 : index
    %1028 = vector.load %arg3[%1027, %c0_511] : memref<32x128xf32, #tpu.memory_space<vmem>>, vector<1x128xf32>
    %c85 = arith.constant 85 : index
    %c0_512 = arith.constant 0 : index
    %1029 = vector.load %arg6[%c85, %c0_512] : memref<128x128xf32, #tpu.memory_space<vmem>>, vector<1x128xf32>
    tpu.vector_store %arg6[%c85, %c0_512], %1028 {strides = array<i32>} : memref<128x128xf32, #tpu.memory_space<vmem>>, vector<1x128xf32>,
    %1030 = arith.index_cast %1026 : i32 to index
    %c0_513 = arith.constant 0 : index
    %1031 = vector.load %arg4[%1030, %c0_513] : memref<48x128xf32, #tpu.memory_space<vmem>>, vector<1x128xf32>
    %c85_514 = arith.constant 85 : index
    %c0_515 = arith.constant 0 : index
    %1032 = vector.load %arg7[%c85_514, %c0_515] : memref<128x128xf32, #tpu.memory_space<vmem>>, vector<1x128xf32>
    tpu.vector_store %arg7[%c85_514, %c0_515], %1031 {strides = array<i32>} : memref<128x128xf32, #tpu.memory_space<vmem>>, vector<1x128xf32>,
    %c86_i32 = arith.constant 86 : i32
    %1033 = arith.addi %0, %c86_i32 : i32
    %1034 = arith.index_cast %1033 : i32 to index
    %1035 = memref.load %arg1[%1034] : memref<128xi32, #tpu.memory_space<smem>>
    %c86_i32_516 = arith.constant 86 : i32
    %1036 = arith.addi %0, %c86_i32_516 : i32
    %1037 = arith.index_cast %1036 : i32 to index
    %1038 = memref.load %arg2[%1037] : memref<128xi32, #tpu.memory_space<smem>>
    %1039 = arith.index_cast %1035 : i32 to index
    %c0_517 = arith.constant 0 : index
    %1040 = vector.load %arg3[%1039, %c0_517] : memref<32x128xf32, #tpu.memory_space<vmem>>, vector<1x128xf32>
    %c86 = arith.constant 86 : index
    %c0_518 = arith.constant 0 : index
    %1041 = vector.load %arg6[%c86, %c0_518] : memref<128x128xf32, #tpu.memory_space<vmem>>, vector<1x128xf32>
    tpu.vector_store %arg6[%c86, %c0_518], %1040 {strides = array<i32>} : memref<128x128xf32, #tpu.memory_space<vmem>>, vector<1x128xf32>,
    %1042 = arith.index_cast %1038 : i32 to index
    %c0_519 = arith.constant 0 : index
    %1043 = vector.load %arg4[%1042, %c0_519] : memref<48x128xf32, #tpu.memory_space<vmem>>, vector<1x128xf32>
    %c86_520 = arith.constant 86 : index
    %c0_521 = arith.constant 0 : index
    %1044 = vector.load %arg7[%c86_520, %c0_521] : memref<128x128xf32, #tpu.memory_space<vmem>>, vector<1x128xf32>
    tpu.vector_store %arg7[%c86_520, %c0_521], %1043 {strides = array<i32>} : memref<128x128xf32, #tpu.memory_space<vmem>>, vector<1x128xf32>,
    %c87_i32 = arith.constant 87 : i32
    %1045 = arith.addi %0, %c87_i32 : i32
    %1046 = arith.index_cast %1045 : i32 to index
    %1047 = memref.load %arg1[%1046] : memref<128xi32, #tpu.memory_space<smem>>
    %c87_i32_522 = arith.constant 87 : i32
    %1048 = arith.addi %0, %c87_i32_522 : i32
    %1049 = arith.index_cast %1048 : i32 to index
    %1050 = memref.load %arg2[%1049] : memref<128xi32, #tpu.memory_space<smem>>
    %1051 = arith.index_cast %1047 : i32 to index
    %c0_523 = arith.constant 0 : index
    %1052 = vector.load %arg3[%1051, %c0_523] : memref<32x128xf32, #tpu.memory_space<vmem>>, vector<1x128xf32>
    %c87 = arith.constant 87 : index
    %c0_524 = arith.constant 0 : index
    %1053 = vector.load %arg6[%c87, %c0_524] : memref<128x128xf32, #tpu.memory_space<vmem>>, vector<1x128xf32>
    tpu.vector_store %arg6[%c87, %c0_524], %1052 {strides = array<i32>} : memref<128x128xf32, #tpu.memory_space<vmem>>, vector<1x128xf32>,
    %1054 = arith.index_cast %1050 : i32 to index
    %c0_525 = arith.constant 0 : index
    %1055 = vector.load %arg4[%1054, %c0_525] : memref<48x128xf32, #tpu.memory_space<vmem>>, vector<1x128xf32>
    %c87_526 = arith.constant 87 : index
    %c0_527 = arith.constant 0 : index
    %1056 = vector.load %arg7[%c87_526, %c0_527] : memref<128x128xf32, #tpu.memory_space<vmem>>, vector<1x128xf32>
    tpu.vector_store %arg7[%c87_526, %c0_527], %1055 {strides = array<i32>} : memref<128x128xf32, #tpu.memory_space<vmem>>, vector<1x128xf32>,
    %c88_i32 = arith.constant 88 : i32
    %1057 = arith.addi %0, %c88_i32 : i32
    %1058 = arith.index_cast %1057 : i32 to index
    %1059 = memref.load %arg1[%1058] : memref<128xi32, #tpu.memory_space<smem>>
    %c88_i32_528 = arith.constant 88 : i32
    %1060 = arith.addi %0, %c88_i32_528 : i32
    %1061 = arith.index_cast %1060 : i32 to index
    %1062 = memref.load %arg2[%1061] : memref<128xi32, #tpu.memory_space<smem>>
    %1063 = arith.index_cast %1059 : i32 to index
    %c0_529 = arith.constant 0 : index
    %1064 = vector.load %arg3[%1063, %c0_529] : memref<32x128xf32, #tpu.memory_space<vmem>>, vector<1x128xf32>
    %c88 = arith.constant 88 : index
    %c0_530 = arith.constant 0 : index
    %1065 = vector.load %arg6[%c88, %c0_530] : memref<128x128xf32, #tpu.memory_space<vmem>>, vector<1x128xf32>
    tpu.vector_store %arg6[%c88, %c0_530], %1064 {strides = array<i32>} : memref<128x128xf32, #tpu.memory_space<vmem>>, vector<1x128xf32>,
    %1066 = arith.index_cast %1062 : i32 to index
    %c0_531 = arith.constant 0 : index
    %1067 = vector.load %arg4[%1066, %c0_531] : memref<48x128xf32, #tpu.memory_space<vmem>>, vector<1x128xf32>
    %c88_532 = arith.constant 88 : index
    %c0_533 = arith.constant 0 : index
    %1068 = vector.load %arg7[%c88_532, %c0_533] : memref<128x128xf32, #tpu.memory_space<vmem>>, vector<1x128xf32>
    tpu.vector_store %arg7[%c88_532, %c0_533], %1067 {strides = array<i32>} : memref<128x128xf32, #tpu.memory_space<vmem>>, vector<1x128xf32>,
    %c89_i32 = arith.constant 89 : i32
    %1069 = arith.addi %0, %c89_i32 : i32
    %1070 = arith.index_cast %1069 : i32 to index
    %1071 = memref.load %arg1[%1070] : memref<128xi32, #tpu.memory_space<smem>>
    %c89_i32_534 = arith.constant 89 : i32
    %1072 = arith.addi %0, %c89_i32_534 : i32
    %1073 = arith.index_cast %1072 : i32 to index
    %1074 = memref.load %arg2[%1073] : memref<128xi32, #tpu.memory_space<smem>>
    %1075 = arith.index_cast %1071 : i32 to index
    %c0_535 = arith.constant 0 : index
    %1076 = vector.load %arg3[%1075, %c0_535] : memref<32x128xf32, #tpu.memory_space<vmem>>, vector<1x128xf32>
    %c89 = arith.constant 89 : index
    %c0_536 = arith.constant 0 : index
    %1077 = vector.load %arg6[%c89, %c0_536] : memref<128x128xf32, #tpu.memory_space<vmem>>, vector<1x128xf32>
    tpu.vector_store %arg6[%c89, %c0_536], %1076 {strides = array<i32>} : memref<128x128xf32, #tpu.memory_space<vmem>>, vector<1x128xf32>,
    %1078 = arith.index_cast %1074 : i32 to index
    %c0_537 = arith.constant 0 : index
    %1079 = vector.load %arg4[%1078, %c0_537] : memref<48x128xf32, #tpu.memory_space<vmem>>, vector<1x128xf32>
    %c89_538 = arith.constant 89 : index
    %c0_539 = arith.constant 0 : index
    %1080 = vector.load %arg7[%c89_538, %c0_539] : memref<128x128xf32, #tpu.memory_space<vmem>>, vector<1x128xf32>
    tpu.vector_store %arg7[%c89_538, %c0_539], %1079 {strides = array<i32>} : memref<128x128xf32, #tpu.memory_space<vmem>>, vector<1x128xf32>,
    %c90_i32 = arith.constant 90 : i32
    %1081 = arith.addi %0, %c90_i32 : i32
    %1082 = arith.index_cast %1081 : i32 to index
    %1083 = memref.load %arg1[%1082] : memref<128xi32, #tpu.memory_space<smem>>
    %c90_i32_540 = arith.constant 90 : i32
    %1084 = arith.addi %0, %c90_i32_540 : i32
    %1085 = arith.index_cast %1084 : i32 to index
    %1086 = memref.load %arg2[%1085] : memref<128xi32, #tpu.memory_space<smem>>
    %1087 = arith.index_cast %1083 : i32 to index
    %c0_541 = arith.constant 0 : index
    %1088 = vector.load %arg3[%1087, %c0_541] : memref<32x128xf32, #tpu.memory_space<vmem>>, vector<1x128xf32>
    %c90 = arith.constant 90 : index
    %c0_542 = arith.constant 0 : index
    %1089 = vector.load %arg6[%c90, %c0_542] : memref<128x128xf32, #tpu.memory_space<vmem>>, vector<1x128xf32>
    tpu.vector_store %arg6[%c90, %c0_542], %1088 {strides = array<i32>} : memref<128x128xf32, #tpu.memory_space<vmem>>, vector<1x128xf32>,
    %1090 = arith.index_cast %1086 : i32 to index
    %c0_543 = arith.constant 0 : index
    %1091 = vector.load %arg4[%1090, %c0_543] : memref<48x128xf32, #tpu.memory_space<vmem>>, vector<1x128xf32>
    %c90_544 = arith.constant 90 : index
    %c0_545 = arith.constant 0 : index
    %1092 = vector.load %arg7[%c90_544, %c0_545] : memref<128x128xf32, #tpu.memory_space<vmem>>, vector<1x128xf32>
    tpu.vector_store %arg7[%c90_544, %c0_545], %1091 {strides = array<i32>} : memref<128x128xf32, #tpu.memory_space<vmem>>, vector<1x128xf32>,
    %c91_i32 = arith.constant 91 : i32
    %1093 = arith.addi %0, %c91_i32 : i32
    %1094 = arith.index_cast %1093 : i32 to index
    %1095 = memref.load %arg1[%1094] : memref<128xi32, #tpu.memory_space<smem>>
    %c91_i32_546 = arith.constant 91 : i32
    %1096 = arith.addi %0, %c91_i32_546 : i32
    %1097 = arith.index_cast %1096 : i32 to index
    %1098 = memref.load %arg2[%1097] : memref<128xi32, #tpu.memory_space<smem>>
    %1099 = arith.index_cast %1095 : i32 to index
    %c0_547 = arith.constant 0 : index
    %1100 = vector.load %arg3[%1099, %c0_547] : memref<32x128xf32, #tpu.memory_space<vmem>>, vector<1x128xf32>
    %c91 = arith.constant 91 : index
    %c0_548 = arith.constant 0 : index
    %1101 = vector.load %arg6[%c91, %c0_548] : memref<128x128xf32, #tpu.memory_space<vmem>>, vector<1x128xf32>
    tpu.vector_store %arg6[%c91, %c0_548], %1100 {strides = array<i32>} : memref<128x128xf32, #tpu.memory_space<vmem>>, vector<1x128xf32>,
    %1102 = arith.index_cast %1098 : i32 to index
    %c0_549 = arith.constant 0 : index
    %1103 = vector.load %arg4[%1102, %c0_549] : memref<48x128xf32, #tpu.memory_space<vmem>>, vector<1x128xf32>
    %c91_550 = arith.constant 91 : index
    %c0_551 = arith.constant 0 : index
    %1104 = vector.load %arg7[%c91_550, %c0_551] : memref<128x128xf32, #tpu.memory_space<vmem>>, vector<1x128xf32>
    tpu.vector_store %arg7[%c91_550, %c0_551], %1103 {strides = array<i32>} : memref<128x128xf32, #tpu.memory_space<vmem>>, vector<1x128xf32>,
    %c92_i32 = arith.constant 92 : i32
    %1105 = arith.addi %0, %c92_i32 : i32
    %1106 = arith.index_cast %1105 : i32 to index
    %1107 = memref.load %arg1[%1106] : memref<128xi32, #tpu.memory_space<smem>>
    %c92_i32_552 = arith.constant 92 : i32
    %1108 = arith.addi %0, %c92_i32_552 : i32
    %1109 = arith.index_cast %1108 : i32 to index
    %1110 = memref.load %arg2[%1109] : memref<128xi32, #tpu.memory_space<smem>>
    %1111 = arith.index_cast %1107 : i32 to index
    %c0_553 = arith.constant 0 : index
    %1112 = vector.load %arg3[%1111, %c0_553] : memref<32x128xf32, #tpu.memory_space<vmem>>, vector<1x128xf32>
    %c92 = arith.constant 92 : index
    %c0_554 = arith.constant 0 : index
    %1113 = vector.load %arg6[%c92, %c0_554] : memref<128x128xf32, #tpu.memory_space<vmem>>, vector<1x128xf32>
    tpu.vector_store %arg6[%c92, %c0_554], %1112 {strides = array<i32>} : memref<128x128xf32, #tpu.memory_space<vmem>>, vector<1x128xf32>,
    %1114 = arith.index_cast %1110 : i32 to index
    %c0_555 = arith.constant 0 : index
    %1115 = vector.load %arg4[%1114, %c0_555] : memref<48x128xf32, #tpu.memory_space<vmem>>, vector<1x128xf32>
    %c92_556 = arith.constant 92 : index
    %c0_557 = arith.constant 0 : index
    %1116 = vector.load %arg7[%c92_556, %c0_557] : memref<128x128xf32, #tpu.memory_space<vmem>>, vector<1x128xf32>
    tpu.vector_store %arg7[%c92_556, %c0_557], %1115 {strides = array<i32>} : memref<128x128xf32, #tpu.memory_space<vmem>>, vector<1x128xf32>,
    %c93_i32 = arith.constant 93 : i32
    %1117 = arith.addi %0, %c93_i32 : i32
    %1118 = arith.index_cast %1117 : i32 to index
    %1119 = memref.load %arg1[%1118] : memref<128xi32, #tpu.memory_space<smem>>
    %c93_i32_558 = arith.constant 93 : i32
    %1120 = arith.addi %0, %c93_i32_558 : i32
    %1121 = arith.index_cast %1120 : i32 to index
    %1122 = memref.load %arg2[%1121] : memref<128xi32, #tpu.memory_space<smem>>
    %1123 = arith.index_cast %1119 : i32 to index
    %c0_559 = arith.constant 0 : index
    %1124 = vector.load %arg3[%1123, %c0_559] : memref<32x128xf32, #tpu.memory_space<vmem>>, vector<1x128xf32>
    %c93 = arith.constant 93 : index
    %c0_560 = arith.constant 0 : index
    %1125 = vector.load %arg6[%c93, %c0_560] : memref<128x128xf32, #tpu.memory_space<vmem>>, vector<1x128xf32>
    tpu.vector_store %arg6[%c93, %c0_560], %1124 {strides = array<i32>} : memref<128x128xf32, #tpu.memory_space<vmem>>, vector<1x128xf32>,
    %1126 = arith.index_cast %1122 : i32 to index
    %c0_561 = arith.constant 0 : index
    %1127 = vector.load %arg4[%1126, %c0_561] : memref<48x128xf32, #tpu.memory_space<vmem>>, vector<1x128xf32>
    %c93_562 = arith.constant 93 : index
    %c0_563 = arith.constant 0 : index
    %1128 = vector.load %arg7[%c93_562, %c0_563] : memref<128x128xf32, #tpu.memory_space<vmem>>, vector<1x128xf32>
    tpu.vector_store %arg7[%c93_562, %c0_563], %1127 {strides = array<i32>} : memref<128x128xf32, #tpu.memory_space<vmem>>, vector<1x128xf32>,
    %c94_i32 = arith.constant 94 : i32
    %1129 = arith.addi %0, %c94_i32 : i32
    %1130 = arith.index_cast %1129 : i32 to index
    %1131 = memref.load %arg1[%1130] : memref<128xi32, #tpu.memory_space<smem>>
    %c94_i32_564 = arith.constant 94 : i32
    %1132 = arith.addi %0, %c94_i32_564 : i32
    %1133 = arith.index_cast %1132 : i32 to index
    %1134 = memref.load %arg2[%1133] : memref<128xi32, #tpu.memory_space<smem>>
    %1135 = arith.index_cast %1131 : i32 to index
    %c0_565 = arith.constant 0 : index
    %1136 = vector.load %arg3[%1135, %c0_565] : memref<32x128xf32, #tpu.memory_space<vmem>>, vector<1x128xf32>
    %c94 = arith.constant 94 : index
    %c0_566 = arith.constant 0 : index
    %1137 = vector.load %arg6[%c94, %c0_566] : memref<128x128xf32, #tpu.memory_space<vmem>>, vector<1x128xf32>
    tpu.vector_store %arg6[%c94, %c0_566], %1136 {strides = array<i32>} : memref<128x128xf32, #tpu.memory_space<vmem>>, vector<1x128xf32>,
    %1138 = arith.index_cast %1134 : i32 to index
    %c0_567 = arith.constant 0 : index
    %1139 = vector.load %arg4[%1138, %c0_567] : memref<48x128xf32, #tpu.memory_space<vmem>>, vector<1x128xf32>
    %c94_568 = arith.constant 94 : index
    %c0_569 = arith.constant 0 : index
    %1140 = vector.load %arg7[%c94_568, %c0_569] : memref<128x128xf32, #tpu.memory_space<vmem>>, vector<1x128xf32>
    tpu.vector_store %arg7[%c94_568, %c0_569], %1139 {strides = array<i32>} : memref<128x128xf32, #tpu.memory_space<vmem>>, vector<1x128xf32>,
    %c95_i32 = arith.constant 95 : i32
    %1141 = arith.addi %0, %c95_i32 : i32
    %1142 = arith.index_cast %1141 : i32 to index
    %1143 = memref.load %arg1[%1142] : memref<128xi32, #tpu.memory_space<smem>>
    %c95_i32_570 = arith.constant 95 : i32
    %1144 = arith.addi %0, %c95_i32_570 : i32
    %1145 = arith.index_cast %1144 : i32 to index
    %1146 = memref.load %arg2[%1145] : memref<128xi32, #tpu.memory_space<smem>>
    %1147 = arith.index_cast %1143 : i32 to index
    %c0_571 = arith.constant 0 : index
    %1148 = vector.load %arg3[%1147, %c0_571] : memref<32x128xf32, #tpu.memory_space<vmem>>, vector<1x128xf32>
    %c95 = arith.constant 95 : index
    %c0_572 = arith.constant 0 : index
    %1149 = vector.load %arg6[%c95, %c0_572] : memref<128x128xf32, #tpu.memory_space<vmem>>, vector<1x128xf32>
    tpu.vector_store %arg6[%c95, %c0_572], %1148 {strides = array<i32>} : memref<128x128xf32, #tpu.memory_space<vmem>>, vector<1x128xf32>,
    %1150 = arith.index_cast %1146 : i32 to index
    %c0_573 = arith.constant 0 : index
    %1151 = vector.load %arg4[%1150, %c0_573] : memref<48x128xf32, #tpu.memory_space<vmem>>, vector<1x128xf32>
    %c95_574 = arith.constant 95 : index
    %c0_575 = arith.constant 0 : index
    %1152 = vector.load %arg7[%c95_574, %c0_575] : memref<128x128xf32, #tpu.memory_space<vmem>>, vector<1x128xf32>
    tpu.vector_store %arg7[%c95_574, %c0_575], %1151 {strides = array<i32>} : memref<128x128xf32, #tpu.memory_space<vmem>>, vector<1x128xf32>,
    %c96_i32 = arith.constant 96 : i32
    %1153 = arith.addi %0, %c96_i32 : i32
    %1154 = arith.index_cast %1153 : i32 to index
    %1155 = memref.load %arg1[%1154] : memref<128xi32, #tpu.memory_space<smem>>
    %c96_i32_576 = arith.constant 96 : i32
    %1156 = arith.addi %0, %c96_i32_576 : i32
    %1157 = arith.index_cast %1156 : i32 to index
    %1158 = memref.load %arg2[%1157] : memref<128xi32, #tpu.memory_space<smem>>
    %1159 = arith.index_cast %1155 : i32 to index
    %c0_577 = arith.constant 0 : index
    %1160 = vector.load %arg3[%1159, %c0_577] : memref<32x128xf32, #tpu.memory_space<vmem>>, vector<1x128xf32>
    %c96 = arith.constant 96 : index
    %c0_578 = arith.constant 0 : index
    %1161 = vector.load %arg6[%c96, %c0_578] : memref<128x128xf32, #tpu.memory_space<vmem>>, vector<1x128xf32>
    tpu.vector_store %arg6[%c96, %c0_578], %1160 {strides = array<i32>} : memref<128x128xf32, #tpu.memory_space<vmem>>, vector<1x128xf32>,
    %1162 = arith.index_cast %1158 : i32 to index
    %c0_579 = arith.constant 0 : index
    %1163 = vector.load %arg4[%1162, %c0_579] : memref<48x128xf32, #tpu.memory_space<vmem>>, vector<1x128xf32>
    %c96_580 = arith.constant 96 : index
    %c0_581 = arith.constant 0 : index
    %1164 = vector.load %arg7[%c96_580, %c0_581] : memref<128x128xf32, #tpu.memory_space<vmem>>, vector<1x128xf32>
    tpu.vector_store %arg7[%c96_580, %c0_581], %1163 {strides = array<i32>} : memref<128x128xf32, #tpu.memory_space<vmem>>, vector<1x128xf32>,
    %c97_i32 = arith.constant 97 : i32
    %1165 = arith.addi %0, %c97_i32 : i32
    %1166 = arith.index_cast %1165 : i32 to index
    %1167 = memref.load %arg1[%1166] : memref<128xi32, #tpu.memory_space<smem>>
    %c97_i32_582 = arith.constant 97 : i32
    %1168 = arith.addi %0, %c97_i32_582 : i32
    %1169 = arith.index_cast %1168 : i32 to index
    %1170 = memref.load %arg2[%1169] : memref<128xi32, #tpu.memory_space<smem>>
    %1171 = arith.index_cast %1167 : i32 to index
    %c0_583 = arith.constant 0 : index
    %1172 = vector.load %arg3[%1171, %c0_583] : memref<32x128xf32, #tpu.memory_space<vmem>>, vector<1x128xf32>
    %c97 = arith.constant 97 : index
    %c0_584 = arith.constant 0 : index
    %1173 = vector.load %arg6[%c97, %c0_584] : memref<128x128xf32, #tpu.memory_space<vmem>>, vector<1x128xf32>
    tpu.vector_store %arg6[%c97, %c0_584], %1172 {strides = array<i32>} : memref<128x128xf32, #tpu.memory_space<vmem>>, vector<1x128xf32>,
    %1174 = arith.index_cast %1170 : i32 to index
    %c0_585 = arith.constant 0 : index
    %1175 = vector.load %arg4[%1174, %c0_585] : memref<48x128xf32, #tpu.memory_space<vmem>>, vector<1x128xf32>
    %c97_586 = arith.constant 97 : index
    %c0_587 = arith.constant 0 : index
    %1176 = vector.load %arg7[%c97_586, %c0_587] : memref<128x128xf32, #tpu.memory_space<vmem>>, vector<1x128xf32>
    tpu.vector_store %arg7[%c97_586, %c0_587], %1175 {strides = array<i32>} : memref<128x128xf32, #tpu.memory_space<vmem>>, vector<1x128xf32>,
    %c98_i32 = arith.constant 98 : i32
    %1177 = arith.addi %0, %c98_i32 : i32
    %1178 = arith.index_cast %1177 : i32 to index
    %1179 = memref.load %arg1[%1178] : memref<128xi32, #tpu.memory_space<smem>>
    %c98_i32_588 = arith.constant 98 : i32
    %1180 = arith.addi %0, %c98_i32_588 : i32
    %1181 = arith.index_cast %1180 : i32 to index
    %1182 = memref.load %arg2[%1181] : memref<128xi32, #tpu.memory_space<smem>>
    %1183 = arith.index_cast %1179 : i32 to index
    %c0_589 = arith.constant 0 : index
    %1184 = vector.load %arg3[%1183, %c0_589] : memref<32x128xf32, #tpu.memory_space<vmem>>, vector<1x128xf32>
    %c98 = arith.constant 98 : index
    %c0_590 = arith.constant 0 : index
    %1185 = vector.load %arg6[%c98, %c0_590] : memref<128x128xf32, #tpu.memory_space<vmem>>, vector<1x128xf32>
    tpu.vector_store %arg6[%c98, %c0_590], %1184 {strides = array<i32>} : memref<128x128xf32, #tpu.memory_space<vmem>>, vector<1x128xf32>,
    %1186 = arith.index_cast %1182 : i32 to index
    %c0_591 = arith.constant 0 : index
    %1187 = vector.load %arg4[%1186, %c0_591] : memref<48x128xf32, #tpu.memory_space<vmem>>, vector<1x128xf32>
    %c98_592 = arith.constant 98 : index
    %c0_593 = arith.constant 0 : index
    %1188 = vector.load %arg7[%c98_592, %c0_593] : memref<128x128xf32, #tpu.memory_space<vmem>>, vector<1x128xf32>
    tpu.vector_store %arg7[%c98_592, %c0_593], %1187 {strides = array<i32>} : memref<128x128xf32, #tpu.memory_space<vmem>>, vector<1x128xf32>,
    %c99_i32 = arith.constant 99 : i32
    %1189 = arith.addi %0, %c99_i32 : i32
    %1190 = arith.index_cast %1189 : i32 to index
    %1191 = memref.load %arg1[%1190] : memref<128xi32, #tpu.memory_space<smem>>
    %c99_i32_594 = arith.constant 99 : i32
    %1192 = arith.addi %0, %c99_i32_594 : i32
    %1193 = arith.index_cast %1192 : i32 to index
    %1194 = memref.load %arg2[%1193] : memref<128xi32, #tpu.memory_space<smem>>
    %1195 = arith.index_cast %1191 : i32 to index
    %c0_595 = arith.constant 0 : index
    %1196 = vector.load %arg3[%1195, %c0_595] : memref<32x128xf32, #tpu.memory_space<vmem>>, vector<1x128xf32>
    %c99 = arith.constant 99 : index
    %c0_596 = arith.constant 0 : index
    %1197 = vector.load %arg6[%c99, %c0_596] : memref<128x128xf32, #tpu.memory_space<vmem>>, vector<1x128xf32>
    tpu.vector_store %arg6[%c99, %c0_596], %1196 {strides = array<i32>} : memref<128x128xf32, #tpu.memory_space<vmem>>, vector<1x128xf32>,
    %1198 = arith.index_cast %1194 : i32 to index
    %c0_597 = arith.constant 0 : index
    %1199 = vector.load %arg4[%1198, %c0_597] : memref<48x128xf32, #tpu.memory_space<vmem>>, vector<1x128xf32>
    %c99_598 = arith.constant 99 : index
    %c0_599 = arith.constant 0 : index
    %1200 = vector.load %arg7[%c99_598, %c0_599] : memref<128x128xf32, #tpu.memory_space<vmem>>, vector<1x128xf32>
    tpu.vector_store %arg7[%c99_598, %c0_599], %1199 {strides = array<i32>} : memref<128x128xf32, #tpu.memory_space<vmem>>, vector<1x128xf32>,
    %c100_i32 = arith.constant 100 : i32
    %1201 = arith.addi %0, %c100_i32 : i32
    %1202 = arith.index_cast %1201 : i32 to index
    %1203 = memref.load %arg1[%1202] : memref<128xi32, #tpu.memory_space<smem>>
    %c100_i32_600 = arith.constant 100 : i32
    %1204 = arith.addi %0, %c100_i32_600 : i32
    %1205 = arith.index_cast %1204 : i32 to index
    %1206 = memref.load %arg2[%1205] : memref<128xi32, #tpu.memory_space<smem>>
    %1207 = arith.index_cast %1203 : i32 to index
    %c0_601 = arith.constant 0 : index
    %1208 = vector.load %arg3[%1207, %c0_601] : memref<32x128xf32, #tpu.memory_space<vmem>>, vector<1x128xf32>
    %c100 = arith.constant 100 : index
    %c0_602 = arith.constant 0 : index
    %1209 = vector.load %arg6[%c100, %c0_602] : memref<128x128xf32, #tpu.memory_space<vmem>>, vector<1x128xf32>
    tpu.vector_store %arg6[%c100, %c0_602], %1208 {strides = array<i32>} : memref<128x128xf32, #tpu.memory_space<vmem>>, vector<1x128xf32>,
    %1210 = arith.index_cast %1206 : i32 to index
    %c0_603 = arith.constant 0 : index
    %1211 = vector.load %arg4[%1210, %c0_603] : memref<48x128xf32, #tpu.memory_space<vmem>>, vector<1x128xf32>
    %c100_604 = arith.constant 100 : index
    %c0_605 = arith.constant 0 : index
    %1212 = vector.load %arg7[%c100_604, %c0_605] : memref<128x128xf32, #tpu.memory_space<vmem>>, vector<1x128xf32>
    tpu.vector_store %arg7[%c100_604, %c0_605], %1211 {strides = array<i32>} : memref<128x128xf32, #tpu.memory_space<vmem>>, vector<1x128xf32>,
    %c101_i32 = arith.constant 101 : i32
    %1213 = arith.addi %0, %c101_i32 : i32
    %1214 = arith.index_cast %1213 : i32 to index
    %1215 = memref.load %arg1[%1214] : memref<128xi32, #tpu.memory_space<smem>>
    %c101_i32_606 = arith.constant 101 : i32
    %1216 = arith.addi %0, %c101_i32_606 : i32
    %1217 = arith.index_cast %1216 : i32 to index
    %1218 = memref.load %arg2[%1217] : memref<128xi32, #tpu.memory_space<smem>>
    %1219 = arith.index_cast %1215 : i32 to index
    %c0_607 = arith.constant 0 : index
    %1220 = vector.load %arg3[%1219, %c0_607] : memref<32x128xf32, #tpu.memory_space<vmem>>, vector<1x128xf32>
    %c101 = arith.constant 101 : index
    %c0_608 = arith.constant 0 : index
    %1221 = vector.load %arg6[%c101, %c0_608] : memref<128x128xf32, #tpu.memory_space<vmem>>, vector<1x128xf32>
    tpu.vector_store %arg6[%c101, %c0_608], %1220 {strides = array<i32>} : memref<128x128xf32, #tpu.memory_space<vmem>>, vector<1x128xf32>,
    %1222 = arith.index_cast %1218 : i32 to index
    %c0_609 = arith.constant 0 : index
    %1223 = vector.load %arg4[%1222, %c0_609] : memref<48x128xf32, #tpu.memory_space<vmem>>, vector<1x128xf32>
    %c101_610 = arith.constant 101 : index
    %c0_611 = arith.constant 0 : index
    %1224 = vector.load %arg7[%c101_610, %c0_611] : memref<128x128xf32, #tpu.memory_space<vmem>>, vector<1x128xf32>
    tpu.vector_store %arg7[%c101_610, %c0_611], %1223 {strides = array<i32>} : memref<128x128xf32, #tpu.memory_space<vmem>>, vector<1x128xf32>,
    %c102_i32 = arith.constant 102 : i32
    %1225 = arith.addi %0, %c102_i32 : i32
    %1226 = arith.index_cast %1225 : i32 to index
    %1227 = memref.load %arg1[%1226] : memref<128xi32, #tpu.memory_space<smem>>
    %c102_i32_612 = arith.constant 102 : i32
    %1228 = arith.addi %0, %c102_i32_612 : i32
    %1229 = arith.index_cast %1228 : i32 to index
    %1230 = memref.load %arg2[%1229] : memref<128xi32, #tpu.memory_space<smem>>
    %1231 = arith.index_cast %1227 : i32 to index
    %c0_613 = arith.constant 0 : index
    %1232 = vector.load %arg3[%1231, %c0_613] : memref<32x128xf32, #tpu.memory_space<vmem>>, vector<1x128xf32>
    %c102 = arith.constant 102 : index
    %c0_614 = arith.constant 0 : index
    %1233 = vector.load %arg6[%c102, %c0_614] : memref<128x128xf32, #tpu.memory_space<vmem>>, vector<1x128xf32>
    tpu.vector_store %arg6[%c102, %c0_614], %1232 {strides = array<i32>} : memref<128x128xf32, #tpu.memory_space<vmem>>, vector<1x128xf32>,
    %1234 = arith.index_cast %1230 : i32 to index
    %c0_615 = arith.constant 0 : index
    %1235 = vector.load %arg4[%1234, %c0_615] : memref<48x128xf32, #tpu.memory_space<vmem>>, vector<1x128xf32>
    %c102_616 = arith.constant 102 : index
    %c0_617 = arith.constant 0 : index
    %1236 = vector.load %arg7[%c102_616, %c0_617] : memref<128x128xf32, #tpu.memory_space<vmem>>, vector<1x128xf32>
    tpu.vector_store %arg7[%c102_616, %c0_617], %1235 {strides = array<i32>} : memref<128x128xf32, #tpu.memory_space<vmem>>, vector<1x128xf32>,
    %c103_i32 = arith.constant 103 : i32
    %1237 = arith.addi %0, %c103_i32 : i32
    %1238 = arith.index_cast %1237 : i32 to index
    %1239 = memref.load %arg1[%1238] : memref<128xi32, #tpu.memory_space<smem>>
    %c103_i32_618 = arith.constant 103 : i32
    %1240 = arith.addi %0, %c103_i32_618 : i32
    %1241 = arith.index_cast %1240 : i32 to index
    %1242 = memref.load %arg2[%1241] : memref<128xi32, #tpu.memory_space<smem>>
    %1243 = arith.index_cast %1239 : i32 to index
    %c0_619 = arith.constant 0 : index
    %1244 = vector.load %arg3[%1243, %c0_619] : memref<32x128xf32, #tpu.memory_space<vmem>>, vector<1x128xf32>
    %c103 = arith.constant 103 : index
    %c0_620 = arith.constant 0 : index
    %1245 = vector.load %arg6[%c103, %c0_620] : memref<128x128xf32, #tpu.memory_space<vmem>>, vector<1x128xf32>
    tpu.vector_store %arg6[%c103, %c0_620], %1244 {strides = array<i32>} : memref<128x128xf32, #tpu.memory_space<vmem>>, vector<1x128xf32>,
    %1246 = arith.index_cast %1242 : i32 to index
    %c0_621 = arith.constant 0 : index
    %1247 = vector.load %arg4[%1246, %c0_621] : memref<48x128xf32, #tpu.memory_space<vmem>>, vector<1x128xf32>
    %c103_622 = arith.constant 103 : index
    %c0_623 = arith.constant 0 : index
    %1248 = vector.load %arg7[%c103_622, %c0_623] : memref<128x128xf32, #tpu.memory_space<vmem>>, vector<1x128xf32>
    tpu.vector_store %arg7[%c103_622, %c0_623], %1247 {strides = array<i32>} : memref<128x128xf32, #tpu.memory_space<vmem>>, vector<1x128xf32>,
    %c104_i32 = arith.constant 104 : i32
    %1249 = arith.addi %0, %c104_i32 : i32
    %1250 = arith.index_cast %1249 : i32 to index
    %1251 = memref.load %arg1[%1250] : memref<128xi32, #tpu.memory_space<smem>>
    %c104_i32_624 = arith.constant 104 : i32
    %1252 = arith.addi %0, %c104_i32_624 : i32
    %1253 = arith.index_cast %1252 : i32 to index
    %1254 = memref.load %arg2[%1253] : memref<128xi32, #tpu.memory_space<smem>>
    %1255 = arith.index_cast %1251 : i32 to index
    %c0_625 = arith.constant 0 : index
    %1256 = vector.load %arg3[%1255, %c0_625] : memref<32x128xf32, #tpu.memory_space<vmem>>, vector<1x128xf32>
    %c104 = arith.constant 104 : index
    %c0_626 = arith.constant 0 : index
    %1257 = vector.load %arg6[%c104, %c0_626] : memref<128x128xf32, #tpu.memory_space<vmem>>, vector<1x128xf32>
    tpu.vector_store %arg6[%c104, %c0_626], %1256 {strides = array<i32>} : memref<128x128xf32, #tpu.memory_space<vmem>>, vector<1x128xf32>,
    %1258 = arith.index_cast %1254 : i32 to index
    %c0_627 = arith.constant 0 : index
    %1259 = vector.load %arg4[%1258, %c0_627] : memref<48x128xf32, #tpu.memory_space<vmem>>, vector<1x128xf32>
    %c104_628 = arith.constant 104 : index
    %c0_629 = arith.constant 0 : index
    %1260 = vector.load %arg7[%c104_628, %c0_629] : memref<128x128xf32, #tpu.memory_space<vmem>>, vector<1x128xf32>
    tpu.vector_store %arg7[%c104_628, %c0_629], %1259 {strides = array<i32>} : memref<128x128xf32, #tpu.memory_space<vmem>>, vector<1x128xf32>,
    %c105_i32 = arith.constant 105 : i32
    %1261 = arith.addi %0, %c105_i32 : i32
    %1262 = arith.index_cast %1261 : i32 to index
    %1263 = memref.load %arg1[%1262] : memref<128xi32, #tpu.memory_space<smem>>
    %c105_i32_630 = arith.constant 105 : i32
    %1264 = arith.addi %0, %c105_i32_630 : i32
    %1265 = arith.index_cast %1264 : i32 to index
    %1266 = memref.load %arg2[%1265] : memref<128xi32, #tpu.memory_space<smem>>
    %1267 = arith.index_cast %1263 : i32 to index
    %c0_631 = arith.constant 0 : index
    %1268 = vector.load %arg3[%1267, %c0_631] : memref<32x128xf32, #tpu.memory_space<vmem>>, vector<1x128xf32>
    %c105 = arith.constant 105 : index
    %c0_632 = arith.constant 0 : index
    %1269 = vector.load %arg6[%c105, %c0_632] : memref<128x128xf32, #tpu.memory_space<vmem>>, vector<1x128xf32>
    tpu.vector_store %arg6[%c105, %c0_632], %1268 {strides = array<i32>} : memref<128x128xf32, #tpu.memory_space<vmem>>, vector<1x128xf32>,
    %1270 = arith.index_cast %1266 : i32 to index
    %c0_633 = arith.constant 0 : index
    %1271 = vector.load %arg4[%1270, %c0_633] : memref<48x128xf32, #tpu.memory_space<vmem>>, vector<1x128xf32>
    %c105_634 = arith.constant 105 : index
    %c0_635 = arith.constant 0 : index
    %1272 = vector.load %arg7[%c105_634, %c0_635] : memref<128x128xf32, #tpu.memory_space<vmem>>, vector<1x128xf32>
    tpu.vector_store %arg7[%c105_634, %c0_635], %1271 {strides = array<i32>} : memref<128x128xf32, #tpu.memory_space<vmem>>, vector<1x128xf32>,
    %c106_i32 = arith.constant 106 : i32
    %1273 = arith.addi %0, %c106_i32 : i32
    %1274 = arith.index_cast %1273 : i32 to index
    %1275 = memref.load %arg1[%1274] : memref<128xi32, #tpu.memory_space<smem>>
    %c106_i32_636 = arith.constant 106 : i32
    %1276 = arith.addi %0, %c106_i32_636 : i32
    %1277 = arith.index_cast %1276 : i32 to index
    %1278 = memref.load %arg2[%1277] : memref<128xi32, #tpu.memory_space<smem>>
    %1279 = arith.index_cast %1275 : i32 to index
    %c0_637 = arith.constant 0 : index
    %1280 = vector.load %arg3[%1279, %c0_637] : memref<32x128xf32, #tpu.memory_space<vmem>>, vector<1x128xf32>
    %c106 = arith.constant 106 : index
    %c0_638 = arith.constant 0 : index
    %1281 = vector.load %arg6[%c106, %c0_638] : memref<128x128xf32, #tpu.memory_space<vmem>>, vector<1x128xf32>
    tpu.vector_store %arg6[%c106, %c0_638], %1280 {strides = array<i32>} : memref<128x128xf32, #tpu.memory_space<vmem>>, vector<1x128xf32>,
    %1282 = arith.index_cast %1278 : i32 to index
    %c0_639 = arith.constant 0 : index
    %1283 = vector.load %arg4[%1282, %c0_639] : memref<48x128xf32, #tpu.memory_space<vmem>>, vector<1x128xf32>
    %c106_640 = arith.constant 106 : index
    %c0_641 = arith.constant 0 : index
    %1284 = vector.load %arg7[%c106_640, %c0_641] : memref<128x128xf32, #tpu.memory_space<vmem>>, vector<1x128xf32>
    tpu.vector_store %arg7[%c106_640, %c0_641], %1283 {strides = array<i32>} : memref<128x128xf32, #tpu.memory_space<vmem>>, vector<1x128xf32>,
    %c107_i32 = arith.constant 107 : i32
    %1285 = arith.addi %0, %c107_i32 : i32
    %1286 = arith.index_cast %1285 : i32 to index
    %1287 = memref.load %arg1[%1286] : memref<128xi32, #tpu.memory_space<smem>>
    %c107_i32_642 = arith.constant 107 : i32
    %1288 = arith.addi %0, %c107_i32_642 : i32
    %1289 = arith.index_cast %1288 : i32 to index
    %1290 = memref.load %arg2[%1289] : memref<128xi32, #tpu.memory_space<smem>>
    %1291 = arith.index_cast %1287 : i32 to index
    %c0_643 = arith.constant 0 : index
    %1292 = vector.load %arg3[%1291, %c0_643] : memref<32x128xf32, #tpu.memory_space<vmem>>, vector<1x128xf32>
    %c107 = arith.constant 107 : index
    %c0_644 = arith.constant 0 : index
    %1293 = vector.load %arg6[%c107, %c0_644] : memref<128x128xf32, #tpu.memory_space<vmem>>, vector<1x128xf32>
    tpu.vector_store %arg6[%c107, %c0_644], %1292 {strides = array<i32>} : memref<128x128xf32, #tpu.memory_space<vmem>>, vector<1x128xf32>,
    %1294 = arith.index_cast %1290 : i32 to index
    %c0_645 = arith.constant 0 : index
    %1295 = vector.load %arg4[%1294, %c0_645] : memref<48x128xf32, #tpu.memory_space<vmem>>, vector<1x128xf32>
    %c107_646 = arith.constant 107 : index
    %c0_647 = arith.constant 0 : index
    %1296 = vector.load %arg7[%c107_646, %c0_647] : memref<128x128xf32, #tpu.memory_space<vmem>>, vector<1x128xf32>
    tpu.vector_store %arg7[%c107_646, %c0_647], %1295 {strides = array<i32>} : memref<128x128xf32, #tpu.memory_space<vmem>>, vector<1x128xf32>,
    %c108_i32 = arith.constant 108 : i32
    %1297 = arith.addi %0, %c108_i32 : i32
    %1298 = arith.index_cast %1297 : i32 to index
    %1299 = memref.load %arg1[%1298] : memref<128xi32, #tpu.memory_space<smem>>
    %c108_i32_648 = arith.constant 108 : i32
    %1300 = arith.addi %0, %c108_i32_648 : i32
    %1301 = arith.index_cast %1300 : i32 to index
    %1302 = memref.load %arg2[%1301] : memref<128xi32, #tpu.memory_space<smem>>
    %1303 = arith.index_cast %1299 : i32 to index
    %c0_649 = arith.constant 0 : index
    %1304 = vector.load %arg3[%1303, %c0_649] : memref<32x128xf32, #tpu.memory_space<vmem>>, vector<1x128xf32>
    %c108 = arith.constant 108 : index
    %c0_650 = arith.constant 0 : index
    %1305 = vector.load %arg6[%c108, %c0_650] : memref<128x128xf32, #tpu.memory_space<vmem>>, vector<1x128xf32>
    tpu.vector_store %arg6[%c108, %c0_650], %1304 {strides = array<i32>} : memref<128x128xf32, #tpu.memory_space<vmem>>, vector<1x128xf32>,
    %1306 = arith.index_cast %1302 : i32 to index
    %c0_651 = arith.constant 0 : index
    %1307 = vector.load %arg4[%1306, %c0_651] : memref<48x128xf32, #tpu.memory_space<vmem>>, vector<1x128xf32>
    %c108_652 = arith.constant 108 : index
    %c0_653 = arith.constant 0 : index
    %1308 = vector.load %arg7[%c108_652, %c0_653] : memref<128x128xf32, #tpu.memory_space<vmem>>, vector<1x128xf32>
    tpu.vector_store %arg7[%c108_652, %c0_653], %1307 {strides = array<i32>} : memref<128x128xf32, #tpu.memory_space<vmem>>, vector<1x128xf32>,
    %c109_i32 = arith.constant 109 : i32
    %1309 = arith.addi %0, %c109_i32 : i32
    %1310 = arith.index_cast %1309 : i32 to index
    %1311 = memref.load %arg1[%1310] : memref<128xi32, #tpu.memory_space<smem>>
    %c109_i32_654 = arith.constant 109 : i32
    %1312 = arith.addi %0, %c109_i32_654 : i32
    %1313 = arith.index_cast %1312 : i32 to index
    %1314 = memref.load %arg2[%1313] : memref<128xi32, #tpu.memory_space<smem>>
    %1315 = arith.index_cast %1311 : i32 to index
    %c0_655 = arith.constant 0 : index
    %1316 = vector.load %arg3[%1315, %c0_655] : memref<32x128xf32, #tpu.memory_space<vmem>>, vector<1x128xf32>
    %c109 = arith.constant 109 : index
    %c0_656 = arith.constant 0 : index
    %1317 = vector.load %arg6[%c109, %c0_656] : memref<128x128xf32, #tpu.memory_space<vmem>>, vector<1x128xf32>
    tpu.vector_store %arg6[%c109, %c0_656], %1316 {strides = array<i32>} : memref<128x128xf32, #tpu.memory_space<vmem>>, vector<1x128xf32>,
    %1318 = arith.index_cast %1314 : i32 to index
    %c0_657 = arith.constant 0 : index
    %1319 = vector.load %arg4[%1318, %c0_657] : memref<48x128xf32, #tpu.memory_space<vmem>>, vector<1x128xf32>
    %c109_658 = arith.constant 109 : index
    %c0_659 = arith.constant 0 : index
    %1320 = vector.load %arg7[%c109_658, %c0_659] : memref<128x128xf32, #tpu.memory_space<vmem>>, vector<1x128xf32>
    tpu.vector_store %arg7[%c109_658, %c0_659], %1319 {strides = array<i32>} : memref<128x128xf32, #tpu.memory_space<vmem>>, vector<1x128xf32>,
    %c110_i32 = arith.constant 110 : i32
    %1321 = arith.addi %0, %c110_i32 : i32
    %1322 = arith.index_cast %1321 : i32 to index
    %1323 = memref.load %arg1[%1322] : memref<128xi32, #tpu.memory_space<smem>>
    %c110_i32_660 = arith.constant 110 : i32
    %1324 = arith.addi %0, %c110_i32_660 : i32
    %1325 = arith.index_cast %1324 : i32 to index
    %1326 = memref.load %arg2[%1325] : memref<128xi32, #tpu.memory_space<smem>>
    %1327 = arith.index_cast %1323 : i32 to index
    %c0_661 = arith.constant 0 : index
    %1328 = vector.load %arg3[%1327, %c0_661] : memref<32x128xf32, #tpu.memory_space<vmem>>, vector<1x128xf32>
    %c110 = arith.constant 110 : index
    %c0_662 = arith.constant 0 : index
    %1329 = vector.load %arg6[%c110, %c0_662] : memref<128x128xf32, #tpu.memory_space<vmem>>, vector<1x128xf32>
    tpu.vector_store %arg6[%c110, %c0_662], %1328 {strides = array<i32>} : memref<128x128xf32, #tpu.memory_space<vmem>>, vector<1x128xf32>,
    %1330 = arith.index_cast %1326 : i32 to index
    %c0_663 = arith.constant 0 : index
    %1331 = vector.load %arg4[%1330, %c0_663] : memref<48x128xf32, #tpu.memory_space<vmem>>, vector<1x128xf32>
    %c110_664 = arith.constant 110 : index
    %c0_665 = arith.constant 0 : index
    %1332 = vector.load %arg7[%c110_664, %c0_665] : memref<128x128xf32, #tpu.memory_space<vmem>>, vector<1x128xf32>
    tpu.vector_store %arg7[%c110_664, %c0_665], %1331 {strides = array<i32>} : memref<128x128xf32, #tpu.memory_space<vmem>>, vector<1x128xf32>,
    %c111_i32 = arith.constant 111 : i32
    %1333 = arith.addi %0, %c111_i32 : i32
    %1334 = arith.index_cast %1333 : i32 to index
    %1335 = memref.load %arg1[%1334] : memref<128xi32, #tpu.memory_space<smem>>
    %c111_i32_666 = arith.constant 111 : i32
    %1336 = arith.addi %0, %c111_i32_666 : i32
    %1337 = arith.index_cast %1336 : i32 to index
    %1338 = memref.load %arg2[%1337] : memref<128xi32, #tpu.memory_space<smem>>
    %1339 = arith.index_cast %1335 : i32 to index
    %c0_667 = arith.constant 0 : index
    %1340 = vector.load %arg3[%1339, %c0_667] : memref<32x128xf32, #tpu.memory_space<vmem>>, vector<1x128xf32>
    %c111 = arith.constant 111 : index
    %c0_668 = arith.constant 0 : index
    %1341 = vector.load %arg6[%c111, %c0_668] : memref<128x128xf32, #tpu.memory_space<vmem>>, vector<1x128xf32>
    tpu.vector_store %arg6[%c111, %c0_668], %1340 {strides = array<i32>} : memref<128x128xf32, #tpu.memory_space<vmem>>, vector<1x128xf32>,
    %1342 = arith.index_cast %1338 : i32 to index
    %c0_669 = arith.constant 0 : index
    %1343 = vector.load %arg4[%1342, %c0_669] : memref<48x128xf32, #tpu.memory_space<vmem>>, vector<1x128xf32>
    %c111_670 = arith.constant 111 : index
    %c0_671 = arith.constant 0 : index
    %1344 = vector.load %arg7[%c111_670, %c0_671] : memref<128x128xf32, #tpu.memory_space<vmem>>, vector<1x128xf32>
    tpu.vector_store %arg7[%c111_670, %c0_671], %1343 {strides = array<i32>} : memref<128x128xf32, #tpu.memory_space<vmem>>, vector<1x128xf32>,
    %c112_i32 = arith.constant 112 : i32
    %1345 = arith.addi %0, %c112_i32 : i32
    %1346 = arith.index_cast %1345 : i32 to index
    %1347 = memref.load %arg1[%1346] : memref<128xi32, #tpu.memory_space<smem>>
    %c112_i32_672 = arith.constant 112 : i32
    %1348 = arith.addi %0, %c112_i32_672 : i32
    %1349 = arith.index_cast %1348 : i32 to index
    %1350 = memref.load %arg2[%1349] : memref<128xi32, #tpu.memory_space<smem>>
    %1351 = arith.index_cast %1347 : i32 to index
    %c0_673 = arith.constant 0 : index
    %1352 = vector.load %arg3[%1351, %c0_673] : memref<32x128xf32, #tpu.memory_space<vmem>>, vector<1x128xf32>
    %c112 = arith.constant 112 : index
    %c0_674 = arith.constant 0 : index
    %1353 = vector.load %arg6[%c112, %c0_674] : memref<128x128xf32, #tpu.memory_space<vmem>>, vector<1x128xf32>
    tpu.vector_store %arg6[%c112, %c0_674], %1352 {strides = array<i32>} : memref<128x128xf32, #tpu.memory_space<vmem>>, vector<1x128xf32>,
    %1354 = arith.index_cast %1350 : i32 to index
    %c0_675 = arith.constant 0 : index
    %1355 = vector.load %arg4[%1354, %c0_675] : memref<48x128xf32, #tpu.memory_space<vmem>>, vector<1x128xf32>
    %c112_676 = arith.constant 112 : index
    %c0_677 = arith.constant 0 : index
    %1356 = vector.load %arg7[%c112_676, %c0_677] : memref<128x128xf32, #tpu.memory_space<vmem>>, vector<1x128xf32>
    tpu.vector_store %arg7[%c112_676, %c0_677], %1355 {strides = array<i32>} : memref<128x128xf32, #tpu.memory_space<vmem>>, vector<1x128xf32>,
    %c113_i32 = arith.constant 113 : i32
    %1357 = arith.addi %0, %c113_i32 : i32
    %1358 = arith.index_cast %1357 : i32 to index
    %1359 = memref.load %arg1[%1358] : memref<128xi32, #tpu.memory_space<smem>>
    %c113_i32_678 = arith.constant 113 : i32
    %1360 = arith.addi %0, %c113_i32_678 : i32
    %1361 = arith.index_cast %1360 : i32 to index
    %1362 = memref.load %arg2[%1361] : memref<128xi32, #tpu.memory_space<smem>>
    %1363 = arith.index_cast %1359 : i32 to index
    %c0_679 = arith.constant 0 : index
    %1364 = vector.load %arg3[%1363, %c0_679] : memref<32x128xf32, #tpu.memory_space<vmem>>, vector<1x128xf32>
    %c113 = arith.constant 113 : index
    %c0_680 = arith.constant 0 : index
    %1365 = vector.load %arg6[%c113, %c0_680] : memref<128x128xf32, #tpu.memory_space<vmem>>, vector<1x128xf32>
    tpu.vector_store %arg6[%c113, %c0_680], %1364 {strides = array<i32>} : memref<128x128xf32, #tpu.memory_space<vmem>>, vector<1x128xf32>,
    %1366 = arith.index_cast %1362 : i32 to index
    %c0_681 = arith.constant 0 : index
    %1367 = vector.load %arg4[%1366, %c0_681] : memref<48x128xf32, #tpu.memory_space<vmem>>, vector<1x128xf32>
    %c113_682 = arith.constant 113 : index
    %c0_683 = arith.constant 0 : index
    %1368 = vector.load %arg7[%c113_682, %c0_683] : memref<128x128xf32, #tpu.memory_space<vmem>>, vector<1x128xf32>
    tpu.vector_store %arg7[%c113_682, %c0_683], %1367 {strides = array<i32>} : memref<128x128xf32, #tpu.memory_space<vmem>>, vector<1x128xf32>,
    %c114_i32 = arith.constant 114 : i32
    %1369 = arith.addi %0, %c114_i32 : i32
    %1370 = arith.index_cast %1369 : i32 to index
    %1371 = memref.load %arg1[%1370] : memref<128xi32, #tpu.memory_space<smem>>
    %c114_i32_684 = arith.constant 114 : i32
    %1372 = arith.addi %0, %c114_i32_684 : i32
    %1373 = arith.index_cast %1372 : i32 to index
    %1374 = memref.load %arg2[%1373] : memref<128xi32, #tpu.memory_space<smem>>
    %1375 = arith.index_cast %1371 : i32 to index
    %c0_685 = arith.constant 0 : index
    %1376 = vector.load %arg3[%1375, %c0_685] : memref<32x128xf32, #tpu.memory_space<vmem>>, vector<1x128xf32>
    %c114 = arith.constant 114 : index
    %c0_686 = arith.constant 0 : index
    %1377 = vector.load %arg6[%c114, %c0_686] : memref<128x128xf32, #tpu.memory_space<vmem>>, vector<1x128xf32>
    tpu.vector_store %arg6[%c114, %c0_686], %1376 {strides = array<i32>} : memref<128x128xf32, #tpu.memory_space<vmem>>, vector<1x128xf32>,
    %1378 = arith.index_cast %1374 : i32 to index
    %c0_687 = arith.constant 0 : index
    %1379 = vector.load %arg4[%1378, %c0_687] : memref<48x128xf32, #tpu.memory_space<vmem>>, vector<1x128xf32>
    %c114_688 = arith.constant 114 : index
    %c0_689 = arith.constant 0 : index
    %1380 = vector.load %arg7[%c114_688, %c0_689] : memref<128x128xf32, #tpu.memory_space<vmem>>, vector<1x128xf32>
    tpu.vector_store %arg7[%c114_688, %c0_689], %1379 {strides = array<i32>} : memref<128x128xf32, #tpu.memory_space<vmem>>, vector<1x128xf32>,
    %c115_i32 = arith.constant 115 : i32
    %1381 = arith.addi %0, %c115_i32 : i32
    %1382 = arith.index_cast %1381 : i32 to index
    %1383 = memref.load %arg1[%1382] : memref<128xi32, #tpu.memory_space<smem>>
    %c115_i32_690 = arith.constant 115 : i32
    %1384 = arith.addi %0, %c115_i32_690 : i32
    %1385 = arith.index_cast %1384 : i32 to index
    %1386 = memref.load %arg2[%1385] : memref<128xi32, #tpu.memory_space<smem>>
    %1387 = arith.index_cast %1383 : i32 to index
    %c0_691 = arith.constant 0 : index
    %1388 = vector.load %arg3[%1387, %c0_691] : memref<32x128xf32, #tpu.memory_space<vmem>>, vector<1x128xf32>
    %c115 = arith.constant 115 : index
    %c0_692 = arith.constant 0 : index
    %1389 = vector.load %arg6[%c115, %c0_692] : memref<128x128xf32, #tpu.memory_space<vmem>>, vector<1x128xf32>
    tpu.vector_store %arg6[%c115, %c0_692], %1388 {strides = array<i32>} : memref<128x128xf32, #tpu.memory_space<vmem>>, vector<1x128xf32>,
    %1390 = arith.index_cast %1386 : i32 to index
    %c0_693 = arith.constant 0 : index
    %1391 = vector.load %arg4[%1390, %c0_693] : memref<48x128xf32, #tpu.memory_space<vmem>>, vector<1x128xf32>
    %c115_694 = arith.constant 115 : index
    %c0_695 = arith.constant 0 : index
    %1392 = vector.load %arg7[%c115_694, %c0_695] : memref<128x128xf32, #tpu.memory_space<vmem>>, vector<1x128xf32>
    tpu.vector_store %arg7[%c115_694, %c0_695], %1391 {strides = array<i32>} : memref<128x128xf32, #tpu.memory_space<vmem>>, vector<1x128xf32>,
    %c116_i32 = arith.constant 116 : i32
    %1393 = arith.addi %0, %c116_i32 : i32
    %1394 = arith.index_cast %1393 : i32 to index
    %1395 = memref.load %arg1[%1394] : memref<128xi32, #tpu.memory_space<smem>>
    %c116_i32_696 = arith.constant 116 : i32
    %1396 = arith.addi %0, %c116_i32_696 : i32
    %1397 = arith.index_cast %1396 : i32 to index
    %1398 = memref.load %arg2[%1397] : memref<128xi32, #tpu.memory_space<smem>>
    %1399 = arith.index_cast %1395 : i32 to index
    %c0_697 = arith.constant 0 : index
    %1400 = vector.load %arg3[%1399, %c0_697] : memref<32x128xf32, #tpu.memory_space<vmem>>, vector<1x128xf32>
    %c116 = arith.constant 116 : index
    %c0_698 = arith.constant 0 : index
    %1401 = vector.load %arg6[%c116, %c0_698] : memref<128x128xf32, #tpu.memory_space<vmem>>, vector<1x128xf32>
    tpu.vector_store %arg6[%c116, %c0_698], %1400 {strides = array<i32>} : memref<128x128xf32, #tpu.memory_space<vmem>>, vector<1x128xf32>,
    %1402 = arith.index_cast %1398 : i32 to index
    %c0_699 = arith.constant 0 : index
    %1403 = vector.load %arg4[%1402, %c0_699] : memref<48x128xf32, #tpu.memory_space<vmem>>, vector<1x128xf32>
    %c116_700 = arith.constant 116 : index
    %c0_701 = arith.constant 0 : index
    %1404 = vector.load %arg7[%c116_700, %c0_701] : memref<128x128xf32, #tpu.memory_space<vmem>>, vector<1x128xf32>
    tpu.vector_store %arg7[%c116_700, %c0_701], %1403 {strides = array<i32>} : memref<128x128xf32, #tpu.memory_space<vmem>>, vector<1x128xf32>,
    %c117_i32 = arith.constant 117 : i32
    %1405 = arith.addi %0, %c117_i32 : i32
    %1406 = arith.index_cast %1405 : i32 to index
    %1407 = memref.load %arg1[%1406] : memref<128xi32, #tpu.memory_space<smem>>
    %c117_i32_702 = arith.constant 117 : i32
    %1408 = arith.addi %0, %c117_i32_702 : i32
    %1409 = arith.index_cast %1408 : i32 to index
    %1410 = memref.load %arg2[%1409] : memref<128xi32, #tpu.memory_space<smem>>
    %1411 = arith.index_cast %1407 : i32 to index
    %c0_703 = arith.constant 0 : index
    %1412 = vector.load %arg3[%1411, %c0_703] : memref<32x128xf32, #tpu.memory_space<vmem>>, vector<1x128xf32>
    %c117 = arith.constant 117 : index
    %c0_704 = arith.constant 0 : index
    %1413 = vector.load %arg6[%c117, %c0_704] : memref<128x128xf32, #tpu.memory_space<vmem>>, vector<1x128xf32>
    tpu.vector_store %arg6[%c117, %c0_704], %1412 {strides = array<i32>} : memref<128x128xf32, #tpu.memory_space<vmem>>, vector<1x128xf32>,
    %1414 = arith.index_cast %1410 : i32 to index
    %c0_705 = arith.constant 0 : index
    %1415 = vector.load %arg4[%1414, %c0_705] : memref<48x128xf32, #tpu.memory_space<vmem>>, vector<1x128xf32>
    %c117_706 = arith.constant 117 : index
    %c0_707 = arith.constant 0 : index
    %1416 = vector.load %arg7[%c117_706, %c0_707] : memref<128x128xf32, #tpu.memory_space<vmem>>, vector<1x128xf32>
    tpu.vector_store %arg7[%c117_706, %c0_707], %1415 {strides = array<i32>} : memref<128x128xf32, #tpu.memory_space<vmem>>, vector<1x128xf32>,
    %c118_i32 = arith.constant 118 : i32
    %1417 = arith.addi %0, %c118_i32 : i32
    %1418 = arith.index_cast %1417 : i32 to index
    %1419 = memref.load %arg1[%1418] : memref<128xi32, #tpu.memory_space<smem>>
    %c118_i32_708 = arith.constant 118 : i32
    %1420 = arith.addi %0, %c118_i32_708 : i32
    %1421 = arith.index_cast %1420 : i32 to index
    %1422 = memref.load %arg2[%1421] : memref<128xi32, #tpu.memory_space<smem>>
    %1423 = arith.index_cast %1419 : i32 to index
    %c0_709 = arith.constant 0 : index
    %1424 = vector.load %arg3[%1423, %c0_709] : memref<32x128xf32, #tpu.memory_space<vmem>>, vector<1x128xf32>
    %c118 = arith.constant 118 : index
    %c0_710 = arith.constant 0 : index
    %1425 = vector.load %arg6[%c118, %c0_710] : memref<128x128xf32, #tpu.memory_space<vmem>>, vector<1x128xf32>
    tpu.vector_store %arg6[%c118, %c0_710], %1424 {strides = array<i32>} : memref<128x128xf32, #tpu.memory_space<vmem>>, vector<1x128xf32>,
    %1426 = arith.index_cast %1422 : i32 to index
    %c0_711 = arith.constant 0 : index
    %1427 = vector.load %arg4[%1426, %c0_711] : memref<48x128xf32, #tpu.memory_space<vmem>>, vector<1x128xf32>
    %c118_712 = arith.constant 118 : index
    %c0_713 = arith.constant 0 : index
    %1428 = vector.load %arg7[%c118_712, %c0_713] : memref<128x128xf32, #tpu.memory_space<vmem>>, vector<1x128xf32>
    tpu.vector_store %arg7[%c118_712, %c0_713], %1427 {strides = array<i32>} : memref<128x128xf32, #tpu.memory_space<vmem>>, vector<1x128xf32>,
    %c119_i32 = arith.constant 119 : i32
    %1429 = arith.addi %0, %c119_i32 : i32
    %1430 = arith.index_cast %1429 : i32 to index
    %1431 = memref.load %arg1[%1430] : memref<128xi32, #tpu.memory_space<smem>>
    %c119_i32_714 = arith.constant 119 : i32
    %1432 = arith.addi %0, %c119_i32_714 : i32
    %1433 = arith.index_cast %1432 : i32 to index
    %1434 = memref.load %arg2[%1433] : memref<128xi32, #tpu.memory_space<smem>>
    %1435 = arith.index_cast %1431 : i32 to index
    %c0_715 = arith.constant 0 : index
    %1436 = vector.load %arg3[%1435, %c0_715] : memref<32x128xf32, #tpu.memory_space<vmem>>, vector<1x128xf32>
    %c119 = arith.constant 119 : index
    %c0_716 = arith.constant 0 : index
    %1437 = vector.load %arg6[%c119, %c0_716] : memref<128x128xf32, #tpu.memory_space<vmem>>, vector<1x128xf32>
    tpu.vector_store %arg6[%c119, %c0_716], %1436 {strides = array<i32>} : memref<128x128xf32, #tpu.memory_space<vmem>>, vector<1x128xf32>,
    %1438 = arith.index_cast %1434 : i32 to index
    %c0_717 = arith.constant 0 : index
    %1439 = vector.load %arg4[%1438, %c0_717] : memref<48x128xf32, #tpu.memory_space<vmem>>, vector<1x128xf32>
    %c119_718 = arith.constant 119 : index
    %c0_719 = arith.constant 0 : index
    %1440 = vector.load %arg7[%c119_718, %c0_719] : memref<128x128xf32, #tpu.memory_space<vmem>>, vector<1x128xf32>
    tpu.vector_store %arg7[%c119_718, %c0_719], %1439 {strides = array<i32>} : memref<128x128xf32, #tpu.memory_space<vmem>>, vector<1x128xf32>,
    %c120_i32 = arith.constant 120 : i32
    %1441 = arith.addi %0, %c120_i32 : i32
    %1442 = arith.index_cast %1441 : i32 to index
    %1443 = memref.load %arg1[%1442] : memref<128xi32, #tpu.memory_space<smem>>
    %c120_i32_720 = arith.constant 120 : i32
    %1444 = arith.addi %0, %c120_i32_720 : i32
    %1445 = arith.index_cast %1444 : i32 to index
    %1446 = memref.load %arg2[%1445] : memref<128xi32, #tpu.memory_space<smem>>
    %1447 = arith.index_cast %1443 : i32 to index
    %c0_721 = arith.constant 0 : index
    %1448 = vector.load %arg3[%1447, %c0_721] : memref<32x128xf32, #tpu.memory_space<vmem>>, vector<1x128xf32>
    %c120 = arith.constant 120 : index
    %c0_722 = arith.constant 0 : index
    %1449 = vector.load %arg6[%c120, %c0_722] : memref<128x128xf32, #tpu.memory_space<vmem>>, vector<1x128xf32>
    tpu.vector_store %arg6[%c120, %c0_722], %1448 {strides = array<i32>} : memref<128x128xf32, #tpu.memory_space<vmem>>, vector<1x128xf32>,
    %1450 = arith.index_cast %1446 : i32 to index
    %c0_723 = arith.constant 0 : index
    %1451 = vector.load %arg4[%1450, %c0_723] : memref<48x128xf32, #tpu.memory_space<vmem>>, vector<1x128xf32>
    %c120_724 = arith.constant 120 : index
    %c0_725 = arith.constant 0 : index
    %1452 = vector.load %arg7[%c120_724, %c0_725] : memref<128x128xf32, #tpu.memory_space<vmem>>, vector<1x128xf32>
    tpu.vector_store %arg7[%c120_724, %c0_725], %1451 {strides = array<i32>} : memref<128x128xf32, #tpu.memory_space<vmem>>, vector<1x128xf32>,
    %c121_i32 = arith.constant 121 : i32
    %1453 = arith.addi %0, %c121_i32 : i32
    %1454 = arith.index_cast %1453 : i32 to index
    %1455 = memref.load %arg1[%1454] : memref<128xi32, #tpu.memory_space<smem>>
    %c121_i32_726 = arith.constant 121 : i32
    %1456 = arith.addi %0, %c121_i32_726 : i32
    %1457 = arith.index_cast %1456 : i32 to index
    %1458 = memref.load %arg2[%1457] : memref<128xi32, #tpu.memory_space<smem>>
    %1459 = arith.index_cast %1455 : i32 to index
    %c0_727 = arith.constant 0 : index
    %1460 = vector.load %arg3[%1459, %c0_727] : memref<32x128xf32, #tpu.memory_space<vmem>>, vector<1x128xf32>
    %c121 = arith.constant 121 : index
    %c0_728 = arith.constant 0 : index
    %1461 = vector.load %arg6[%c121, %c0_728] : memref<128x128xf32, #tpu.memory_space<vmem>>, vector<1x128xf32>
    tpu.vector_store %arg6[%c121, %c0_728], %1460 {strides = array<i32>} : memref<128x128xf32, #tpu.memory_space<vmem>>, vector<1x128xf32>,
    %1462 = arith.index_cast %1458 : i32 to index
    %c0_729 = arith.constant 0 : index
    %1463 = vector.load %arg4[%1462, %c0_729] : memref<48x128xf32, #tpu.memory_space<vmem>>, vector<1x128xf32>
    %c121_730 = arith.constant 121 : index
    %c0_731 = arith.constant 0 : index
    %1464 = vector.load %arg7[%c121_730, %c0_731] : memref<128x128xf32, #tpu.memory_space<vmem>>, vector<1x128xf32>
    tpu.vector_store %arg7[%c121_730, %c0_731], %1463 {strides = array<i32>} : memref<128x128xf32, #tpu.memory_space<vmem>>, vector<1x128xf32>,
    %c122_i32 = arith.constant 122 : i32
    %1465 = arith.addi %0, %c122_i32 : i32
    %1466 = arith.index_cast %1465 : i32 to index
    %1467 = memref.load %arg1[%1466] : memref<128xi32, #tpu.memory_space<smem>>
    %c122_i32_732 = arith.constant 122 : i32
    %1468 = arith.addi %0, %c122_i32_732 : i32
    %1469 = arith.index_cast %1468 : i32 to index
    %1470 = memref.load %arg2[%1469] : memref<128xi32, #tpu.memory_space<smem>>
    %1471 = arith.index_cast %1467 : i32 to index
    %c0_733 = arith.constant 0 : index
    %1472 = vector.load %arg3[%1471, %c0_733] : memref<32x128xf32, #tpu.memory_space<vmem>>, vector<1x128xf32>
    %c122 = arith.constant 122 : index
    %c0_734 = arith.constant 0 : index
    %1473 = vector.load %arg6[%c122, %c0_734] : memref<128x128xf32, #tpu.memory_space<vmem>>, vector<1x128xf32>
    tpu.vector_store %arg6[%c122, %c0_734], %1472 {strides = array<i32>} : memref<128x128xf32, #tpu.memory_space<vmem>>, vector<1x128xf32>,
    %1474 = arith.index_cast %1470 : i32 to index
    %c0_735 = arith.constant 0 : index
    %1475 = vector.load %arg4[%1474, %c0_735] : memref<48x128xf32, #tpu.memory_space<vmem>>, vector<1x128xf32>
    %c122_736 = arith.constant 122 : index
    %c0_737 = arith.constant 0 : index
    %1476 = vector.load %arg7[%c122_736, %c0_737] : memref<128x128xf32, #tpu.memory_space<vmem>>, vector<1x128xf32>
    tpu.vector_store %arg7[%c122_736, %c0_737], %1475 {strides = array<i32>} : memref<128x128xf32, #tpu.memory_space<vmem>>, vector<1x128xf32>,
    %c123_i32 = arith.constant 123 : i32
    %1477 = arith.addi %0, %c123_i32 : i32
    %1478 = arith.index_cast %1477 : i32 to index
    %1479 = memref.load %arg1[%1478] : memref<128xi32, #tpu.memory_space<smem>>
    %c123_i32_738 = arith.constant 123 : i32
    %1480 = arith.addi %0, %c123_i32_738 : i32
    %1481 = arith.index_cast %1480 : i32 to index
    %1482 = memref.load %arg2[%1481] : memref<128xi32, #tpu.memory_space<smem>>
    %1483 = arith.index_cast %1479 : i32 to index
    %c0_739 = arith.constant 0 : index
    %1484 = vector.load %arg3[%1483, %c0_739] : memref<32x128xf32, #tpu.memory_space<vmem>>, vector<1x128xf32>
    %c123 = arith.constant 123 : index
    %c0_740 = arith.constant 0 : index
    %1485 = vector.load %arg6[%c123, %c0_740] : memref<128x128xf32, #tpu.memory_space<vmem>>, vector<1x128xf32>
    tpu.vector_store %arg6[%c123, %c0_740], %1484 {strides = array<i32>} : memref<128x128xf32, #tpu.memory_space<vmem>>, vector<1x128xf32>,
    %1486 = arith.index_cast %1482 : i32 to index
    %c0_741 = arith.constant 0 : index
    %1487 = vector.load %arg4[%1486, %c0_741] : memref<48x128xf32, #tpu.memory_space<vmem>>, vector<1x128xf32>
    %c123_742 = arith.constant 123 : index
    %c0_743 = arith.constant 0 : index
    %1488 = vector.load %arg7[%c123_742, %c0_743] : memref<128x128xf32, #tpu.memory_space<vmem>>, vector<1x128xf32>
    tpu.vector_store %arg7[%c123_742, %c0_743], %1487 {strides = array<i32>} : memref<128x128xf32, #tpu.memory_space<vmem>>, vector<1x128xf32>,
    %c124_i32 = arith.constant 124 : i32
    %1489 = arith.addi %0, %c124_i32 : i32
    %1490 = arith.index_cast %1489 : i32 to index
    %1491 = memref.load %arg1[%1490] : memref<128xi32, #tpu.memory_space<smem>>
    %c124_i32_744 = arith.constant 124 : i32
    %1492 = arith.addi %0, %c124_i32_744 : i32
    %1493 = arith.index_cast %1492 : i32 to index
    %1494 = memref.load %arg2[%1493] : memref<128xi32, #tpu.memory_space<smem>>
    %1495 = arith.index_cast %1491 : i32 to index
    %c0_745 = arith.constant 0 : index
    %1496 = vector.load %arg3[%1495, %c0_745] : memref<32x128xf32, #tpu.memory_space<vmem>>, vector<1x128xf32>
    %c124 = arith.constant 124 : index
    %c0_746 = arith.constant 0 : index
    %1497 = vector.load %arg6[%c124, %c0_746] : memref<128x128xf32, #tpu.memory_space<vmem>>, vector<1x128xf32>
    tpu.vector_store %arg6[%c124, %c0_746], %1496 {strides = array<i32>} : memref<128x128xf32, #tpu.memory_space<vmem>>, vector<1x128xf32>,
    %1498 = arith.index_cast %1494 : i32 to index
    %c0_747 = arith.constant 0 : index
    %1499 = vector.load %arg4[%1498, %c0_747] : memref<48x128xf32, #tpu.memory_space<vmem>>, vector<1x128xf32>
    %c124_748 = arith.constant 124 : index
    %c0_749 = arith.constant 0 : index
    %1500 = vector.load %arg7[%c124_748, %c0_749] : memref<128x128xf32, #tpu.memory_space<vmem>>, vector<1x128xf32>
    tpu.vector_store %arg7[%c124_748, %c0_749], %1499 {strides = array<i32>} : memref<128x128xf32, #tpu.memory_space<vmem>>, vector<1x128xf32>,
    %c125_i32 = arith.constant 125 : i32
    %1501 = arith.addi %0, %c125_i32 : i32
    %1502 = arith.index_cast %1501 : i32 to index
    %1503 = memref.load %arg1[%1502] : memref<128xi32, #tpu.memory_space<smem>>
    %c125_i32_750 = arith.constant 125 : i32
    %1504 = arith.addi %0, %c125_i32_750 : i32
    %1505 = arith.index_cast %1504 : i32 to index
    %1506 = memref.load %arg2[%1505] : memref<128xi32, #tpu.memory_space<smem>>
    %1507 = arith.index_cast %1503 : i32 to index
    %c0_751 = arith.constant 0 : index
    %1508 = vector.load %arg3[%1507, %c0_751] : memref<32x128xf32, #tpu.memory_space<vmem>>, vector<1x128xf32>
    %c125 = arith.constant 125 : index
    %c0_752 = arith.constant 0 : index
    %1509 = vector.load %arg6[%c125, %c0_752] : memref<128x128xf32, #tpu.memory_space<vmem>>, vector<1x128xf32>
    tpu.vector_store %arg6[%c125, %c0_752], %1508 {strides = array<i32>} : memref<128x128xf32, #tpu.memory_space<vmem>>, vector<1x128xf32>,
    %1510 = arith.index_cast %1506 : i32 to index
    %c0_753 = arith.constant 0 : index
    %1511 = vector.load %arg4[%1510, %c0_753] : memref<48x128xf32, #tpu.memory_space<vmem>>, vector<1x128xf32>
    %c125_754 = arith.constant 125 : index
    %c0_755 = arith.constant 0 : index
    %1512 = vector.load %arg7[%c125_754, %c0_755] : memref<128x128xf32, #tpu.memory_space<vmem>>, vector<1x128xf32>
    tpu.vector_store %arg7[%c125_754, %c0_755], %1511 {strides = array<i32>} : memref<128x128xf32, #tpu.memory_space<vmem>>, vector<1x128xf32>,
    %c126_i32 = arith.constant 126 : i32
    %1513 = arith.addi %0, %c126_i32 : i32
    %1514 = arith.index_cast %1513 : i32 to index
    %1515 = memref.load %arg1[%1514] : memref<128xi32, #tpu.memory_space<smem>>
    %c126_i32_756 = arith.constant 126 : i32
    %1516 = arith.addi %0, %c126_i32_756 : i32
    %1517 = arith.index_cast %1516 : i32 to index
    %1518 = memref.load %arg2[%1517] : memref<128xi32, #tpu.memory_space<smem>>
    %1519 = arith.index_cast %1515 : i32 to index
    %c0_757 = arith.constant 0 : index
    %1520 = vector.load %arg3[%1519, %c0_757] : memref<32x128xf32, #tpu.memory_space<vmem>>, vector<1x128xf32>
    %c126 = arith.constant 126 : index
    %c0_758 = arith.constant 0 : index
    %1521 = vector.load %arg6[%c126, %c0_758] : memref<128x128xf32, #tpu.memory_space<vmem>>, vector<1x128xf32>
    tpu.vector_store %arg6[%c126, %c0_758], %1520 {strides = array<i32>} : memref<128x128xf32, #tpu.memory_space<vmem>>, vector<1x128xf32>,
    %1522 = arith.index_cast %1518 : i32 to index
    %c0_759 = arith.constant 0 : index
    %1523 = vector.load %arg4[%1522, %c0_759] : memref<48x128xf32, #tpu.memory_space<vmem>>, vector<1x128xf32>
    %c126_760 = arith.constant 126 : index
    %c0_761 = arith.constant 0 : index
    %1524 = vector.load %arg7[%c126_760, %c0_761] : memref<128x128xf32, #tpu.memory_space<vmem>>, vector<1x128xf32>
    tpu.vector_store %arg7[%c126_760, %c0_761], %1523 {strides = array<i32>} : memref<128x128xf32, #tpu.memory_space<vmem>>, vector<1x128xf32>,
    %c127_i32 = arith.constant 127 : i32
    %1525 = arith.addi %0, %c127_i32 : i32
    %1526 = arith.index_cast %1525 : i32 to index
    %1527 = memref.load %arg1[%1526] : memref<128xi32, #tpu.memory_space<smem>>
    %c127_i32_762 = arith.constant 127 : i32
    %1528 = arith.addi %0, %c127_i32_762 : i32
    %1529 = arith.index_cast %1528 : i32 to index
    %1530 = memref.load %arg2[%1529] : memref<128xi32, #tpu.memory_space<smem>>
    %1531 = arith.index_cast %1527 : i32 to index
    %c0_763 = arith.constant 0 : index
    %1532 = vector.load %arg3[%1531, %c0_763] : memref<32x128xf32, #tpu.memory_space<vmem>>, vector<1x128xf32>
    %c127 = arith.constant 127 : index
    %c0_764 = arith.constant 0 : index
    %1533 = vector.load %arg6[%c127, %c0_764] : memref<128x128xf32, #tpu.memory_space<vmem>>, vector<1x128xf32>
    tpu.vector_store %arg6[%c127, %c0_764], %1532 {strides = array<i32>} : memref<128x128xf32, #tpu.memory_space<vmem>>, vector<1x128xf32>,
    %1534 = arith.index_cast %1530 : i32 to index
    %c0_765 = arith.constant 0 : index
    %1535 = vector.load %arg4[%1534, %c0_765] : memref<48x128xf32, #tpu.memory_space<vmem>>, vector<1x128xf32>
    %c127_766 = arith.constant 127 : index
    %c0_767 = arith.constant 0 : index
    %1536 = vector.load %arg7[%c127_766, %c0_767] : memref<128x128xf32, #tpu.memory_space<vmem>>, vector<1x128xf32>
    tpu.vector_store %arg7[%c127_766, %c0_767], %1535 {strides = array<i32>} : memref<128x128xf32, #tpu.memory_space<vmem>>, vector<1x128xf32>,
    %c0_768 = arith.constant 0 : index
    %c0_769 = arith.constant 0 : index
    %1537 = vector.load %arg6[%c0_768, %c0_769] : memref<128x128xf32, #tpu.memory_space<vmem>>, vector<128x128xf32>
    %c0_770 = arith.constant 0 : index
    %c0_771 = arith.constant 0 : index
    %1538 = vector.load %arg7[%c0_770, %c0_771] : memref<128x128xf32, #tpu.memory_space<vmem>>, vector<128x128xf32>
    %1539 = arith.mulf %1537, %1538 : vector<128x128xf32>
    %cst = arith.constant dense<0.000000e+00> : vector<128xf32>
    %1540 = vector.multi_reduction <add>, %1539, %cst [1] : vector<128x128xf32> to vector<128xf32>
    %c0_772 = arith.constant 0 : index
    %c0_773 = arith.constant 0 : index
    %c0_774 = arith.constant 0 : index
    %1541 = vector.load %arg5[%c0_772, %c0_773, %c0_774] : memref<1x1x128xf32, #tpu.memory_space<vmem>>, vector<1x1x128xf32>
    %1542 = vector.shape_cast %1541 : vector<1x1x128xf32> to vector<128xf32>
    %1543 = vector.shape_cast %1540 : vector<128xf32> to vector<1x1x128xf32>
    tpu.vector_store %arg5[%c0_772, %c0_773, %c0_774], %1543 {strides = array<i32>} : memref<1x1x128xf32, #tpu.memory_space<vmem>>, vector<1x1x128xf32>,
    return
  }
  func.func @transform_0(%arg0: i32, %arg1: memref<128xi32, #tpu.memory_space<smem>>, %arg2: memref<128xi32, #tpu.memory_space<smem>>) -> (i32, i32) {
    %c0_i32 = arith.constant 0 : i32
    %c0_i32_0 = arith.constant 0 : i32
    %c0_i32_1 = arith.constant 0 : i32
    return %c0_i32, %c0_i32_0 : i32, i32
  }
  func.func @transform_1(%arg0: i32, %arg1: memref<128xi32, #tpu.memory_space<smem>>, %arg2: memref<128xi32, #tpu.memory_space<smem>>) -> (i32, i32) {
    %c0_i32 = arith.constant 0 : i32
    %c0_i32_0 = arith.constant 0 : i32
    %c0_i32_1 = arith.constant 0 : i32
    return %c0_i32, %c0_i32_0 : i32, i32
  }
  func.func @transform_2(%arg0: i32, %arg1: memref<128xi32, #tpu.memory_space<smem>>, %arg2: memref<128xi32, #tpu.memory_space<smem>>) -> (i32, i32, i32) {
    %c0_i32 = arith.constant 0 : i32
    %c0_i32_0 = arith.constant 0 : i32
    %c0_i32_1 = arith.constant 0 : i32
    return %arg0, %c0_i32, %c0_i32_0 : i32, i32, i32
  }
}

</mosaic_0001>

<bundles_post_ra>
// kernel: tpu_custom_call.1
= control target key start
LH: loop header
LB: loop body
LE: loop exit
PB: predicated region body
PF: predicated region fallthrough
CT: control target
= control target key end

     0   :  { %s2465_s0 = inlined_call_operand.hbm [shape: s32[128], index: 0, kind: input, shape index: {}]   ;;  %s2466_s2 = inlined_call_operand.hbm [shape: f32[32,128], index: 2, kind: input, shape index: {}]   ;;  %s2467_s3 = inlined_call_operand.hbm [shape: f32[48,128], index: 3, kind: input, shape index: {}]   ;;  %s2468_s4 = inlined_call_operand.hbm [shape: f32[1,1,128], index: 4, kind: output, shape index: {}]   ;;  %s2469_s1 = inlined_call_operand.vmem [shape: s32[128], index: 1, kind: input, shape index: {}]  }
   0x1   :  { %s1944_s17 = scalar_lea.hbm %s2465_s0, 16 }
   0x2   :  { %p1945_p0 = scmp.ne.s32.totalorder %s2465_s0, %s1944_s17  ;;  %p1948_p1 = scmp.lt.u32.totalorder %s1944_s17, %s2465_s0 }
   0x4   :  { %p1950_p2 = pnand %p1948_p1, %p1945_p0 }
   0x6   :  { %1953 = shalt.err (!%p1950_p2)  }
   0x7   :  { %s2040_s22 = smov [#allocation5]   ;;  %s11_s27 = sshll.u32 %s2469_s1, 4  ;;  %s12_s27 = int_to_ptr.vmem [resolvable:$true] %s11_s27 }
   0x8   :  { %10 = dma.hbm_to_smem %s2465_s0, 16, %s2040_s22, [#allocation4] }
   0x9   :  { %s1954_s28 = scalar_lea.vmem %s12_s27, 16  ;;  %p1959_p4 = scmp.lt.s32.totalorder %s12_s27, %s12_s27 }
   0xa   :  { %p1955_p3 = scmp.ne.s32.totalorder %s12_s27, %s1954_s28  ;;  %p1960_p5 = scmp.lt.s32.totalorder %s1954_s28, %s1954_s28 }
   0xc   :  { %p1961_p6 = por %p1960_p5, %p1959_p4 }
   0xe   :  { %p1962_p7 = pnand %p1961_p6, %p1955_p3 }
  0x10   :  { %1965 = shalt.err (!%p1962_p7)  }
  0x11   :  { %s2041_s29 = smov [#allocation6]  }
  0x12   :  { %14 = dma.vmem_to_smem %s12_s27, 16, %s2041_s29, [#allocation4] }
  0x13   :  { %2032 = dma.done.wait [#allocation4], 32 }
  0x14   :  { %2033 = vsyncadd [#allocation4], 4294967264 }
  0x15   :  { %16 = sfence }
  0x16   :  { %17 = vsyncpa [#allocation8], 0 }
  0x17   :  { %18 = vsyncpa [#allocation11], 0 }
  0x18   :  { %19 = vsyncpa [#allocation9], 0  ;;  %s2042_s0 = smov [#allocation7]   ;;  %s1966_s6 = scalar_lea.hbm %s2466_s2, 512 }
  0x19   :  { %s25_s30 = sshll.u32 %s2042_s0, 4  ;;  %p1967_p8 = scmp.ne.s32.totalorder %s2466_s2, %s1966_s6  ;;  %s26_s30 = int_to_ptr.vmem [resolvable:$true] %s25_s30 }
  0x1a   :  { %p1970_p9 = scmp.lt.u32.totalorder %s1966_s6, %s2466_s2 }
  0x1c   :  { %p1972_p10 = pnand %p1970_p9, %p1967_p8 }
  0x1e   :  { %1975 = shalt.err (!%p1972_p10)
}
  0x1f   :  { %s1976_s11 = scalar_lea.vmem %s26_s30, 512  ;;  %p1981_p12 = scmp.lt.s32.totalorder %s26_s30, %s26_s30 }
  0x20   :  { %p1977_p11 = scmp.ne.s32.totalorder %s26_s30, %s1976_s11  ;;  %p1982_p13 = scmp.lt.s32.totalorder %s1976_s11, %s1976_s11 }
  0x22   :  { %p1983_p0 = por %p1982_p13, %p1981_p12 }
  0x24   :  { %p1984_p1 = pnand %p1983_p0, %p1977_p11 }
  0x26   :  { %1987 = shalt.err (!%p1984_p1)
}
  0x27   :  { %s2043_s12 = smov 128   ;;  %s2044_s13 = smov 8  }
  0x28   :  { %31 = dma.hbm_to_vmem [thread:$0]  %s2466_s2, 512, %s26_s30, [#allocation8], %s2043_s12, %s2043_s12, %s2044_s13  }
  0x29   :  { %s2045_s16 = smov [#allocation10]   ;;  %s1988_s20 = scalar_lea.hbm %s2467_s3, 768 }
  0x2a   :  { %s37_s17 = sshll.u32 %s2045_s16, 4  ;;  %p1989_p2 = scmp.ne.s32.totalorder %s2467_s3, %s1988_s20  ;;  %s38_s17 = int_to_ptr.vmem [resolvable:$true] %s37_s17 }
  0x2b   :  { %p1992_p3 = scmp.lt.u32.totalorder %s1988_s20, %s2467_s3 }
  0x2d   :  { %p1994_p4 = pnand %p1992_p3, %p1989_p2 }
  0x2f   :  { %1997 = shalt.err (!%p1994_p4)
}
  0x30   :  { %s1998_s25 = scalar_lea.vmem %s38_s17, 768  ;;  %p2003_p6 = scmp.lt.s32.totalorder %s38_s17, %s38_s17 }
  0x31   :  { %p1999_p5 = scmp.ne.s32.totalorder %s38_s17, %s1998_s25  ;;  %p2004_p7 = scmp.lt.s32.totalorder %s1998_s25, %s1998_s25 }
  0x33   :  { %p2005_p8 = por %p2004_p7, %p2003_p6 }
  0x35   :  { %p2006_p9 = pnand %p2005_p8, %p1999_p5 }
  0x37   :  { %2009 = shalt.err (!%p2006_p9)
}
  0x38   :  { %43 = dma.hbm_to_vmem [thread:$0]  %s2467_s3, 768, %s38_s17, [#allocation11], %s2043_s12, %s2043_s12, %s2044_s13  }
  0x39   :  { %2034 = dma.done.wait [#allocation8], 512  }
  0x3a   :  { %2035 = vsyncadd [#allocation8], 4294966784 }
  0x3b   :  { %2036 = dma.done.wait [#allocation11], 768  }
  0x3c   :  { %2037 = vsyncadd [#allocation11], 4294966528  ;;  %s51_s27 = sld [smem:[#allocation5]]  ;;  %s1683_s29 = sld [smem:[#allocation5 + $0x1]]  ;;  %vm1309_vm0 = vcmask 130112   ;;  %vm1316_vm1 = vcmask 195712  }
  0x3d   :  { %s52_s28 = sld [smem:[#allocation6]]  ;;  %s1684_s0 = sld [smem:[#allocation6 + $0x1]]  ;;  %vm1323_vm2 = vcmask 261312   ;;  %vm1330_vm3 = vcmask 326912   ;;  %vm1337_vm4 = vcmask 392512   ;;  %vm1344_vm5 = vcmask 458112  }
  0x3e   :  { %s1685_s30 = sld [smem:[#allocation5 + $0x2]]  ;;  %s1687_s5 = sld [smem:[#allocation5 + $0x3]]  ;;  %vm1351_vm6 = vcmask 523712   ;;  %vm1358_vm7 = vcmask 589312   ;;  %vm1365_vm8 = vcmask 654912   ;;  %vm1372_vm9 = vcmask 720512  }
  0x3f   :  { %s1686_s1 = sld [smem:[#allocation6 + $0x2]]  ;;  %s1688_s6 = sld [smem:[#allocation6 + $0x3]]  ;;  %vm1379_vm10 = vcmask 786112   ;;  %vm1386_vm11 = vcmask 851712   ;;  %vm1393_vm12 = vcmask 917312   ;;  %vm1400_vm13 = vcmask 982912  }
  0x40   :  { %s2111_s7 = sld [smem:[#allocation5 + $0x4]]  ;;  %s2115_s9 = sld [smem:[#allocation5 + $0x5]]  ;;  %vm1407_vm14 = vcmask 1048512  }
  0x41   :  { %s2113_s8 = sld [smem:[#allocation6 + $0x4]]  ;;  %s2117_s10 = sld [smem:[#allocation6 + $0x5]] }
  0x42   :  { %s53_s3 = scalar_lea.vmem [#allocation7], %s51_s27  ;;  %s62_s12 = scalar_lea.vmem [#allocation7], %s1683_s29 }
  0x43   :  { %v54_v0 = vld [vmem:[%s53_s3] sm:$0x1]  ;;  %s56_s11 = scalar_lea.vmem [#allocation10], %s52_s28  ;;  %s65_s13 = scalar_lea.vmem [#allocation10], %s1684_s0 }
  0x44   :  { %v57_v1 = vld [vmem:[%s56_s11] sm:$0x1]  ;;  %55 = vst [vmem:[#allocation2] sm:$0x1] %v54_v0  ;;  %s71_s14 = scalar_lea.vmem [#allocation7], %s1685_s30  ;;  %s80_s16 = scalar_lea.vmem [#allocation7], %s1687_s5 }
  0x45   :  { %58 = vst [vmem:[#allocation3] sm:$0x1] %v57_v1  ;;  %v63_v2 = vld [vmem:[%s62_s12] sm:$0x1]  ;;  %s74_s15 = scalar_lea.vmem [#allocation10], %s1686_s1  ;;  %s83_s17 = scalar_lea.vmem [#allocation10], %s1688_s6 }
  0x46   :  { %v66_v3 = vld [vmem:[%s65_s13] sm:$0x1]  ;;  %64 = vst [vmem:[#allocation2 + $0x1] sm:$0x1] %v63_v2  ;;  %s89_s18 = scalar_lea.vmem [#allocation7], %s2111_s7  ;;  %s98_s20 = scalar_lea.vmem [#allocation7], %s2115_s9 }
  0x47   :  { %67 = vst [vmem:[#allocation3 + $0x1] sm:$0x1] %v66_v3  ;;  %v72_v4 = vld [vmem:[%s71_s14] sm:$0x1]  ;;  %s92_s19 = scalar_lea.vmem [#allocation10], %s2113_s8  ;;  %s101_s21 = scalar_lea.vmem [#allocation10], %s2117_s10 }
  0x48   :  { %v75_v5 = vld [vmem:[%s74_s15] sm:$0x1]  ;;  %73 = vst [vmem:[#allocation2 + $0x2] sm:$0x1] %v72_v4  ;;  %s1693_s22 = sld [smem:[#allocation5 + $0x6]]  ;;  %s1695_s24 = sld [smem:[#allocation5 + $0x7]] }
  0x49   :  { %76 = vst [vmem:[#allocation3 + $0x2] sm:$0x1] %v75_v5  ;;  %v81_v6 = vld [vmem:[%s80_s16] sm:$0x1]  ;;  %s1694_s23 = sld [smem:[#allocation6 + $0x6]]  ;;  %s1696_s25 = sld [smem:[#allocation6 + $0x7]] }
  0x4a   :  { %v84_v7 = vld [vmem:[%s83_s17] sm:$0x1]  ;;  %82 = vst [vmem:[#allocation2 + $0x3] sm:$0x1] %v81_v6  ;;  %s1713_s2 = sld [smem:[#allocation5 + $0x10]]  ;;  %s1715_s27 = sld [smem:[#allocation5 + $0x11]] }
  0x4b   :  { %85 = vst [vmem:[#allocation3 + $0x3] sm:$0x1] %v84_v7  ;;  %v90_v8 = vld [vmem:[%s89_s18] sm:$0x1]  ;;  %s1714_s26 = sld [smem:[#allocation6 + $0x10]]  ;;  %s1716_s28 = sld [smem:[#allocation6 + $0x11]] }
  0x4c   :  { %v93_v9 = vld [vmem:[%s92_s19] sm:$0x1]  ;;  %91 = vst [vmem:[#allocation2 + $0x4] sm:$0x1] %v90_v8  ;;  %s1717_s29 = sld [smem:[#allocation5 + $0x12]]  ;;  %s2125_s30 = sld [smem:[#allocation5 + $0x13]] }
  0x4d   :  { %94 = vst [vmem:[#allocation3 + $0x4] sm:$0x1] %v93_v9  ;;  %v99_v10 = vld [vmem:[%s98_s20] sm:$0x1]  ;;  %s2123_s0 = sld [smem:[#allocation6 + $0x12]]  ;;  %s2127_s1 = sld [smem:[#allocation6 + $0x13]] }
  0x4e   :  { %v102_v11 = vld [vmem:[%s101_s21] sm:$0x1]  ;;  %100 = vst [vmem:[#allocation2 + $0x5] sm:$0x1] %v99_v10  ;;  %s107_s5 = scalar_lea.vmem [#allocation7], %s1693_s22  ;;  %s116_s7 = scalar_lea.vmem [#allocation7], %s1695_s24 }
  0x4f   :  { %103 = vst [vmem:[#allocation3 + $0x5] sm:$0x1] %v102_v11  ;;  %v108_v12 = vld [vmem:[%s107_s5] sm:$0x1]  ;;  %s110_s6 = scalar_lea.vmem [#allocation10], %s1694_s23  ;;  %s119_s8 = scalar_lea.vmem [#allocation10], %s1696_s25 }
  0x50   :  { %109 = vst [vmem:[#allocation2 + $0x6] sm:$0x1] %v108_v12  ;;  %v111_v13 = vld [vmem:[%s110_s6] sm:$0x1]  ;;  %s197_s9 = scalar_lea.vmem [#allocation7], %s1713_s2  ;;  %s206_s3 = scalar_lea.vmem [#allocation7], %s1715_s27 }
  0x51   :  { %v117_v14 = vld [vmem:[%s116_s7] sm:$0x1]  ;;  %112 = vst [vmem:[#allocation3 + $0x6] sm:$0x1] %v111_v13  ;;  %s200_s10 = scalar_lea.vmem [#allocation10], %s1714_s26  ;;  %s209_s11 = scalar_lea.vmem [#allocation10], %s1716_s28 }
  0x52   :  { %118 = vst [vmem:[#allocation2 + $0x7] sm:$0x1] %v117_v14  ;;  %v120_v15 = vld [vmem:[%s119_s8] sm:$0x1]  ;;  %s215_s12 = scalar_lea.vmem [#allocation7], %s1717_s29  ;;  %s224_s14 = scalar_lea.vmem [#allocation7], %s2125_s30 }
  0x53   :  { %v198_v16 = vld [vmem:[%s197_s9] sm:$0x1]  ;;  %121 = vst [vmem:[#allocation3 + $0x7] sm:$0x1] %v120_v15  ;;  %s218_s13 = scalar_lea.vmem [#allocation10], %s2123_s0  ;;  %s227_s15 = scalar_lea.vmem [#allocation10], %s2127_s1 }
  0x54   :  { %199 = vst [vmem:[#allocation2 + $0x10] sm:$0x1] %v198_v16  ;;  %v201_v17 = vld [vmem:[%s200_s10] sm:$0x1]  ;;  %s1721_s16 = sld [smem:[#allocation5 + $0x14]]  ;;  %s1723_s18 = sld [smem:[#allocation5 + $0x15]] }
  0x55   :  { %v207_v18 = vld [vmem:[%s206_s3] sm:$0x1]  ;;  %202 = vst [vmem:[#allocation3 + $0x10] sm:$0x1] %v201_v17  ;;  %s1722_s17 = sld [smem:[#allocation6 + $0x14]]  ;;  %s1724_s19 = sld [smem:[#allocation6 + $0x15]] }
  0x56   :  { %208 = vst [vmem:[#allocation2 + $0x11] sm:$0x1] %v207_v18  ;;  %v210_v19 = vld [vmem:[%s209_s11] sm:$0x1]  ;;  %s1725_s20 = sld [smem:[#allocation5 + $0x16]]  ;;  %s1727_s22 = sld [smem:[#allocation5 + $0x17]] }
  0x57   :  { %v216_v20 = vld [vmem:[%s215_s12] sm:$0x1]  ;;  %211 = vst [vmem:[#allocation3 + $0x11] sm:$0x1] %v210_v19  ;;  %s1726_s21 = sld [smem:[#allocation6 + $0x16]]  ;;  %s2132_s23 = sld [smem:[#allocation6 + $0x17]] }
  0x58   :  { %217 = vst [vmem:[#allocation2 + $0x12] sm:$0x1] %v216_v20  ;;  %v219_v21 = vld [vmem:[%s218_s13] sm:$0x1]  ;;  %s2134_s24 = sld [smem:[#allocation5 + $0x8]]  ;;  %s2138_s2 = sld [smem:[#allocation5 + $0x9]] }
  0x59   :  { %v225_v22 = vld [vmem:[%s224_s14] sm:$0x1]  ;;  %220 = vst [vmem:[#allocation3 + $0x12] sm:$0x1] %v219_v21  ;;  %s2136_s25 = sld [smem:[#allocation6 + $0x8]]  ;;  %s2140_s26 = sld [smem:[#allocation6 + $0x9]] }
  0x5a   :  { %226 = vst [vmem:[#allocation2 + $0x13] sm:$0x1] %v225_v22  ;;  %v228_v23 = vld [vmem:[%s227_s15] sm:$0x1]  ;;  %s233_s27 = scalar_lea.vmem [#allocation7], %s1721_s16  ;;  %s242_s29 = scalar_lea.vmem [#allocation7], %s1723_s18 }
  0x5b   :  { %229 = vst [vmem:[#allocation3 + $0x13] sm:$0x1] %v228_v23  ;;  %v1202_v24 = vld [vmem:[#allocation2] sm:$0xff]  ;;  %s236_s28 = scalar_lea.vmem [#allocation10], %s1722_s17  ;;  %s245_s0 = scalar_lea.vmem [#allocation10], %s1724_s19 }
  0x5c   :  { %v1218_v25 = vld [vmem:[#allocation3] sm:$0xff]  ;;  %s251_s30 = scalar_lea.vmem [#allocation7], %s1725_s20  ;;  %s260_s5 = scalar_lea.vmem [#allocation7], %s1727_s22 }
  0x5d   :  { %v1234_v26 = vmul.f32 %v1218_v25, %v1202_v24  ;;  %v234_v27 = vld [vmem:[%s233_s27] sm:$0x1]  ;;  %s254_s1 = scalar_lea.vmem [#allocation10], %s1726_s21  ;;  %s263_s6 = scalar_lea.vmem [#allocation10], %s2132_s23 }
  0x5e   :  { %v237_v28 = vld [vmem:[%s236_s28] sm:$0x1]  ;;  %235 = vst [vmem:[#allocation2 + $0x14] sm:$0x1] %v234_v27  ;;  %s125_s7 = scalar_lea.vmem [#allocation7], %s2134_s24  ;;  %s134_s9 = scalar_lea.vmem [#allocation7], %s2138_s2 }
  0x5f   :  { %1250 = vadd.xlane.f32.xlu0 %v1234_v26  ;;  %238 = vst [vmem:[#allocation3 + $0x14] sm:$0x1] %v237_v28  ;;  %v243_v29 = vld [vmem:[%s242_s29] sm:$0x1]  ;;  %s128_s8 = scalar_lea.vmem [#allocation10], %s2136_s25  ;;  %s137_s10 = scalar_lea.vmem [#allocation10], %s2140_s26 }
  0x60   :  { %v246_v30 = vld [vmem:[%s245_s0] sm:$0x1]  ;;  %244 = vst [vmem:[#allocation2 + $0x15] sm:$0x1] %v243_v29  ;;  %s1701_s3 = sld [smem:[#allocation5 + $0xa]]  ;;  %s1703_s12 = sld [smem:[#allocation5 + $0xb]] }
  0x61   :  { %247 = vst [vmem:[#allocation3 + $0x15] sm:$0x1] %v246_v30  ;;  %v252_v31 = vld [vmem:[%s251_s30] sm:$0x1]  ;;  %s1702_s11 = sld [smem:[#allocation6 + $0xa]]  ;;  %s1704_s13 = sld [smem:[#allocation6 + $0xb]] }
  0x62   :  { %v255_v32 = vld [vmem:[%s254_s1] sm:$0x1]  ;;  %253 = vst [vmem:[#allocation2 + $0x16] sm:$0x1] %v252_v31  ;;  %s1705_s14 = sld [smem:[#allocation5 + $0xc]]  ;;  %s1707_s16 = sld [smem:[#allocation5 + $0xd]] }
  0x63   :  { %256 = vst [vmem:[#allocation3 + $0x16] sm:$0x1] %v255_v32  ;;  %v261_v33 = vld [vmem:[%s260_s5] sm:$0x1]  ;;  %s1706_s15 = sld [smem:[#allocation6 + $0xc]]  ;;  %s2147_s17 = sld [smem:[#allocation6 + $0xd]] }
  0x64   :  { %v264_v34 = vld [vmem:[%s263_s6] sm:$0x1]  ;;  %262 = vst [vmem:[#allocation2 + $0x17] sm:$0x1] %v261_v33  ;;  %s2149_s18 = sld [smem:[#allocation5 + $0xe]]  ;;  %s2153_s20 = sld [smem:[#allocation5 + $0xf]] }
  0x65   :  { %265 = vst [vmem:[#allocation3 + $0x17] sm:$0x1] %v264_v34  ;;  %v126_v35 = vld [vmem:[%s125_s7] sm:$0x1]  ;;  %s2151_s19 = sld [smem:[#allocation6 + $0xe]]  ;;  %s2155_s21 = sld [smem:[#allocation6 + $0xf]] }
  0x66   :  { %v129_v36 = vld [vmem:[%s128_s8] sm:$0x1]  ;;  %127 = vst [vmem:[#allocation2 + $0x8] sm:$0x1] %v126_v35  ;;  %s143_s22 = scalar_lea.vmem [#allocation7], %s1701_s3  ;;  %s152_s24 = scalar_lea.vmem [#allocation7], %s1703_s12 }
  0x67   :  { %130 = vst [vmem:[#allocation3 + $0x8] sm:$0x1] %v129_v36  ;;  %v135_v37 = vld [vmem:[%s134_s9] sm:$0x1]  ;;  %s146_s23 = scalar_lea.vmem [#allocation10], %s1702_s11  ;;  %s155_s25 = scalar_lea.vmem [#allocation10], %s1704_s13 }
  0x68   :  { %v138_v38 = vld [vmem:[%s137_s10] sm:$0x1]  ;;  %136 = vst [vmem:[#allocation2 + $0x9] sm:$0x1] %v135_v37  ;;  %s161_s2 = scalar_lea.vmem [#allocation7], %s1705_s14  ;;  %s170_s27 = scalar_lea.vmem [#allocation7], %s1707_s16 }
  0x69   :  { %139 = vst [vmem:[#allocation3 + $0x9] sm:$0x1] %v138_v38  ;;  %v144_v42 = vld [vmem:[%s143_s22] sm:$0x1]  ;;  %s164_s26 = scalar_lea.vmem [#allocation10], %s1706_s15  ;;  %s173_s28 = scalar_lea.vmem [#allocation10], %s2147_s17 }
  0x6a   :  { %145 = vst [vmem:[#allocation2 + $0xa] sm:$0x1] %v144_v42  ;;  %v147_v43 = vld [vmem:[%s146_s23] sm:$0x1]  ;;  %s179_s29 = scalar_lea.vmem [#allocation7], %s2149_s18  ;;  %s188_s30 = scalar_lea.vmem [#allocation7], %s2153_s20 }
  0x6b   :  { %v1204_v39 = vld [vmem:[#allocation2 + $0x10] sm:$0xff]  ;;  %v153_v44 = vld [vmem:[%s152_s24] sm:$0x1]  ;;  %148 = vst [vmem:[#allocation3 + $0xa] sm:$0x1] %v147_v43  ;;  %s182_s0 = scalar_lea.vmem [#allocation10], %s2151_s19 }
  0x6c   :  { %v1220_v40 = vld [vmem:[#allocation3 + $0x10] sm:$0xff]  ;;  %154 = vst [vmem:[#allocation2 + $0xb] sm:$0x1] %v153_v44  ;;  %v156_v45 = vld [vmem:[%s155_s25] sm:$0x1]  ;;  %s191_s1 = scalar_lea.vmem [#allocation10], %s2155_s21 }
  0x6d   :  { %v1236_v41 = vmul.f32 %v1220_v40, %v1204_v39  ;;  %v162_v46 = vld [vmem:[%s161_s2] sm:$0x1]  ;;  %157 = vst [vmem:[#allocation3 + $0xb] sm:$0x1] %v156_v45  ;;  %s1729_s5 = sld [smem:[#allocation5 + $0x18]]  ;;  %s1731_s7 = sld [smem:[#allocation5 + $0x19]] }
  0x6e   :  { %163 = vst [vmem:[#allocation2 + $0xc] sm:$0x1] %v162_v46  ;;  %v165_v47 = vld [vmem:[%s164_s26] sm:$0x1]  ;;  %s1730_s6 = sld [smem:[#allocation6 + $0x18]]  ;;  %s1732_s8 = sld [smem:[#allocation6 + $0x19]] }
  0x6f   :  { %1254 = vadd.xlane.f32.xlu1 %v1236_v41  ;;  %v171_v48 = vld [vmem:[%s170_s27] sm:$0x1]  ;;  %166 = vst [vmem:[#allocation3 + $0xc] sm:$0x1] %v165_v47  ;;  %s1733_s9 = sld [smem:[#allocation5 + $0x1a]]  ;;  %s1735_s3 = sld [smem:[#allocation5 + $0x1b]] }
  0x70   :  { %172 = vst [vmem:[#allocation2 + $0xd] sm:$0x1] %v171_v48  ;;  %v174_v49 = vld [vmem:[%s173_s28] sm:$0x1]  ;;  %s1734_s10 = sld [smem:[#allocation6 + $0x1a]]  ;;  %s2162_s11 = sld [smem:[#allocation6 + $0x1b]] }
  0x71   :  { %v180_v50 = vld [vmem:[%s179_s29] sm:$0x1]  ;;  %175 = vst [vmem:[#allocation3 + $0xd] sm:$0x1] %v174_v49  ;;  %s2164_s12 = sld [smem:[#allocation5 + $0x1c]]  ;;  %s2168_s14 = sld [smem:[#allocation5 + $0x1d]] }
  0x72   :  { %181 = vst [vmem:[#allocation2 + $0xe] sm:$0x1] %v180_v50  ;;  %v183_v51 = vld [vmem:[%s182_s0] sm:$0x1]  ;;  %s2166_s13 = sld [smem:[#allocation6 + $0x1c]]  ;;  %s2170_s15 = sld [smem:[#allocation6 + $0x1d]] }
  0x73   :  { %v189_v52 = vld [vmem:[%s188_s30] sm:$0x1]  ;;  %184 = vst [vmem:[#allocation3 + $0xe] sm:$0x1] %v183_v51  ;;  %s269_s16 = scalar_lea.vmem [#allocation7], %s1729_s5  ;;  %s278_s18 = scalar_lea.vmem [#allocation7], %s1731_s7 }
  0x74   :  { %190 = vst [vmem:[#allocation2 + $0xf] sm:$0x1] %v189_v52  ;;  %v192_v53 = vld [vmem:[%s191_s1] sm:$0x1]  ;;  %s272_s17 = scalar_lea.vmem [#allocation10], %s1730_s6  ;;  %s281_s19 = scalar_lea.vmem [#allocation10], %s1732_s8 }
  0x75   :  { %193 = vst [vmem:[#allocation3 + $0xf] sm:$0x1] %v192_v53  ;;  %v270_v55 = vld [vmem:[%s269_s16] sm:$0x1]  ;;  %s287_s20 = scalar_lea.vmem [#allocation7], %s1733_s9  ;;  %s296_s22 = scalar_lea.vmem [#allocation7], %s1735_s3 }
  0x76   :  { %v273_v56 = vld [vmem:[%s272_s17] sm:$0x1]  ;;  %271 = vst [vmem:[#allocation2 + $0x18] sm:$0x1] %v270_v55  ;;  %s290_s21 = scalar_lea.vmem [#allocation10], %s1734_s10  ;;  %s299_s23 = scalar_lea.vmem [#allocation10], %s2162_s11 }
  0x77   :  { %274 = vst [vmem:[#allocation3 + $0x18] sm:$0x1] %v273_v56  ;;  %v279_v58 = vld [vmem:[%s278_s18] sm:$0x1]  ;;  %s305_s24 = scalar_lea.vmem [#allocation7], %s2164_s12  ;;  %s314_s2 = scalar_lea.vmem [#allocation7], %s2168_s14 }
  0x78   :  { %280 = vst [vmem:[#allocation2 + $0x19] sm:$0x1] %v279_v58  ;;  %v282_v60 = vld [vmem:[%s281_s19] sm:$0x1]  ;;  %s308_s25 = scalar_lea.vmem [#allocation10], %s2166_s13  ;;  %s317_s26 = scalar_lea.vmem [#allocation10], %s2170_s15 }
  0x79   :  { %v288_v61 = vld [vmem:[%s287_s20] sm:$0x1]  ;;  %283 = vst [vmem:[#allocation3 + $0x19] sm:$0x1] %v282_v60  ;;  %s1741_s27 = sld [smem:[#allocation5 + $0x1e]]  ;;  %s1743_s29 = sld [smem:[#allocation5 + $0x1f]] }
  0x7a   :  { %289 = vst [vmem:[#allocation2 + $0x1a] sm:$0x1] %v288_v61  ;;  %v291_v62 = vld [vmem:[%s290_s21] sm:$0x1]  ;;  %s1742_s28 = sld [smem:[#allocation6 + $0x1e]]  ;;  %s1744_s0 = sld [smem:[#allocation6 + $0x1f]] }
  0x7b   :  { %v1203_v54 = vld [vmem:[#allocation2 + $0x8] sm:$0xff]  ;;  %v297_v63 = vld [vmem:[%s296_s22] sm:$0x1]  ;;  %292 = vst [vmem:[#allocation3 + $0x1a] sm:$0x1] %v291_v62  ;;  %s1745_s30 = sld [smem:[#allocation5 + $0x20]] }
  0x7c   :  { %v1219_v57 = vld [vmem:[#allocation3 + $0x8] sm:$0xff]  ;;  %298 = vst [vmem:[#allocation2 + $0x1b] sm:$0x1] %v297_v63  ;;  %v300_v0 = vld [vmem:[%s299_s23] sm:$0x1]  ;;  %s1746_s1 = sld [smem:[#allocation6 + $0x20]] }
  0x7d   :  { %v1235_v59 = vmul.f32 %v1219_v57, %v1203_v54  ;;  %v306_v1 = vld [vmem:[%s305_s24] sm:$0x1]  ;;  %301 = vst [vmem:[#allocation3 + $0x1b] sm:$0x1] %v300_v0  ;;  %s1747_s5 = sld [smem:[#allocation5 + $0x21]]  ;;  %s2177_s7 = sld [smem:[#allocation5 + $0x22]] }
  0x7e   :  { %307 = vst [vmem:[#allocation2 + $0x1c] sm:$0x1] %v306_v1  ;;  %v309_v2 = vld [vmem:[%s308_s25] sm:$0x1]  ;;  %s1748_s6 = sld [smem:[#allocation6 + $0x21]]  ;;  %s2179_s8 = sld [smem:[#allocation6 + $0x22]] }
  0x7f   :  { %1252 = vadd.xlane.f32.xlu0 %v1235_v59  ;;  %v315_v3 = vld [vmem:[%s314_s2] sm:$0x1]  ;;  %310 = vst [vmem:[#allocation3 + $0x1c] sm:$0x1] %v309_v2  ;;  %s2181_s9 = sld [smem:[#allocation5 + $0x23]]  ;;  %s323_s3 = scalar_lea.vmem [#allocation7], %s1741_s27 }
  0x80   :  { %316 = vst [vmem:[#allocation2 + $0x1d] sm:$0x1] %v315_v3  ;;  %v318_v4 = vld [vmem:[%s317_s26] sm:$0x1]  ;;  %s2183_s10 = sld [smem:[#allocation6 + $0x23]]  ;;  %s326_s11 = scalar_lea.vmem [#allocation10], %s1742_s28 }
  0x81   :  { %319 = vst [vmem:[#allocation3 + $0x1d] sm:$0x1] %v318_v4  ;;  %v324_v5 = vld [vmem:[%s323_s3] sm:$0x1]  ;;  %s332_s12 = scalar_lea.vmem [#allocation7], %s1743_s29  ;;  %s335_s13 = scalar_lea.vmem [#allocation10], %s1744_s0 }
  0x82   :  { %v327_v6 = vld [vmem:[%s326_s11] sm:$0x1]  ;;  %325 = vst [vmem:[#allocation2 + $0x1e] sm:$0x1] %v324_v5  ;;  %s341_s14 = scalar_lea.vmem [#allocation7], %s1745_s30  ;;  %s344_s15 = scalar_lea.vmem [#allocation10], %s1746_s1 }
  0x83   :  { %328 = vst [vmem:[#allocation3 + $0x1e] sm:$0x1] %v327_v6  ;;  %v333_v7 = vld [vmem:[%s332_s12] sm:$0x1]  ;;  %s350_s16 = scalar_lea.vmem [#allocation7], %s1747_s5  ;;  %s359_s18 = scalar_lea.vmem [#allocation7], %s2177_s7 }
  0x84   :  { %v336_v8 = vld [vmem:[%s335_s13] sm:$0x1]  ;;  %334 = vst [vmem:[#allocation2 + $0x1f] sm:$0x1] %v333_v7  ;;  %s353_s17 = scalar_lea.vmem [#allocation10], %s1748_s6  ;;  %s362_s19 = scalar_lea.vmem [#allocation10], %s2179_s8 }
  0x85   :  { %337 = vst [vmem:[#allocation3 + $0x1f] sm:$0x1] %v336_v8  ;;  %v342_v9 = vld [vmem:[%s341_s14] sm:$0x1]  ;;  %s368_s20 = scalar_lea.vmem [#allocation7], %s2181_s9  ;;  %s1753_s22 = sld [smem:[#allocation5 + $0x24]] }
  0x86   :  { %v345_v10 = vld [vmem:[%s344_s15] sm:$0x1]  ;;  %343 = vst [vmem:[#allocation2 + $0x20] sm:$0x1] %v342_v9  ;;  %s371_s21 = scalar_lea.vmem [#allocation10], %s2183_s10  ;;  %s1754_s23 = sld [smem:[#allocation6 + $0x24]] }
  0x87   :  { %346 = vst [vmem:[#allocation3 + $0x20] sm:$0x1] %v345_v10  ;;  %v351_v11 = vld [vmem:[%s350_s16] sm:$0x1]  ;;  %s1755_s24 = sld [smem:[#allocation5 + $0x25]]  ;;  %s1757_s2 = sld [smem:[#allocation5 + $0x26]] }
  0x88   :  { %v354_v12 = vld [vmem:[%s353_s17] sm:$0x1]  ;;  %352 = vst [vmem:[#allocation2 + $0x21] sm:$0x1] %v351_v11  ;;  %s1756_s25 = sld [smem:[#allocation6 + $0x25]]  ;;  %s1758_s26 = sld [smem:[#allocation6 + $0x26]] }
  0x89   :  { %355 = vst [vmem:[#allocation3 + $0x21] sm:$0x1] %v354_v12  ;;  %v360_v13 = vld [vmem:[%s359_s18] sm:$0x1]  ;;  %s1759_s27 = sld [smem:[#allocation5 + $0x27]]  ;;  %s2191_s29 = sld [smem:[#allocation5 + $0x28]] }
  0x8a   :  { %v363_v14 = vld [vmem:[%s362_s19] sm:$0x1]  ;;  %361 = vst [vmem:[#allocation2 + $0x22] sm:$0x1] %v360_v13  ;;  %s2189_s28 = sld [smem:[#allocation6 + $0x27]]  ;;  %s2193_s0 = sld [smem:[#allocation6 + $0x28]] }
  0x8b   :  { %364 = vst [vmem:[#allocation3 + $0x22] sm:$0x1] %v363_v14  ;;  %v369_v15 = vld [vmem:[%s368_s20] sm:$0x1]  ;;  %v1205_v17 = vld [vmem:[#allocation2 + $0x18] sm:$0xff]  ;;  %s2195_s30 = sld [smem:[#allocation5 + $0x29]] }
  0x8c   :  { %v372_v16 = vld [vmem:[%s371_s21] sm:$0x1]  ;;  %370 = vst [vmem:[#allocation2 + $0x23] sm:$0x1] %v369_v15  ;;  %v1221_v18 = vld [vmem:[#allocation3 + $0x18] sm:$0xff]  ;;  %s2197_s1 = sld [smem:[#allocation6 + $0x29]] }
  0x8d   :  { %373 = vst [vmem:[#allocation3 + $0x23] sm:$0x1] %v372_v16  ;;  %v1237_v19 = vmul.f32 %v1221_v18, %v1205_v17  ;;  %s377_s5 = scalar_lea.vmem [#allocation7], %s1753_s22  ;;  %s380_s6 = scalar_lea.vmem [#allocation10], %s1754_s23 }
  0x8e   :  { %v378_v20 = vld [vmem:[%s377_s5] sm:$0x1]  ;;  %s386_s7 = scalar_lea.vmem [#allocation7], %s1755_s24  ;;  %s389_s8 = scalar_lea.vmem [#allocation10], %s1756_s25 }
  0x8f   :  { %1256 = vadd.xlane.f32.xlu1 %v1237_v19  ;;  %379 = vst [vmem:[#allocation2 + $0x24] sm:$0x1] %v378_v20  ;;  %v381_v21 = vld [vmem:[%s380_s6] sm:$0x1]  ;;  %s395_s9 = scalar_lea.vmem [#allocation7], %s1757_s2  ;;  %s398_s10 = scalar_lea.vmem [#allocation10], %s1758_s26 }
  0x90   :  { %v387_v22 = vld [vmem:[%s386_s7] sm:$0x1]  ;;  %382 = vst [vmem:[#allocation3 + $0x24] sm:$0x1] %v381_v21  ;;  %s404_s3 = scalar_lea.vmem [#allocation7], %s1759_s27  ;;  %s407_s11 = scalar_lea.vmem [#allocation10], %s2189_s28 }
  0x91   :  { %388 = vst [vmem:[#allocation2 + $0x25] sm:$0x1] %v387_v22  ;;  %v390_v23 = vld [vmem:[%s389_s8] sm:$0x1]  ;;  %s413_s12 = scalar_lea.vmem [#allocation7], %s2191_s29  ;;  %s416_s13 = scalar_lea.vmem [#allocation10], %s2193_s0 }
  0x92   :  { %v396_v24 = vld [vmem:[%s395_s9] sm:$0x1]  ;;  %391 = vst [vmem:[#allocation3 + $0x25] sm:$0x1] %v390_v23  ;;  %s422_s14 = scalar_lea.vmem [#allocation7], %s2195_s30  ;;  %s425_s15 = scalar_lea.vmem [#allocation10], %s2197_s1 }
  0x93   :  { %397 = vst [vmem:[#allocation2 + $0x26] sm:$0x1] %v396_v24  ;;  %v399_v25 = vld [vmem:[%s398_s10] sm:$0x1]  ;;  %s1765_s16 = sld [smem:[#allocation5 + $0x2a]]  ;;  %s1767_s18 = sld [smem:[#allocation5 + $0x2b]] }
  0x94   :  { %v405_v26 = vld [vmem:[%s404_s3] sm:$0x1]  ;;  %400 = vst [vmem:[#allocation3 + $0x26] sm:$0x1] %v399_v25  ;;  %s1766_s17 = sld [smem:[#allocation6 + $0x2a]]  ;;  %s1768_s19 = sld [smem:[#allocation6 + $0x2b]] }
  0x95   :  { %406 = vst [vmem:[#allocation2 + $0x27] sm:$0x1] %v405_v26  ;;  %v408_v27 = vld [vmem:[%s407_s11] sm:$0x1]  ;;  %s1769_s20 = sld [smem:[#allocation5 + $0x2c]]  ;;  %s2204_s22 = sld [smem:[#allocation5 + $0x2d]] }
  0x96   :  { %v414_v28 = vld [vmem:[%s413_s12] sm:$0x1]  ;;  %409 = vst [vmem:[#allocation3 + $0x27] sm:$0x1] %v408_v27  ;;  %s1770_s21 = sld [smem:[#allocation6 + $0x2c]]  ;;  %s2206_s23 = sld [smem:[#allocation6 + $0x2d]] }
  0x97   :  { %415 = vst [vmem:[#allocation2 + $0x28] sm:$0x1] %v414_v28  ;;  %v417_v29 = vld [vmem:[%s416_s13] sm:$0x1]  ;;  %s2208_s24 = sld [smem:[#allocation5 + $0x2e]]  ;;  %s2212_s2 = sld [smem:[#allocation5 + $0x2f]] }
  0x98   :  { %v423_v30 = vld [vmem:[%s422_s14] sm:$0x1]  ;;  %418 = vst [vmem:[#allocation3 + $0x28] sm:$0x1] %v417_v29  ;;  %s2210_s25 = sld [smem:[#allocation6 + $0x2e]]  ;;  %s2214_s26 = sld [smem:[#allocation6 + $0x2f]] }
  0x99   :  { %424 = vst [vmem:[#allocation2 + $0x29] sm:$0x1] %v423_v30  ;;  %v426_v31 = vld [vmem:[%s425_s15] sm:$0x1]  ;;  %s431_s27 = scalar_lea.vmem [#allocation7], %s1765_s16  ;;  %s440_s29 = scalar_lea.vmem [#allocation7], %s1767_s18 }
  0x9a   :  { %427 = vst [vmem:[#allocation3 + $0x29] sm:$0x1] %v426_v31  ;;  %v432_v35 = vld [vmem:[%s431_s27] sm:$0x1]  ;;  %s434_s28 = scalar_lea.vmem [#allocation10], %s1766_s17  ;;  %s443_s0 = scalar_lea.vmem [#allocation10], %s1768_s19 }
  0x9b   :  { %v435_v36 = vld [vmem:[%s434_s28] sm:$0x1]  ;;  %433 = vst [vmem:[#allocation2 + $0x2a] sm:$0x1] %v432_v35  ;;  %s449_s30 = scalar_lea.vmem [#allocation7], %s1769_s20  ;;  %s458_s5 = scalar_lea.vmem [#allocation7], %s2204_s22 }
  0x9c   :  { %v1206_v32 = vld [vmem:[#allocation2 + $0x20] sm:$0xff]  ;;  %436 = vst [vmem:[#allocation3 + $0x2a] sm:$0x1] %v435_v36  ;;  %s452_s1 = scalar_lea.vmem [#allocation10], %s1770_s21  ;;  %s461_s6 = scalar_lea.vmem [#allocation10], %s2206_s23 }
  0x9d   :  { %v1222_v33 = vld [vmem:[#allocation3 + $0x20] sm:$0xff]  ;;  %s467_s7 = scalar_lea.vmem [#allocation7], %s2208_s24  ;;  %s476_s9 = scalar_lea.vmem [#allocation7], %s2212_s2 }
  0x9e   :  { %v1238_v34 = vmul.f32 %v1222_v33, %v1206_v32  ;;  %v441_v37 = vld [vmem:[%s440_s29] sm:$0x1]  ;;  %s470_s8 = scalar_lea.vmem [#allocation10], %s2210_s25  ;;  %s479_s10 = scalar_lea.vmem [#allocation10], %s2214_s26 }
  0x9f   :  { %v444_v38 = vld [vmem:[%s443_s0] sm:$0x1]  ;;  %442 = vst [vmem:[#allocation2 + $0x2b] sm:$0x1] %v441_v37  ;;  %s1777_s3 = sld [smem:[#allocation5 + $0x30]]  ;;  %s1779_s12 = sld [smem:[#allocation5 + $0x31]] }
  0xa0   :  { %1258 = vadd.xlane.f32.xlu0 %v1238_v34  ;;  %445 = vst [vmem:[#allocation3 + $0x2b] sm:$0x1] %v444_v38  ;;  %v450_v39 = vld [vmem:[%s449_s30] sm:$0x1]  ;;  %s1778_s11 = sld [smem:[#allocation6 + $0x30]]  ;;  %s1780_s13 = sld [smem:[#allocation6 + $0x31]] }
  0xa1   :  { %v453_v40 = vld [vmem:[%s452_s1] sm:$0x1]  ;;  %451 = vst [vmem:[#allocation2 + $0x2c] sm:$0x1] %v450_v39  ;;  %s1781_s14 = sld [smem:[#allocation5 + $0x32]]  ;;  %s1783_s16 = sld [smem:[#allocation5 + $0x33]] }
  0xa2   :  { %454 = vst [vmem:[#allocation3 + $0x2c] sm:$0x1] %v453_v40  ;;  %v459_v41 = vld [vmem:[%s458_s5] sm:$0x1]  ;;  %s1782_s15 = sld [smem:[#allocation6 + $0x32]]  ;;  %s2222_s17 = sld [smem:[#allocation6 + $0x33]] }
  0xa3   :  { %v462_v42 = vld [vmem:[%s461_s6] sm:$0x1]  ;;  %460 = vst [vmem:[#allocation2 + $0x2d] sm:$0x1] %v459_v41  ;;  %s2224_s18 = sld [smem:[#allocation5 + $0x34]]  ;;  %s2228_s20 = sld [smem:[#allocation5 + $0x35]] }
  0xa4   :  { %463 = vst [vmem:[#allocation3 + $0x2d] sm:$0x1] %v462_v42  ;;  %v468_v43 = vld [vmem:[%s467_s7] sm:$0x1]  ;;  %s2226_s19 = sld [smem:[#allocation6 + $0x34]]  ;;  %s2230_s21 = sld [smem:[#allocation6 + $0x35]] }
  0xa5   :  { %v471_v44 = vld [vmem:[%s470_s8] sm:$0x1]  ;;  %469 = vst [vmem:[#allocation2 + $0x2e] sm:$0x1] %v468_v43  ;;  %s485_s22 = scalar_lea.vmem [#allocation7], %s1777_s3  ;;  %s494_s24 = scalar_lea.vmem [#allocation7], %s1779_s12 }
  0xa6   :  { %472 = vst [vmem:[#allocation3 + $0x2e] sm:$0x1] %v471_v44  ;;  %v477_v45 = vld [vmem:[%s476_s9] sm:$0x1]  ;;  %s488_s23 = scalar_lea.vmem [#allocation10], %s1778_s11  ;;  %s497_s25 = scalar_lea.vmem [#allocation10], %s1780_s13 }
  0xa7   :  { %v480_v46 = vld [vmem:[%s479_s10] sm:$0x1]  ;;  %478 = vst [vmem:[#allocation2 + $0x2f] sm:$0x1] %v477_v45  ;;  %s503_s2 = scalar_lea.vmem [#allocation7], %s1781_s14  ;;  %s512_s27 = scalar_lea.vmem [#allocation7], %s1783_s16 }
  0xa8   :  { %481 = vst [vmem:[#allocation3 + $0x2f] sm:$0x1] %v480_v46  ;;  %v486_v47 = vld [vmem:[%s485_s22] sm:$0x1]  ;;  %s506_s26 = scalar_lea.vmem [#allocation10], %s1782_s15  ;;  %s515_s28 = scalar_lea.vmem [#allocation10], %s2222_s17 }
  0xa9   :  { %487 = vst [vmem:[#allocation2 + $0x30] sm:$0x1] %v486_v47  ;;  %v489_v50 = vld [vmem:[%s488_s23] sm:$0x1]  ;;  %s521_s29 = scalar_lea.vmem [#allocation7], %s2224_s18  ;;  %s530_s30 = scalar_lea.vmem [#allocation7], %s2228_s20 }
  0xaa   :  { %490 = vst [vmem:[#allocation3 + $0x30] sm:$0x1] %v489_v50  ;;  %v495_v52 = vld [vmem:[%s494_s24] sm:$0x1]  ;;  %s524_s0 = scalar_lea.vmem [#allocation10], %s2226_s19  ;;  %s533_s1 = scalar_lea.vmem [#allocation10], %s2230_s21 }
  0xab   :  { %v498_v53 = vld [vmem:[%s497_s25] sm:$0x1]  ;;  %496 = vst [vmem:[#allocation2 + $0x31] sm:$0x1] %v495_v52  ;;  %s1789_s5 = sld [smem:[#allocation5 + $0x36]]  ;;  %s1791_s7 = sld [smem:[#allocation5 + $0x37]] }
  0xac   :  { %v504_v54 = vld [vmem:[%s503_s2] sm:$0x1]  ;;  %499 = vst [vmem:[#allocation3 + $0x31] sm:$0x1] %v498_v53  ;;  %s1790_s6 = sld [smem:[#allocation6 + $0x36]]  ;;  %s1792_s8 = sld [smem:[#allocation6 + $0x37]] }
  0xad   :  { %505 = vst [vmem:[#allocation2 + $0x32] sm:$0x1] %v504_v54  ;;  %v507_v55 = vld [vmem:[%s506_s26] sm:$0x1]  ;;  %s1793_s9 = sld [smem:[#allocation5 + $0x38]]  ;;  %s1795_s3 = sld [smem:[#allocation5 + $0x39]] }
  0xae   :  { %v1207_v48 = vld [vmem:[#allocation2 + $0x28] sm:$0xff]  ;;  %v513_v56 = vld [vmem:[%s512_s27] sm:$0x1]  ;;  %508 = vst [vmem:[#allocation3 + $0x32] sm:$0x1] %v507_v55  ;;  %s1794_s10 = sld [smem:[#allocation6 + $0x38]] }
  0xaf   :  { %v1223_v49 = vld [vmem:[#allocation3 + $0x28] sm:$0xff]  ;;  %514 = vst [vmem:[#allocation2 + $0x33] sm:$0x1] %v513_v56  ;;  %v516_v57 = vld [vmem:[%s515_s28] sm:$0x1]  ;;  %s1796_s11 = sld [smem:[#allocation6 + $0x39]] }
  0xb0   :  { %v1239_v51 = vmul.f32 %v1223_v49, %v1207_v48  ;;  %v522_v58 = vld [vmem:[%s521_s29] sm:$0x1]  ;;  %517 = vst [vmem:[#allocation3 + $0x33] sm:$0x1] %v516_v57  ;;  %s2237_s12 = sld [smem:[#allocation5 + $0x3a]]  ;;  %s2241_s14 = sld [smem:[#allocation5 + $0x3b]] }
  0xb1   :  { %523 = vst [vmem:[#allocation2 + $0x34] sm:$0x1] %v522_v58  ;;  %v525_v59 = vld [vmem:[%s524_s0] sm:$0x1]  ;;  %s2239_s13 = sld [smem:[#allocation6 + $0x3a]]  ;;  %s2243_s15 = sld [smem:[#allocation6 + $0x3b]] }
  0xb2   :  { %1260 = vadd.xlane.f32.xlu1 %v1239_v51  ;;  %v531_v60 = vld [vmem:[%s530_s30] sm:$0x1]  ;;  %526 = vst [vmem:[#allocation3 + $0x34] sm:$0x1] %v525_v59  ;;  %s539_s16 = scalar_lea.vmem [#allocation7], %s1789_s5  ;;  %s542_s17 = scalar_lea.vmem [#allocation10], %s1790_s6 }
  0xb3   :  { %532 = vst [vmem:[#allocation2 + $0x35] sm:$0x1] %v531_v60  ;;  %v534_v61 = vld [vmem:[%s533_s1] sm:$0x1]  ;;  %s548_s18 = scalar_lea.vmem [#allocation7], %s1791_s7  ;;  %s551_s19 = scalar_lea.vmem [#allocation10], %s1792_s8 }
  0xb4   :  { %535 = vst [vmem:[#allocation3 + $0x35] sm:$0x1] %v534_v61  ;;  %v540_v62 = vld [vmem:[%s539_s16] sm:$0x1]  ;;  %s557_s20 = scalar_lea.vmem [#allocation7], %s1793_s9  ;;  %s560_s21 = scalar_lea.vmem [#allocation10], %s1794_s10 }
  0xb5   :  { %v543_v63 = vld [vmem:[%s542_s17] sm:$0x1]  ;;  %541 = vst [vmem:[#allocation2 + $0x36] sm:$0x1] %v540_v62  ;;  %s566_s22 = scalar_lea.vmem [#allocation7], %s1795_s3  ;;  %s569_s23 = scalar_lea.vmem [#allocation10], %s1796_s11 }
  0xb6   :  { %544 = vst [vmem:[#allocation3 + $0x36] sm:$0x1] %v543_v63  ;;  %v549_v0 = vld [vmem:[%s548_s18] sm:$0x1]  ;;  %s575_s24 = scalar_lea.vmem [#allocation7], %s2237_s12  ;;  %s584_s2 = scalar_lea.vmem [#allocation7], %s2241_s14 }
  0xb7   :  { %v552_v1 = vld [vmem:[%s551_s19] sm:$0x1]  ;;  %550 = vst [vmem:[#allocation2 + $0x37] sm:$0x1] %v549_v0  ;;  %s578_s25 = scalar_lea.vmem [#allocation10], %s2239_s13  ;;  %s587_s26 = scalar_lea.vmem [#allocation10], %s2243_s15 }
  0xb8   :  { %553 = vst [vmem:[#allocation3 + $0x37] sm:$0x1] %v552_v1  ;;  %v558_v2 = vld [vmem:[%s557_s20] sm:$0x1]  ;;  %s1801_s27 = sld [smem:[#allocation5 + $0x3c]]  ;;  %s1803_s29 = sld [smem:[#allocation5 + $0x3d]] }
  0xb9   :  { %v561_v3 = vld [vmem:[%s560_s21] sm:$0x1]  ;;  %559 = vst [vmem:[#allocation2 + $0x38] sm:$0x1] %v558_v2  ;;  %s1802_s28 = sld [smem:[#allocation6 + $0x3c]]  ;;  %s1804_s0 = sld [smem:[#allocation6 + $0x3d]] }
  0xba   :  { %562 = vst [vmem:[#allocation3 + $0x38] sm:$0x1] %v561_v3  ;;  %v567_v4 = vld [vmem:[%s566_s22] sm:$0x1]  ;;  %s1805_s30 = sld [smem:[#allocation5 + $0x3e]]  ;;  %s1807_s5 = sld [smem:[#allocation5 + $0x3f]] }
  0xbb   :  { %v570_v5 = vld [vmem:[%s569_s23] sm:$0x1]  ;;  %568 = vst [vmem:[#allocation2 + $0x39] sm:$0x1] %v567_v4  ;;  %s1806_s1 = sld [smem:[#allocation6 + $0x3e]]  ;;  %s2249_s6 = sld [smem:[#allocation6 + $0x3f]] }
  0xbc   :  { %571 = vst [vmem:[#allocation3 + $0x39] sm:$0x1] %v570_v5  ;;  %v576_v6 = vld [vmem:[%s575_s24] sm:$0x1]  ;;  %s2251_s7 = sld [smem:[#allocation5 + $0x40]]  ;;  %s2255_s9 = sld [smem:[#allocation5 + $0x41]] }
  0xbd   :  { %v579_v7 = vld [vmem:[%s578_s25] sm:$0x1]  ;;  %577 = vst [vmem:[#allocation2 + $0x3a] sm:$0x1] %v576_v6  ;;  %s2253_s8 = sld [smem:[#allocation6 + $0x40]]  ;;  %s2257_s10 = sld [smem:[#allocation6 + $0x41]] }
  0xbe   :  { %580 = vst [vmem:[#allocation3 + $0x3a] sm:$0x1] %v579_v7  ;;  %v585_v8 = vld [vmem:[%s584_s2] sm:$0x1]  ;;  %v1208_v10 = vld [vmem:[#allocation2 + $0x30] sm:$0xff]  ;;  %s593_s3 = scalar_lea.vmem [#allocation7], %s1801_s27 }
  0xbf   :  { %v588_v9 = vld [vmem:[%s587_s26] sm:$0x1]  ;;  %586 = vst [vmem:[#allocation2 + $0x3b] sm:$0x1] %v585_v8  ;;  %v1224_v11 = vld [vmem:[#allocation3 + $0x30] sm:$0xff]  ;;  %s596_s11 = scalar_lea.vmem [#allocation10], %s1802_s28 }
  0xc0   :  { %589 = vst [vmem:[#allocation3 + $0x3b] sm:$0x1] %v588_v9  ;;  %v1240_v12 = vmul.f32 %v1224_v11, %v1208_v10  ;;  %v594_v13 = vld [vmem:[%s593_s3] sm:$0x1]  ;;  %s602_s12 = scalar_lea.vmem [#allocation7], %s1803_s29  ;;  %s605_s13 = scalar_lea.vmem [#allocation10], %s1804_s0 }
  0xc1   :  { %595 = vst [vmem:[#allocation2 + $0x3c] sm:$0x1] %v594_v13  ;;  %v597_v14 = vld [vmem:[%s596_s11] sm:$0x1]  ;;  %s611_s14 = scalar_lea.vmem [#allocation7], %s1805_s30  ;;  %s614_s15 = scalar_lea.vmem [#allocation10], %s1806_s1 }
  0xc2   :  { %1262 = vadd.xlane.f32.xlu0 %v1240_v12  ;;  %v603_v15 = vld [vmem:[%s602_s12] sm:$0x1]  ;;  %598 = vst [vmem:[#allocation3 + $0x3c] sm:$0x1] %v597_v14  ;;  %s620_s16 = scalar_lea.vmem [#allocation7], %s1807_s5  ;;  %s623_s17 = scalar_lea.vmem [#allocation10], %s2249_s6 }
  0xc3   :  { %604 = vst [vmem:[#allocation2 + $0x3d] sm:$0x1] %v603_v15  ;;  %v606_v16 = vld [vmem:[%s605_s13] sm:$0x1]  ;;  %s629_s18 = scalar_lea.vmem [#allocation7], %s2251_s7  ;;  %s632_s19 = scalar_lea.vmem [#allocation10], %s2253_s8 }
  0xc4   :  { %v612_v17 = vld [vmem:[%s611_s14] sm:$0x1]  ;;  %607 = vst [vmem:[#allocation3 + $0x3d] sm:$0x1] %v606_v16  ;;  %s638_s20 = scalar_lea.vmem [#allocation7], %s2255_s9  ;;  %s641_s21 = scalar_lea.vmem [#allocation10], %s2257_s10 }
  0xc5   :  { %613 = vst [vmem:[#allocation2 + $0x3e] sm:$0x1] %v612_v17  ;;  %v615_v18 = vld [vmem:[%s614_s15] sm:$0x1]  ;;  %s1813_s22 = sld [smem:[#allocation5 + $0x42]]  ;;  %s1815_s24 = sld [smem:[#allocation5 + $0x43]] }
  0xc6   :  { %v621_v19 = vld [vmem:[%s620_s16] sm:$0x1]  ;;  %616 = vst [vmem:[#allocation3 + $0x3e] sm:$0x1] %v615_v18  ;;  %s1814_s23 = sld [smem:[#allocation6 + $0x42]]  ;;  %s1816_s25 = sld [smem:[#allocation6 + $0x43]] }
  0xc7   :  { %622 = vst [vmem:[#allocation2 + $0x3f] sm:$0x1] %v621_v19  ;;  %v624_v20 = vld [vmem:[%s623_s17] sm:$0x1]  ;;  %s1817_s2 = sld [smem:[#allocation5 + $0x44]]  ;;  %s2264_s27 = sld [smem:[#allocation5 + $0x45]] }
  0xc8   :  { %v630_v21 = vld [vmem:[%s629_s18] sm:$0x1]  ;;  %625 = vst [vmem:[#allocation3 + $0x3f] sm:$0x1] %v624_v20  ;;  %s1818_s26 = sld [smem:[#allocation6 + $0x44]]  ;;  %s2266_s28 = sld [smem:[#allocation6 + $0x45]] }
  0xc9   :  { %631 = vst [vmem:[#allocation2 + $0x40] sm:$0x1] %v630_v21  ;;  %v633_v22 = vld [vmem:[%s632_s19] sm:$0x1]  ;;  %s2268_s29 = sld [smem:[#allocation5 + $0x46]]  ;;  %s2272_s30 = sld [smem:[#allocation5 + $0x47]] }
  0xca   :  { %v639_v23 = vld [vmem:[%s638_s20] sm:$0x1]  ;;  %634 = vst [vmem:[#allocation3 + $0x40] sm:$0x1] %v633_v22  ;;  %s2270_s0 = sld [smem:[#allocation6 + $0x46]]  ;;  %s2274_s1 = sld [smem:[#allocation6 + $0x47]] }
  0xcb   :  { %640 = vst [vmem:[#allocation2 + $0x41] sm:$0x1] %v639_v23  ;;  %v642_v24 = vld [vmem:[%s641_s21] sm:$0x1]  ;;  %s647_s5 = scalar_lea.vmem [#allocation7], %s1813_s22  ;;  %s656_s7 = scalar_lea.vmem [#allocation7], %s1815_s24 }
  0xcc   :  { %643 = vst [vmem:[#allocation3 + $0x41] sm:$0x1] %v642_v24  ;;  %v648_v28 = vld [vmem:[%s647_s5] sm:$0x1]  ;;  %s650_s6 = scalar_lea.vmem [#allocation10], %s1814_s23  ;;  %s659_s8 = scalar_lea.vmem [#allocation10], %s1816_s25 }
  0xcd   :  { %v651_v29 = vld [vmem:[%s650_s6] sm:$0x1]  ;;  %649 = vst [vmem:[#allocation2 + $0x42] sm:$0x1] %v648_v28  ;;  %s665_s9 = scalar_lea.vmem [#allocation7], %s1817_s2  ;;  %s674_s3 = scalar_lea.vmem [#allocation7], %s2264_s27 }
  0xce   :  { %v1209_v25 = vld [vmem:[#allocation2 + $0x38] sm:$0xff]  ;;  %652 = vst [vmem:[#allocation3 + $0x42] sm:$0x1] %v651_v29  ;;  %v657_v30 = vld [vmem:[%s656_s7] sm:$0x1]  ;;  %s668_s10 = scalar_lea.vmem [#allocation10], %s1818_s26 }
  0xcf   :  { %v1225_v26 = vld [vmem:[#allocation3 + $0x38] sm:$0xff]  ;;  %v660_v31 = vld [vmem:[%s659_s8] sm:$0x1]  ;;  %658 = vst [vmem:[#allocation2 + $0x43] sm:$0x1] %v657_v30  ;;  %s677_s11 = scalar_lea.vmem [#allocation10], %s2266_s28 }
  0xd0   :  { %v1241_v27 = vmul.f32 %v1225_v26, %v1209_v25  ;;  %661 = vst [vmem:[#allocation3 + $0x43] sm:$0x1] %v660_v31  ;;  %v666_v32 = vld [vmem:[%s665_s9] sm:$0x1]  ;;  %s683_s12 = scalar_lea.vmem [#allocation7], %s2268_s29  ;;  %s686_s13 = scalar_lea.vmem [#allocation10], %s2270_s0 }
  0xd1   :  { %v669_v33 = vld [vmem:[%s668_s10] sm:$0x1]  ;;  %667 = vst [vmem:[#allocation2 + $0x44] sm:$0x1] %v666_v32  ;;  %s692_s14 = scalar_lea.vmem [#allocation7], %s2272_s30  ;;  %s695_s15 = scalar_lea.vmem [#allocation10], %s2274_s1 }
  0xd2   :  { %1264 = vadd.xlane.f32.xlu1 %v1241_v27  ;;  %670 = vst [vmem:[#allocation3 + $0x44] sm:$0x1] %v669_v33  ;;  %v675_v34 = vld [vmem:[%s674_s3] sm:$0x1]  ;;  %s1825_s16 = sld [smem:[#allocation5 + $0x48]]  ;;  %s1827_s18 = sld [smem:[#allocation5 + $0x49]] }
  0xd3   :  { %v678_v35 = vld [vmem:[%s677_s11] sm:$0x1]  ;;  %676 = vst [vmem:[#allocation2 + $0x45] sm:$0x1] %v675_v34  ;;  %s1826_s17 = sld [smem:[#allocation6 + $0x48]]  ;;  %s1828_s19 = sld [smem:[#allocation6 + $0x49]] }
  0xd4   :  { %679 = vst [vmem:[#allocation3 + $0x45] sm:$0x1] %v678_v35  ;;  %v684_v36 = vld [vmem:[%s683_s12] sm:$0x1]  ;;  %s1829_s20 = sld [smem:[#allocation5 + $0x4a]]  ;;  %s1831_s22 = sld [smem:[#allocation5 + $0x4b]] }
  0xd5   :  { %v687_v37 = vld [vmem:[%s686_s13] sm:$0x1]  ;;  %685 = vst [vmem:[#allocation2 + $0x46] sm:$0x1] %v684_v36  ;;  %s1830_s21 = sld [smem:[#allocation6 + $0x4a]]  ;;  %s2282_s23 = sld [smem:[#allocation6 + $0x4b]] }
  0xd6   :  { %688 = vst [vmem:[#allocation3 + $0x46] sm:$0x1] %v687_v37  ;;  %v693_v38 = vld [vmem:[%s692_s14] sm:$0x1]  ;;  %s2284_s24 = sld [smem:[#allocation5 + $0x4c]]  ;;  %s2288_s2 = sld [smem:[#allocation5 + $0x4d]] }
  0xd7   :  { %v696_v39 = vld [vmem:[%s695_s15] sm:$0x1]  ;;  %694 = vst [vmem:[#allocation2 + $0x47] sm:$0x1] %v693_v38  ;;  %s2286_s25 = sld [smem:[#allocation6 + $0x4c]]  ;;  %s2290_s26 = sld [smem:[#allocation6 + $0x4d]] }
  0xd8   :  { %697 = vst [vmem:[#allocation3 + $0x47] sm:$0x1] %v696_v39  ;;  %s701_s27 = scalar_lea.vmem [#allocation7], %s1825_s16  ;;  %s710_s29 = scalar_lea.vmem [#allocation7], %s1827_s18 }
  0xd9   :  { %v702_v40 = vld [vmem:[%s701_s27] sm:$0x1]  ;;  %s704_s28 = scalar_lea.vmem [#allocation10], %s1826_s17  ;;  %s713_s0 = scalar_lea.vmem [#allocation10], %s1828_s19 }
  0xda   :  { %703 = vst [vmem:[#allocation2 + $0x48] sm:$0x1] %v702_v40  ;;  %v705_v43 = vld [vmem:[%s704_s28] sm:$0x1]  ;;  %s719_s30 = scalar_lea.vmem [#allocation7], %s1829_s20  ;;  %s728_s5 = scalar_lea.vmem [#allocation7], %s1831_s22 }
  0xdb   :  { %706 = vst [vmem:[#allocation3 + $0x48] sm:$0x1] %v705_v43  ;;  %v711_v45 = vld [vmem:[%s710_s29] sm:$0x1]  ;;  %s722_s1 = scalar_lea.vmem [#allocation10], %s1830_s21  ;;  %s731_s6 = scalar_lea.vmem [#allocation10], %s2282_s23 }
  0xdc   :  { %v714_v46 = vld [vmem:[%s713_s0] sm:$0x1]  ;;  %712 = vst [vmem:[#allocation2 + $0x49] sm:$0x1] %v711_v45  ;;  %s737_s7 = scalar_lea.vmem [#allocation7], %s2284_s24  ;;  %s746_s9 = scalar_lea.vmem [#allocation7], %s2288_s2 }
  0xdd   :  { %v720_v47 = vld [vmem:[%s719_s30] sm:$0x1]  ;;  %715 = vst [vmem:[#allocation3 + $0x49] sm:$0x1] %v714_v46  ;;  %s740_s8 = scalar_lea.vmem [#allocation10], %s2286_s25  ;;  %s749_s10 = scalar_lea.vmem [#allocation10], %s2290_s26 }
  0xde   :  { %v1210_v41 = vld [vmem:[#allocation2 + $0x40] sm:$0xff]  ;;  %721 = vst [vmem:[#allocation2 + $0x4a] sm:$0x1] %v720_v47  ;;  %s1837_s3 = sld [smem:[#allocation5 + $0x4e]]  ;;  %s1839_s12 = sld [smem:[#allocation5 + $0x4f]] }
  0xdf   :  { %v1226_v42 = vld [vmem:[#allocation3 + $0x40] sm:$0xff]  ;;  %s1838_s11 = sld [smem:[#allocation6 + $0x4e]]  ;;  %s1840_s13 = sld [smem:[#allocation6 + $0x4f]] }
  0xe0   :  { %v1242_v44 = vmul.f32 %v1226_v42, %v1210_v41  ;;  %v723_v48 = vld [vmem:[%s722_s1] sm:$0x1]  ;;  %s1841_s14 = sld [smem:[#allocation5 + $0x50]]  ;;  %s1843_s16 = sld [smem:[#allocation5 + $0x51]] }
  0xe1   :  { %v729_v49 = vld [vmem:[%s728_s5] sm:$0x1]  ;;  %724 = vst [vmem:[#allocation3 + $0x4a] sm:$0x1] %v723_v48  ;;  %s1842_s15 = sld [smem:[#allocation6 + $0x50]]  ;;  %s1844_s17 = sld [smem:[#allocation6 + $0x51]] }
  0xe2   :  { %1266 = vadd.xlane.f32.xlu0 %v1242_v44  ;;  %730 = vst [vmem:[#allocation2 + $0x4b] sm:$0x1] %v729_v49  ;;  %v732_v50 = vld [vmem:[%s731_s6] sm:$0x1]  ;;  %s2297_s18 = sld [smem:[#allocation5 + $0x52]]  ;;  %s2301_s20 = sld [smem:[#allocation5 + $0x53]] }
  0xe3   :  { %v738_v51 = vld [vmem:[%s737_s7] sm:$0x1]  ;;  %733 = vst [vmem:[#allocation3 + $0x4b] sm:$0x1] %v732_v50  ;;  %s2299_s19 = sld [smem:[#allocation6 + $0x52]]  ;;  %s2303_s21 = sld [smem:[#allocation6 + $0x53]] }
  0xe4   :  { %739 = vst [vmem:[#allocation2 + $0x4c] sm:$0x1] %v738_v51  ;;  %v741_v52 = vld [vmem:[%s740_s8] sm:$0x1]  ;;  %s755_s22 = scalar_lea.vmem [#allocation7], %s1837_s3  ;;  %s764_s24 = scalar_lea.vmem [#allocation7], %s1839_s12 }
  0xe5   :  { %v747_v53 = vld [vmem:[%s746_s9] sm:$0x1]  ;;  %742 = vst [vmem:[#allocation3 + $0x4c] sm:$0x1] %v741_v52  ;;  %s758_s23 = scalar_lea.vmem [#allocation10], %s1838_s11  ;;  %s767_s25 = scalar_lea.vmem [#allocation10], %s1840_s13 }
  0xe6   :  { %748 = vst [vmem:[#allocation2 + $0x4d] sm:$0x1] %v747_v53  ;;  %v750_v54 = vld [vmem:[%s749_s10] sm:$0x1]  ;;  %s773_s2 = scalar_lea.vmem [#allocation7], %s1841_s14  ;;  %s782_s27 = scalar_lea.vmem [#allocation7], %s1843_s16 }
  0xe7   :  { %751 = vst [vmem:[#allocation3 + $0x4d] sm:$0x1] %v750_v54  ;;  %v756_v55 = vld [vmem:[%s755_s22] sm:$0x1]  ;;  %s776_s26 = scalar_lea.vmem [#allocation10], %s1842_s15  ;;  %s785_s28 = scalar_lea.vmem [#allocation10], %s1844_s17 }
  0xe8   :  { %v759_v56 = vld [vmem:[%s758_s23] sm:$0x1]  ;;  %757 = vst [vmem:[#allocation2 + $0x4e] sm:$0x1] %v756_v55  ;;  %s791_s29 = scalar_lea.vmem [#allocation7], %s2297_s18  ;;  %s800_s30 = scalar_lea.vmem [#allocation7], %s2301_s20 }
  0xe9   :  { %760 = vst [vmem:[#allocation3 + $0x4e] sm:$0x1] %v759_v56  ;;  %v765_v57 = vld [vmem:[%s764_s24] sm:$0x1]  ;;  %s794_s0 = scalar_lea.vmem [#allocation10], %s2299_s19  ;;  %s803_s1 = scalar_lea.vmem [#allocation10], %s2303_s21 }
  0xea   :  { %v768_v58 = vld [vmem:[%s767_s25] sm:$0x1]  ;;  %766 = vst [vmem:[#allocation2 + $0x4f] sm:$0x1] %v765_v57  ;;  %s1849_s5 = sld [smem:[#allocation5 + $0x54]]  ;;  %s1851_s7 = sld [smem:[#allocation5 + $0x55]] }
  0xeb   :  { %769 = vst [vmem:[#allocation3 + $0x4f] sm:$0x1] %v768_v58  ;;  %v774_v59 = vld [vmem:[%s773_s2] sm:$0x1]  ;;  %s1850_s6 = sld [smem:[#allocation6 + $0x54]]  ;;  %s1852_s8 = sld [smem:[#allocation6 + $0x55]] }
  0xec   :  { %v777_v60 = vld [vmem:[%s776_s26] sm:$0x1]  ;;  %775 = vst [vmem:[#allocation2 + $0x50] sm:$0x1] %v774_v59  ;;  %s1853_s9 = sld [smem:[#allocation5 + $0x56]]  ;;  %s1855_s3 = sld [smem:[#allocation5 + $0x57]] }
  0xed   :  { %778 = vst [vmem:[#allocation3 + $0x50] sm:$0x1] %v777_v60  ;;  %v783_v61 = vld [vmem:[%s782_s27] sm:$0x1]  ;;  %s1854_s10 = sld [smem:[#allocation6 + $0x56]]  ;;  %s2309_s11 = sld [smem:[#allocation6 + $0x57]] }
  0xee   :  { %v786_v62 = vld [vmem:[%s785_s28] sm:$0x1]  ;;  %784 = vst [vmem:[#allocation2 + $0x51] sm:$0x1] %v783_v61  ;;  %s2311_s12 = sld [smem:[#allocation5 + $0x58]]  ;;  %s2315_s14 = sld [smem:[#allocation5 + $0x59]] }
  0xef   :  { %787 = vst [vmem:[#allocation3 + $0x51] sm:$0x1] %v786_v62  ;;  %v792_v63 = vld [vmem:[%s791_s29] sm:$0x1]  ;;  %s2313_s13 = sld [smem:[#allocation6 + $0x58]]  ;;  %s2317_s15 = sld [smem:[#allocation6 + $0x59]] }
  0xf0   :  { %v795_v0 = vld [vmem:[%s794_s0] sm:$0x1]  ;;  %793 = vst [vmem:[#allocation2 + $0x52] sm:$0x1] %v792_v63  ;;  %s809_s16 = scalar_lea.vmem [#allocation7], %s1849_s5  ;;  %s818_s18 = scalar_lea.vmem [#allocation7], %s1851_s7 }
  0xf1   :  { %796 = vst [vmem:[#allocation3 + $0x52] sm:$0x1] %v795_v0  ;;  %v801_v1 = vld [vmem:[%s800_s30] sm:$0x1]  ;;  %v1211_v3 = vld [vmem:[#allocation2 + $0x48] sm:$0xff]  ;;  %s812_s17 = scalar_lea.vmem [#allocation10], %s1850_s6 }
  0xf2   :  { %v804_v2 = vld [vmem:[%s803_s1] sm:$0x1]  ;;  %802 = vst [vmem:[#allocation2 + $0x53] sm:$0x1] %v801_v1  ;;  %v1227_v4 = vld [vmem:[#allocation3 + $0x48] sm:$0xff]  ;;  %s821_s19 = scalar_lea.vmem [#allocation10], %s1852_s8 }
  0xf3   :  { %805 = vst [vmem:[#allocation3 + $0x53] sm:$0x1] %v804_v2  ;;  %v1243_v5 = vmul.f32 %v1227_v4, %v1211_v3  ;;  %v810_v6 = vld [vmem:[%s809_s16] sm:$0x1]  ;;  %s827_s20 = scalar_lea.vmem [#allocation7], %s1853_s9  ;;  %s830_s21 = scalar_lea.vmem [#allocation10], %s1854_s10 }
  0xf4   :  { %811 = vst [vmem:[#allocation2 + $0x54] sm:$0x1] %v810_v6  ;;  %v813_v7 = vld [vmem:[%s812_s17] sm:$0x1]  ;;  %s836_s22 = scalar_lea.vmem [#allocation7], %s1855_s3  ;;  %s839_s23 = scalar_lea.vmem [#allocation10], %s2309_s11 }
  0xf5   :  { %1268 = vadd.xlane.f32.xlu1 %v1243_v5  ;;  %v819_v8 = vld [vmem:[%s818_s18] sm:$0x1]  ;;  %814 = vst [vmem:[#allocation3 + $0x54] sm:$0x1] %v813_v7  ;;  %s845_s24 = scalar_lea.vmem [#allocation7], %s2311_s12  ;;  %s848_s25 = scalar_lea.vmem [#allocation10], %s2313_s13 }
  0xf6   :  { %820 = vst [vmem:[#allocation2 + $0x55] sm:$0x1] %v819_v8  ;;  %v822_v9 = vld [vmem:[%s821_s19] sm:$0x1]  ;;  %s854_s2 = scalar_lea.vmem [#allocation7], %s2315_s14  ;;  %s857_s26 = scalar_lea.vmem [#allocation10], %s2317_s15 }
  0xf7   :  { %v828_v10 = vld [vmem:[%s827_s20] sm:$0x1]  ;;  %823 = vst [vmem:[#allocation3 + $0x55] sm:$0x1] %v822_v9  ;;  %s1861_s27 = sld [smem:[#allocation5 + $0x5a]]  ;;  %s1863_s29 = sld [smem:[#allocation5 + $0x5b]] }
  0xf8   :  { %829 = vst [vmem:[#allocation2 + $0x56] sm:$0x1] %v828_v10  ;;  %v831_v11 = vld [vmem:[%s830_s21] sm:$0x1]  ;;  %s1862_s28 = sld [smem:[#allocation6 + $0x5a]]  ;;  %s1864_s0 = sld [smem:[#allocation6 + $0x5b]] }
  0xf9   :  { %v837_v12 = vld [vmem:[%s836_s22] sm:$0x1]  ;;  %832 = vst [vmem:[#allocation3 + $0x56] sm:$0x1] %v831_v11  ;;  %s1865_s30 = sld [smem:[#allocation5 + $0x5c]]  ;;  %s2324_s5 = sld [smem:[#allocation5 + $0x5d]] }
  0xfa   :  { %838 = vst [vmem:[#allocation2 + $0x57] sm:$0x1] %v837_v12  ;;  %v840_v13 = vld [vmem:[%s839_s23] sm:$0x1]  ;;  %s1866_s1 = sld [smem:[#allocation6 + $0x5c]]  ;;  %s2326_s6 = sld [smem:[#allocation6 + $0x5d]] }
  0xfb   :  { %v846_v14 = vld [vmem:[%s845_s24] sm:$0x1]  ;;  %841 = vst [vmem:[#allocation3 + $0x57] sm:$0x1] %v840_v13  ;;  %s2328_s7 = sld [smem:[#allocation5 + $0x5e]]  ;;  %s2332_s9 = sld [smem:[#allocation5 + $0x5f]] }
  0xfc   :  { %847 = vst [vmem:[#allocation2 + $0x58] sm:$0x1] %v846_v14  ;;  %v849_v15 = vld [vmem:[%s848_s25] sm:$0x1]  ;;  %s2330_s8 = sld [smem:[#allocation6 + $0x5e]]  ;;  %s2334_s10 = sld [smem:[#allocation6 + $0x5f]] }
  0xfd   :  { %v855_v16 = vld [vmem:[%s854_s2] sm:$0x1]  ;;  %850 = vst [vmem:[#allocation3 + $0x58] sm:$0x1] %v849_v15  ;;  %s863_s3 = scalar_lea.vmem [#allocation7], %s1861_s27  ;;  %s872_s12 = scalar_lea.vmem [#allocation7], %s1863_s29 }
  0xfe   :  { %856 = vst [vmem:[#allocation2 + $0x59] sm:$0x1] %v855_v16  ;;  %v858_v17 = vld [vmem:[%s857_s26] sm:$0x1]  ;;  %s866_s11 = scalar_lea.vmem [#allocation10], %s1862_s28  ;;  %s875_s13 = scalar_lea.vmem [#allocation10], %s1864_s0 }
  0xff   :  { %859 = vst [vmem:[#allocation3 + $0x59] sm:$0x1] %v858_v17  ;;  %v864_v21 = vld [vmem:[%s863_s3] sm:$0x1]  ;;  %s881_s14 = scalar_lea.vmem [#allocation7], %s1865_s30  ;;  %s890_s16 = scalar_lea.vmem [#allocation7], %s2324_s5 }
 0x100   :  { %v867_v22 = vld [vmem:[%s866_s11] sm:$0x1]  ;;  %865 = vst [vmem:[#allocation2 + $0x5a] sm:$0x1] %v864_v21  ;;  %s884_s15 = scalar_lea.vmem [#allocation10], %s1866_s1  ;;  %s893_s17 = scalar_lea.vmem [#allocation10], %s2326_s6 }
 0x101   :  { %v1212_v18 = vld [vmem:[#allocation2 + $0x50] sm:$0xff]  ;;  %868 = vst [vmem:[#allocation3 + $0x5a] sm:$0x1] %v867_v22  ;;  %v873_v23 = vld [vmem:[%s872_s12] sm:$0x1]  ;;  %s899_s18 = scalar_lea.vmem [#allocation7], %s2328_s7 }
 0x102   :  { %v1228_v19 = vld [vmem:[#allocation3 + $0x50] sm:$0xff]  ;;  %v876_v24 = vld [vmem:[%s875_s13] sm:$0x1]  ;;  %874 = vst [vmem:[#allocation2 + $0x5b] sm:$0x1] %v873_v23  ;;  %s902_s19 = scalar_lea.vmem [#allocation10], %s2330_s8 }
 0x103   :  { %v1244_v20 = vmul.f32 %v1228_v19, %v1212_v18  ;;  %877 = vst [vmem:[#allocation3 + $0x5b] sm:$0x1] %v876_v24  ;;  %v882_v25 = vld [vmem:[%s881_s14] sm:$0x1]  ;;  %s908_s20 = scalar_lea.vmem [#allocation7], %s2332_s9  ;;  %s911_s21 = scalar_lea.vmem [#allocation10], %s2334_s10 }
 0x104   :  { %v885_v26 = vld [vmem:[%s884_s15] sm:$0x1]  ;;  %883 = vst [vmem:[#allocation2 + $0x5c] sm:$0x1] %v882_v25  ;;  %s1873_s22 = sld [smem:[#allocation5 + $0x60]]  ;;  %s1875_s24 = sld [smem:[#allocation5 + $0x61]] }
 0x105   :  { %1270 = vadd.xlane.f32.xlu0 %v1244_v20  ;;  %886 = vst [vmem:[#allocation3 + $0x5c] sm:$0x1] %v885_v26  ;;  %v891_v27 = vld [vmem:[%s890_s16] sm:$0x1]  ;;  %s1874_s23 = sld [smem:[#allocation6 + $0x60]]  ;;  %s1876_s25 = sld [smem:[#allocation6 + $0x61]] }
 0x106   :  { %v894_v28 = vld [vmem:[%s893_s17] sm:$0x1]  ;;  %892 = vst [vmem:[#allocation2 + $0x5d] sm:$0x1] %v891_v27  ;;  %s1877_s2 = sld [smem:[#allocation5 + $0x62]]  ;;  %s1879_s27 = sld [smem:[#allocation5 + $0x63]] }
 0x107   :  { %895 = vst [vmem:[#allocation3 + $0x5d] sm:$0x1] %v894_v28  ;;  %v900_v29 = vld [vmem:[%s899_s18] sm:$0x1]  ;;  %s1878_s26 = sld [smem:[#allocation6 + $0x62]]  ;;  %s2342_s28 = sld [smem:[#allocation6 + $0x63]] }
 0x108   :  { %v903_v30 = vld [vmem:[%s902_s19] sm:$0x1]  ;;  %901 = vst [vmem:[#allocation2 + $0x5e] sm:$0x1] %v900_v29  ;;  %s2344_s29 = sld [smem:[#allocation5 + $0x64]]  ;;  %s2348_s30 = sld [smem:[#allocation5 + $0x65]] }
 0x109   :  { %904 = vst [vmem:[#allocation3 + $0x5e] sm:$0x1] %v903_v30  ;;  %v909_v31 = vld [vmem:[%s908_s20] sm:$0x1]  ;;  %s2346_s0 = sld [smem:[#allocation6 + $0x64]]  ;;  %s2350_s1 = sld [smem:[#allocation6 + $0x65]] }
 0x10a   :  { %v912_v32 = vld [vmem:[%s911_s21] sm:$0x1]  ;;  %910 = vst [vmem:[#allocation2 + $0x5f] sm:$0x1] %v909_v31  ;;  %s917_s5 = scalar_lea.vmem [#allocation7], %s1873_s22  ;;  %s926_s7 = scalar_lea.vmem [#allocation7], %s1875_s24 }
 0x10b   :  { %913 = vst [vmem:[#allocation3 + $0x5f] sm:$0x1] %v912_v32  ;;  %v918_v33 = vld [vmem:[%s917_s5] sm:$0x1]  ;;  %s920_s6 = scalar_lea.vmem [#allocation10], %s1874_s23  ;;  %s929_s8 = scalar_lea.vmem [#allocation10], %s1876_s25 }
 0x10c   :  { %919 = vst [vmem:[#allocation2 + $0x60] sm:$0x1] %v918_v33  ;;  %v921_v36 = vld [vmem:[%s920_s6] sm:$0x1]  ;;  %s935_s9 = scalar_lea.vmem [#allocation7], %s1877_s2  ;;  %s944_s3 = scalar_lea.vmem [#allocation7], %s1879_s27 }
 0x10d   :  { %922 = vst [vmem:[#allocation3 + $0x60] sm:$0x1] %v921_v36  ;;  %v927_v38 = vld [vmem:[%s926_s7] sm:$0x1]  ;;  %s938_s10 = scalar_lea.vmem [#allocation10], %s1878_s26  ;;  %s947_s11 = scalar_lea.vmem [#allocation10], %s2342_s28 }
 0x10e   :  { %v930_v39 = vld [vmem:[%s929_s8] sm:$0x1]  ;;  %928 = vst [vmem:[#allocation2 + $0x61] sm:$0x1] %v927_v38  ;;  %s953_s12 = scalar_lea.vmem [#allocation7], %s2344_s29  ;;  %s962_s14 = scalar_lea.vmem [#allocation7], %s2348_s30 }
 0x10f   :  { %v936_v40 = vld [vmem:[%s935_s9] sm:$0x1]  ;;  %931 = vst [vmem:[#allocation3 + $0x61] sm:$0x1] %v930_v39  ;;  %s956_s13 = scalar_lea.vmem [#allocation10], %s2346_s0  ;;  %s965_s15 = scalar_lea.vmem [#allocation10], %s2350_s1 }
 0x110   :  { %937 = vst [vmem:[#allocation2 + $0x62] sm:$0x1] %v936_v40  ;;  %v939_v41 = vld [vmem:[%s938_s10] sm:$0x1]  ;;  %s1885_s16 = sld [smem:[#allocation5 + $0x66]]  ;;  %s1887_s18 = sld [smem:[#allocation5 + $0x67]] }
 0x111   :  { %v1213_v34 = vld [vmem:[#allocation2 + $0x58] sm:$0xff]  ;;  %v945_v42 = vld [vmem:[%s944_s3] sm:$0x1]  ;;  %940 = vst [vmem:[#allocation3 + $0x62] sm:$0x1] %v939_v41  ;;  %s1886_s17 = sld [smem:[#allocation6 + $0x66]] }
 0x112   :  { %v1229_v35 = vld [vmem:[#allocation3 + $0x58] sm:$0xff]  ;;  %946 = vst [vmem:[#allocation2 + $0x63] sm:$0x1] %v945_v42  ;;  %v948_v43 = vld [vmem:[%s947_s11] sm:$0x1]  ;;  %s1888_s19 = sld [smem:[#allocation6 + $0x67]] }
 0x113   :  { %v1245_v37 = vmul.f32 %v1229_v35, %v1213_v34  ;;  %v954_v44 = vld [vmem:[%s953_s12] sm:$0x1]  ;;  %949 = vst [vmem:[#allocation3 + $0x63] sm:$0x1] %v948_v43  ;;  %s1889_s20 = sld [smem:[#allocation5 + $0x68]]  ;;  %s1891_s22 = sld [smem:[#allocation5 + $0x69]] }
 0x114   :  { %955 = vst [vmem:[#allocation2 + $0x64] sm:$0x1] %v954_v44  ;;  %v957_v45 = vld [vmem:[%s956_s13] sm:$0x1]  ;;  %s1890_s21 = sld [smem:[#allocation6 + $0x68]]  ;;  %s1892_s23 = sld [smem:[#allocation6 + $0x69]] }
 0x115   :  { %1272 = vadd.xlane.f32.xlu1 %v1245_v37  ;;  %v963_v46 = vld [vmem:[%s962_s14] sm:$0x1]  ;;  %958 = vst [vmem:[#allocation3 + $0x64] sm:$0x1] %v957_v45  ;;  %s2357_s24 = sld [smem:[#allocation5 + $0x6a]]  ;;  %s2361_s2 = sld [smem:[#allocation5 + $0x6b]] }
 0x116   :  { %964 = vst [vmem:[#allocation2 + $0x65] sm:$0x1] %v963_v46  ;;  %v966_v47 = vld [vmem:[%s965_s15] sm:$0x1]  ;;  %s2359_s25 = sld [smem:[#allocation6 + $0x6a]]  ;;  %s2363_s26 = sld [smem:[#allocation6 + $0x6b]] }
 0x117   :  { %967 = vst [vmem:[#allocation3 + $0x65] sm:$0x1] %v966_v47  ;;  %s971_s27 = scalar_lea.vmem [#allocation7], %s1885_s16  ;;  %s974_s28 = scalar_lea.vmem [#allocation10], %s1886_s17 }
 0x118   :  { %v972_v48 = vld [vmem:[%s971_s27] sm:$0x1]  ;;  %s980_s29 = scalar_lea.vmem [#allocation7], %s1887_s18  ;;  %s983_s0 = scalar_lea.vmem [#allocation10], %s1888_s19 }
 0x119   :  { %v975_v49 = vld [vmem:[%s974_s28] sm:$0x1]  ;;  %973 = vst [vmem:[#allocation2 + $0x66] sm:$0x1] %v972_v48  ;;  %s989_s30 = scalar_lea.vmem [#allocation7], %s1889_s20  ;;  %s998_s5 = scalar_lea.vmem [#allocation7], %s1891_s22  ;;  %v1251_v48 = vpop.xlane.xlu0 %1250 }
 0x11a   :  { %976 = vst [vmem:[#allocation3 + $0x66] sm:$0x1] %v975_v49  ;;  %v981_v50 = vld [vmem:[%s980_s29] sm:$0x1]  ;;  %s992_s1 = scalar_lea.vmem [#allocation10], %s1890_s21  ;;  %s1001_s6 = scalar_lea.vmem [#allocation10], %s1892_s23  ;;  %v1298_v49 = vlaneseq }
 0x11b   :  { %v984_v51 = vld [vmem:[%s983_s0] sm:$0x1]  ;;  %982 = vst [vmem:[#allocation2 + $0x67] sm:$0x1] %v981_v50  ;;  %s1007_s7 = scalar_lea.vmem [#allocation7], %s2357_s24  ;;  %s1016_s9 = scalar_lea.vmem [#allocation7], %s2361_s2  ;;  %v1255_v50 = vpop.xlane.xlu1 %1254 }
 0x11c   :  { %985 = vst [vmem:[#allocation3 + $0x67] sm:$0x1] %v984_v51  ;;  %v990_v52 = vld [vmem:[%s989_s30] sm:$0x1]  ;;  %s1010_s8 = scalar_lea.vmem [#allocation10], %s2359_s25  ;;  %s1019_s10 = scalar_lea.vmem [#allocation10], %s2363_s26 }
 0x11d   :  { %v993_v53 = vld [vmem:[%s992_s1] sm:$0x1]  ;;  %991 = vst [vmem:[#allocation2 + $0x68] sm:$0x1] %v990_v52  ;;  %s1897_s3 = sld [smem:[#allocation5 + $0x6c]]  ;;  %s1899_s12 = sld [smem:[#allocation5 + $0x6d]]  ;;  %v1253_v52 = vpop.xlane.xlu0 %1252 }
 0x11e   :  { %994 = vst [vmem:[#allocation3 + $0x68] sm:$0x1] %v993_v53  ;;  %v999_v54 = vld [vmem:[%s998_s5] sm:$0x1]  ;;  %s1898_s11 = sld [smem:[#allocation6 + $0x6c]]  ;;  %s1900_s13 = sld [smem:[#allocation6 + $0x6d]] }
 0x11f   :  { %v1002_v55 = vld [vmem:[%s1001_s6] sm:$0x1]  ;;  %1000 = vst [vmem:[#allocation2 + $0x69] sm:$0x1] %v999_v54  ;;  %s1901_s14 = sld [smem:[#allocation5 + $0x6e]]  ;;  %s1903_s16 = sld [smem:[#allocation5 + $0x6f]] }
 0x120   :  { %1003 = vst [vmem:[#allocation3 + $0x69] sm:$0x1] %v1002_v55  ;;  %v1008_v56 = vld [vmem:[%s1007_s7] sm:$0x1]  ;;  %s1902_s15 = sld [smem:[#allocation6 + $0x6e]]  ;;  %s2369_s17 = sld [smem:[#allocation6 + $0x6f]]  ;;  %v1257_v55 = vpop.xlane.xlu1 %1256 }
 0x121   :  { %v1011_v57 = vld [vmem:[%s1010_s8] sm:$0x1]  ;;  %1009 = vst [vmem:[#allocation2 + $0x6a] sm:$0x1] %v1008_v56  ;;  %s2371_s18 = sld [smem:[#allocation5 + $0x70]]  ;;  %s2375_s20 = sld [smem:[#allocation5 + $0x71]] }
 0x122   :  { %1012 = vst [vmem:[#allocation3 + $0x6a] sm:$0x1] %v1011_v57  ;;  %v1017_v58 = vld [vmem:[%s1016_s9] sm:$0x1]  ;;  %s2373_s19 = sld [smem:[#allocation6 + $0x70]]  ;;  %s2377_s21 = sld [smem:[#allocation6 + $0x71]] }
 0x123   :  { %v1020_v59 = vld [vmem:[%s1019_s10] sm:$0x1]  ;;  %1018 = vst [vmem:[#allocation2 + $0x6b] sm:$0x1] %v1017_v58  ;;  %s1025_s22 = scalar_lea.vmem [#allocation7], %s1897_s3  ;;  %s1034_s24 = scalar_lea.vmem [#allocation7], %s1899_s12 }
 0x124   :  { %1021 = vst [vmem:[#allocation3 + $0x6b] sm:$0x1] %v1020_v59  ;;  %v1214_v60 = vld [vmem:[#allocation2 + $0x60] sm:$0xff]  ;;  %s1028_s23 = scalar_lea.vmem [#allocation10], %s1898_s11  ;;  %s1037_s25 = scalar_lea.vmem [#allocation10], %s1900_s13  ;;  %v2417_v51 = vand.u32 127, %v1298_v49 }
 0x125   :  { %v1230_v61 = vld [vmem:[#allocation3 + $0x60] sm:$0xff]  ;;  %s1043_s2 = scalar_lea.vmem [#allocation7], %s1901_s14  ;;  %s1052_s27 = scalar_lea.vmem [#allocation7], %s1903_s16  ;;  %v2420_v54 = vshrl.u32 %v1298_v49, 7 }
 0x126   :  { %v1246_v62 = vmul.f32 %v1230_v61, %v1214_v60  ;;  %v1026_v63 = vld [vmem:[%s1025_s22] sm:$0x1]  ;;  %s1046_s26 = scalar_lea.vmem [#allocation10], %s1902_s15  ;;  %s1055_s28 = scalar_lea.vmem [#allocation10], %s2369_s17  ;;  %v1304_v53 = vadd.s32 4294967288, %v2417_v51  ;;  %v1311_v58 = vadd.s32 4294967280, %v2417_v51 }
 0x127   :  { %1027 = vst [vmem:[#allocation2 + $0x6c] sm:$0x1] %v1026_v63  ;;  %v1029_v0 = vld [vmem:[%s1028_s23] sm:$0x1]  ;;  %s1061_s29 = scalar_lea.vmem [#allocation7], %s2371_s18  ;;  %s1070_s30 = scalar_lea.vmem [#allocation7], %s2375_s20  ;;  %v1302_v59 = vsub.s32 %v2417_v51, %v2420_v54 }
 0x128   :  { %1274 = vadd.xlane.f32.xlu0 %v1246_v62  ;;  %v1035_v1 = vld [vmem:[%s1034_s24] sm:$0x1]  ;;  %1030 = vst [vmem:[#allocation3 + $0x6c] sm:$0x1] %v1029_v0  ;;  %s1064_s0 = scalar_lea.vmem [#allocation10], %s2373_s19  ;;  %s1073_s1 = scalar_lea.vmem [#allocation10], %s2377_s21  ;;  %v1307_v56 = vsub.s32 %v1304_v53, %v2420_v54  ;;  %v1314_v62 = vsub.s32 %v1311_v58, %v2420_v54 }
 0x129   :  { %1036 = vst [vmem:[#allocation2 + $0x6d] sm:$0x1] %v1035_v1  ;;  %v1038_v2 = vld [vmem:[%s1037_s25] sm:$0x1]  ;;  %s1909_s5 = sld [smem:[#allocation5 + $0x72]]  ;;  %s1911_s7 = sld [smem:[#allocation5 + $0x73]]  ;;  %v1303_v1 = vrot.slane %v1251_v48, %v1302_v59 }
 0x12a   :  { %v1044_v3 = vld [vmem:[%s1043_s2] sm:$0x1]  ;;  %1039 = vst [vmem:[#allocation3 + $0x6d] sm:$0x1] %v1038_v2  ;;  %s1910_s6 = sld [smem:[#allocation6 + $0x72]]  ;;  %s1912_s8 = sld [smem:[#allocation6 + $0x73]]  ;;  %v1308_v61 = vrot.slane %v1253_v52, %v1307_v56 }
 0x12b   :  { %1045 = vst [vmem:[#allocation2 + $0x6e] sm:$0x1] %v1044_v3  ;;  %v1047_v4 = vld [vmem:[%s1046_s26] sm:$0x1]  ;;  %s1913_s9 = sld [smem:[#allocation5 + $0x74]]  ;;  %s2384_s3 = sld [smem:[#allocation5 + $0x75]] }
 0x12c   :  { %v1053_v5 = vld [vmem:[%s1052_s27] sm:$0x1]  ;;  %1048 = vst [vmem:[#allocation3 + $0x6e] sm:$0x1] %v1047_v4  ;;  %s1914_s10 = sld [smem:[#allocation6 + $0x74]]  ;;  %s2386_s11 = sld [smem:[#allocation6 + $0x75]]  ;;  %v1310_v4 = vsel %vm1309_vm0, %v1308_v61, %v1303_v1 }
 0x12d   :  { %1054 = vst [vmem:[#allocation2 + $0x6f] sm:$0x1] %v1053_v5  ;;  %v1056_v6 = vld [vmem:[%s1055_s28] sm:$0x1]  ;;  %s2388_s12 = sld [smem:[#allocation5 + $0x76]]  ;;  %s2392_s14 = sld [smem:[#allocation5 + $0x77]]  ;;  %v1259_v57 = vpop.xlane.xlu0 %1258 }
 0x12e   :  { %v1062_v7 = vld [vmem:[%s1061_s29] sm:$0x1]  ;;  %1057 = vst [vmem:[#allocation3 + $0x6f] sm:$0x1] %v1056_v6  ;;  %s2390_s13 = sld [smem:[#allocation6 + $0x76]]  ;;  %s2394_s15 = sld [smem:[#allocation6 + $0x77]]  ;;  %v1315_v6 = vrot.slane %v1255_v50, %v1314_v62 }
 0x12f   :  { %1063 = vst [vmem:[#allocation2 + $0x70] sm:$0x1] %v1062_v7  ;;  %v1065_v8 = vld [vmem:[%s1064_s0] sm:$0x1]  ;;  %s1079_s16 = scalar_lea.vmem [#allocation7], %s1909_s5  ;;  %s1088_s18 = scalar_lea.vmem [#allocation7], %s1911_s7 }
 0x130   :  { %v1071_v9 = vld [vmem:[%s1070_s30] sm:$0x1]  ;;  %1066 = vst [vmem:[#allocation3 + $0x70] sm:$0x1] %v1065_v8  ;;  %s1082_s17 = scalar_lea.vmem [#allocation10], %s1910_s6  ;;  %s1091_s19 = scalar_lea.vmem [#allocation10], %s1912_s8 }
 0x131   :  { %1072 = vst [vmem:[#allocation2 + $0x71] sm:$0x1] %v1071_v9  ;;  %v1074_v10 = vld [vmem:[%s1073_s1] sm:$0x1]  ;;  %s1097_s20 = scalar_lea.vmem [#allocation7], %s1913_s9  ;;  %s1106_s22 = scalar_lea.vmem [#allocation7], %s2384_s3 }
 0x132   :  { %1075 = vst [vmem:[#allocation3 + $0x71] sm:$0x1] %v1074_v10  ;;  %v1080_v14 = vld [vmem:[%s1079_s16] sm:$0x1]  ;;  %s1100_s21 = scalar_lea.vmem [#allocation10], %s1914_s10  ;;  %s1109_s23 = scalar_lea.vmem [#allocation10], %s2386_s11  ;;  %v1317_v10 = vsel %vm1316_vm1, %v1315_v6, %v1310_v4 }
 0x133   :  { %v1083_v15 = vld [vmem:[%s1082_s17] sm:$0x1]  ;;  %1081 = vst [vmem:[#allocation2 + $0x72] sm:$0x1] %v1080_v14  ;;  %s1115_s24 = scalar_lea.vmem [#allocation7], %s2388_s12  ;;  %s1124_s2 = scalar_lea.vmem [#allocation7], %s2392_s14 }
 0x134   :  { %v1215_v11 = vld [vmem:[#allocation2 + $0x68] sm:$0xff]  ;;  %1084 = vst [vmem:[#allocation3 + $0x72] sm:$0x1] %v1083_v15  ;;  %v1089_v16 = vld [vmem:[%s1088_s18] sm:$0x1]  ;;  %s1118_s25 = scalar_lea.vmem [#allocation10], %s2390_s13 }
 0x135   :  { %v1231_v12 = vld [vmem:[#allocation3 + $0x68] sm:$0xff]  ;;  %v1092_v17 = vld [vmem:[%s1091_s19] sm:$0x1]  ;;  %1090 = vst [vmem:[#allocation2 + $0x73] sm:$0x1] %v1089_v16  ;;  %s1127_s26 = scalar_lea.vmem [#allocation10], %s2394_s15 }
 0x136   :  { %v1247_v13 = vmul.f32 %v1231_v12, %v1215_v11  ;;  %1093 = vst [vmem:[#allocation3 + $0x73] sm:$0x1] %v1092_v17  ;;  %v1098_v18 = vld [vmem:[%s1097_s20] sm:$0x1]  ;;  %s1921_s27 = sld [smem:[#allocation5 + $0x78]]  ;;  %s1923_s29 = sld [smem:[#allocation5 + $0x79]] }
 0x137   :  { %v1101_v19 = vld [vmem:[%s1100_s21] sm:$0x1]  ;;  %1099 = vst [vmem:[#allocation2 + $0x74] sm:$0x1] %v1098_v18  ;;  %s1922_s28 = sld [smem:[#allocation6 + $0x78]]  ;;  %s1924_s0 = sld [smem:[#allocation6 + $0x79]] }
 0x138   :  { %1276 = vadd.xlane.f32.xlu1 %v1247_v13  ;;  %1102 = vst [vmem:[#allocation3 + $0x74] sm:$0x1] %v1101_v19  ;;  %v1107_v20 = vld [vmem:[%s1106_s22] sm:$0x1]  ;;  %s1925_s30 = sld [smem:[#allocation5 + $0x7a]]  ;;  %s1927_s5 = sld [smem:[#allocation5 + $0x7b]] }
 0x139   :  { %v1110_v21 = vld [vmem:[%s1109_s23] sm:$0x1]  ;;  %1108 = vst [vmem:[#allocation2 + $0x75] sm:$0x1] %v1107_v20  ;;  %s1926_s1 = sld [smem:[#allocation6 + $0x7a]]  ;;  %s2402_s6 = sld [smem:[#allocation6 + $0x7b]] }
 0x13a   :  { %1111 = vst [vmem:[#allocation3 + $0x75] sm:$0x1] %v1110_v21  ;;  %v1116_v22 = vld [vmem:[%s1115_s24] sm:$0x1]  ;;  %s2404_s7 = sld [smem:[#allocation5 + $0x7c]]  ;;  %s2408_s9 = sld [smem:[#allocation5 + $0x7d]] }
 0x13b   :  { %v1119_v23 = vld [vmem:[%s1118_s25] sm:$0x1]  ;;  %1117 = vst [vmem:[#allocation2 + $0x76] sm:$0x1] %v1116_v22  ;;  %s2406_s8 = sld [smem:[#allocation6 + $0x7c]]  ;;  %s2410_s10 = sld [smem:[#allocation6 + $0x7d]] }
 0x13c   :  { %1120 = vst [vmem:[#allocation3 + $0x76] sm:$0x1] %v1119_v23  ;;  %v1125_v24 = vld [vmem:[%s1124_s2] sm:$0x1]  ;;  %s1133_s3 = scalar_lea.vmem [#allocation7], %s1921_s27  ;;  %s1142_s12 = scalar_lea.vmem [#allocation7], %s1923_s29 }
 0x13d   :  { %v1128_v25 = vld [vmem:[%s1127_s26] sm:$0x1]  ;;  %1126 = vst [vmem:[#allocation2 + $0x77] sm:$0x1] %v1125_v24  ;;  %s1136_s11 = scalar_lea.vmem [#allocation10], %s1922_s28  ;;  %s1145_s13 = scalar_lea.vmem [#allocation10], %s1924_s0 }
 0x13e   :  { %1129 = vst [vmem:[#allocation3 + $0x77] sm:$0x1] %v1128_v25  ;;  %v1134_v26 = vld [vmem:[%s1133_s3] sm:$0x1]  ;;  %s1151_s14 = scalar_lea.vmem [#allocation7], %s1925_s30  ;;  %s1160_s16 = scalar_lea.vmem [#allocation7], %s1927_s5 }
 0x13f   :  { %1135 = vst [vmem:[#allocation2 + $0x78] sm:$0x1] %v1134_v26  ;;  %v1137_v29 = vld [vmem:[%s1136_s11] sm:$0x1]  ;;  %s1154_s15 = scalar_lea.vmem [#allocation10], %s1926_s1  ;;  %s1163_s17 = scalar_lea.vmem [#allocation10], %s2402_s6  ;;  %v1261_v0 = vpop.xlane.xlu1 %1260 }
 0x140   :  { %1138 = vst [vmem:[#allocation3 + $0x78] sm:$0x1] %v1137_v29  ;;  %v1143_v31 = vld [vmem:[%s1142_s12] sm:$0x1]  ;;  %s1169_s18 = scalar_lea.vmem [#allocation7], %s2404_s7  ;;  %s1178_s20 = scalar_lea.vmem [#allocation7], %s2408_s9 }
 0x141   :  { %v1146_v32 = vld [vmem:[%s1145_s13] sm:$0x1]  ;;  %1144 = vst [vmem:[#allocation2 + $0x79] sm:$0x1] %v1143_v31  ;;  %s1172_s19 = scalar_lea.vmem [#allocation10], %s2406_s8  ;;  %s1181_s21 = scalar_lea.vmem [#allocation10], %s2410_s10 }
 0x142   :  { %v1152_v33 = vld [vmem:[%s1151_s14] sm:$0x1]  ;;  %1147 = vst [vmem:[#allocation3 + $0x79] sm:$0x1] %v1146_v32  ;;  %s1933_s22 = sld [smem:[#allocation5 + $0x7e]]  ;;  %s1935_s24 = sld [smem:[#allocation5 + $0x7f]] }
 0x143   :  { %1153 = vst [vmem:[#allocation2 + $0x7a] sm:$0x1] %v1152_v33  ;;  %v1155_v34 = vld [vmem:[%s1154_s15] sm:$0x1]  ;;  %s1934_s23 = sld [smem:[#allocation6 + $0x7e]]  ;;  %s1936_s25 = sld [smem:[#allocation6 + $0x7f]] }
 0x144   :  { %v1216_v27 = vld [vmem:[#allocation2 + $0x70] sm:$0xff]  ;;  %v1161_v35 = vld [vmem:[%s1160_s16] sm:$0x1]  ;;  %1156 = vst [vmem:[#allocation3 + $0x7a] sm:$0x1] %v1155_v34  ;;  %v1318_v60 = vadd.s32 4294967272, %v2417_v51 }
 0x145   :  { %v1232_v28 = vld [vmem:[#allocation3 + $0x70] sm:$0xff]  ;;  %1162 = vst [vmem:[#allocation2 + $0x7b] sm:$0x1] %v1161_v35  ;;  %v1164_v36 = vld [vmem:[%s1163_s17] sm:$0x1]  ;;  %v1325_v63 = vadd.s32 4294967264, %v2417_v51 }
 0x146   :  { %v1248_v30 = vmul.f32 %v1232_v28, %v1216_v27  ;;  %v1170_v37 = vld [vmem:[%s1169_s18] sm:$0x1]  ;;  %1165 = vst [vmem:[#allocation3 + $0x7b] sm:$0x1] %v1164_v36  ;;  %v1321_v2 = vsub.s32 %v1318_v60, %v2420_v54  ;;  %v1332_v5 = vadd.s32 4294967256, %v2417_v51  ;;  %v1339_v8 = vadd.s32 4294967248, %v2417_v51 }
 0x147   :  { %1171 = vst [vmem:[#allocation2 + $0x7c] sm:$0x1] %v1170_v37  ;;  %v1173_v38 = vld [vmem:[%s1172_s19] sm:$0x1]  ;;  %v1328_v7 = vsub.s32 %v1325_v63, %v2420_v54  ;;  %v1346_v13 = vadd.s32 4294967240, %v2417_v51  ;;  %v1353_v17 = vadd.s32 4294967232, %v2417_v51 }
 0x148   :  { %1278 = vadd.xlane.f32.xlu0 %v1248_v30  ;;  %v1179_v39 = vld [vmem:[%s1178_s20] sm:$0x1]  ;;  %1174 = vst [vmem:[#allocation3 + $0x7c] sm:$0x1] %v1173_v38  ;;  %s1187_s2 = scalar_lea.vmem [#allocation7], %s1933_s22  ;;  %s1196_s27 = scalar_lea.vmem [#allocation7], %s1935_s24  ;;  %v1322_v9 = vrot.slane %v1257_v55, %v1321_v2  ;;  %v1335_v12 = vsub.s32 %v1332_v5, %v2420_v54  ;;  %v1342_v16 = vsub.s32 %v1339_v8, %v2420_v54 }
 0x149   :  { %1180 = vst [vmem:[#allocation2 + $0x7d] sm:$0x1] %v1179_v39  ;;  %v1182_v40 = vld [vmem:[%s1181_s21] sm:$0x1]  ;;  %s1190_s26 = scalar_lea.vmem [#allocation10], %s1934_s23  ;;  %s1199_s28 = scalar_lea.vmem [#allocation10], %s1936_s25  ;;  %v1329_v15 = vrot.slane %v1259_v57, %v1328_v7  ;;  %v1349_v20 = vsub.s32 %v1346_v13, %v2420_v54  ;;  %v1356_v24 = vsub.s32 %v1353_v17, %v2420_v54 }
 0x14a   :  { %1183 = vst [vmem:[#allocation3 + $0x7d] sm:$0x1] %v1182_v40  ;;  %v1188_v41 = vld [vmem:[%s1187_s2] sm:$0x1]  ;;  %v1324_v18 = vsel %vm1323_vm2, %v1322_v9, %v1317_v10  ;;  %v1336_v19 = vrot.slane %v1261_v0, %v1335_v12  ;;  %v1360_v21 = vadd.s32 4294967224, %v2417_v51  ;;  %v1367_v26 = vadd.s32 4294967216, %v2417_v51 }
 0x14b   :  { %v1191_v42 = vld [vmem:[%s1190_s26] sm:$0x1]  ;;  %1189 = vst [vmem:[#allocation2 + $0x7e] sm:$0x1] %v1188_v41  ;;  %v1331_v22 = vsel %vm1330_vm3, %v1329_v15, %v1324_v18  ;;  %v1374_v31 = vadd.s32 4294967208, %v2417_v51  ;;  %v1381_v35 = vadd.s32 4294967200, %v2417_v51 }
 0x14c   :  { %1192 = vst [vmem:[#allocation3 + $0x7e] sm:$0x1] %v1191_v42  ;;  %v1197_v43 = vld [vmem:[%s1196_s27] sm:$0x1]  ;;  %v1338_v28 = vsel %vm1337_vm4, %v1336_v19, %v1331_v22  ;;  %v1363_v30 = vsub.s32 %v1360_v21, %v2420_v54  ;;  %v1370_v34 = vsub.s32 %v1367_v26, %v2420_v54  ;;  %v1388_v41 = vadd.s32 4294967192, %v2417_v51  ;;  %s2046_s29 = smov [#allocation12]  }
 0x14d   :  { %v1200_v44 = vld [vmem:[%s1199_s28] sm:$0x1]  ;;  %1198 = vst [vmem:[#allocation2 + $0x7f] sm:$0x1] %v1197_v43  ;;  %v1377_v39 = vsub.s32 %v1374_v31, %v2420_v54  ;;  %v1402_v56 = vadd.s32 4294967176, %v2417_v51  ;;  %s1417_s0 = sshll.u32 %s2046_s29, 4  ;;  %s1418_s0 = int_to_ptr.vmem [resolvable:$true] %s1417_s0 }
 0x14e   :  { %1201 = vst [vmem:[#allocation3 + $0x7f] sm:$0x1] %v1200_v44  ;;  %v1384_v44 = vsub.s32 %v1381_v35, %v2420_v54  ;;  %v1391_v48 = vsub.s32 %v1388_v41, %v2420_v54  ;;  %s2010_s30 = scalar_lea.vmem %s1418_s0, 16  ;;  %s2014_s1 = scalar_lea.vmem %s1418_s0, 32 }
 0x14f   :  { %v1263_v3 = vpop.xlane.xlu0 %1262  ;;  %v1405_v61 = vsub.s32 %v1402_v56, %v2420_v54  ;;  %p2011_p10 = scmp.ne.s32.totalorder %s1418_s0, %s2010_s30  ;;  %p2015_p11 = scmp.lt.s32.totalorder %s1418_s0, %s1418_s0 }
 0x150   :  { %v1343_v23 = vrot.slane %v1263_v3, %v1342_v16  ;;  %p2016_p12 = scmp.lt.s32.totalorder %s2014_s1, %s2010_s30 }
 0x152   :  { %v1345_v32 = vsel %vm1344_vm5, %v1343_v23, %v1338_v28  ;;  %p2017_p13 = por %p2016_p12, %p2015_p11 }
 0x154   :  { %v1217_v45 = vld [vmem:[#allocation2 + $0x78] sm:$0xff]  ;;  %p2018_p0 = pnand %p2017_p13, %p2011_p10 }
 0x155   :  { %v1233_v46 = vld [vmem:[#allocation3 + $0x78] sm:$0xff] }
 0x156   :  { %v1249_v47 = vmul.f32 %v1233_v46, %v1217_v45  ;;  %v1395_v45 = vadd.s32 4294967184, %v2417_v51 }
 0x158   :  { %1280 = vadd.xlane.f32.xlu1 %v1249_v47  ;;  %v1398_v53 = vsub.s32 %v1395_v45, %v2420_v54 }
 0x15f   :  { %v1265_v11 = vpop.xlane.xlu1 %1264 }
 0x160   :  { %v1350_v29 = vrot.slane %v1265_v11, %v1349_v20 }
 0x162   :  { %v1352_v37 = vsel %vm1351_vm6, %v1350_v29, %v1345_v32 }
 0x16f   :  { %v1267_v14 = vpop.xlane.xlu0 %1266 }
 0x170   :  { %v1357_v33 = vrot.slane %v1267_v14, %v1356_v24 }
 0x172   :  { %v1359_v42 = vsel %vm1358_vm7, %v1357_v33, %v1352_v37 }
 0x182   :  { %v1269_v25 = vpop.xlane.xlu1 %1268 }
 0x183   :  { %v1364_v38 = vrot.slane %v1269_v25, %v1363_v30 }
 0x185   :  { %v1366_v46 = vsel %vm1365_vm8, %v1364_v38, %v1359_v42 }
 0x192   :  { %v1271_v27 = vpop.xlane.xlu0 %1270 }
 0x193   :  { %v1371_v43 = vrot.slane %v1271_v27, %v1370_v34 }
 0x195   :  { %v1373_v49 = vsel %vm1372_vm9, %v1371_v43, %v1366_v46 }
 0x1a2   :  { %v1273_v36 = vpop.xlane.xlu1 %1272 }
 0x1a3   :  { %v1378_v47 = vrot.slane %v1273_v36, %v1377_v39 }
 0x1a5   :  { %v1380_v57 = vsel %vm1379_vm10, %v1378_v47, %v1373_v49 }
 0x1b5   :  { %v1275_v40 = vpop.xlane.xlu0 %1274 }
 0x1b6   :  { %v1385_v50 = vrot.slane %v1275_v40, %v1384_v44 }
 0x1b8   :  { %v1387_v59 = vsel %vm1386_vm11, %v1385_v50, %v1380_v57 }
 0x1c5   :  { %v1277_v52 = vpop.xlane.xlu1 %1276 }
 0x1c6   :  { %v1392_v58 = vrot.slane %v1277_v52, %v1391_v48 }
 0x1c8   :  { %v1394_v62 = vsel %vm1393_vm12, %v1392_v58, %v1387_v59 }
 0x1d5   :  { %v1279_v55 = vpop.xlane.xlu0 %1278 }
 0x1d6   :  { %v1399_v60 = vrot.slane %v1279_v55, %v1398_v53 }
 0x1d8   :  { %v1401_v0 = vsel %vm1400_vm13, %v1399_v60, %v1394_v62 }
 0x1e5   :  { %v1281_v63 = vpop.xlane.xlu1 %1280 }
 0x1e6   :  { %v1406_v1 = vrot.slane %v1281_v63, %v1405_v61 }
 0x1e8   :  { %v1408_v2 = vsel %vm1407_vm14, %v1406_v1, %v1401_v0 }
 0x1e9   :  { %1410 = vst [vmem:[#allocation12] sm:$0x1] %v1408_v2 }
 0x1ea   :  { %2021 = shalt.err (!%p2018_p0)
}
 0x1eb   :  { %s2022_s7 = scalar_lea.hbm %s2468_s4, 16 }
 0x1ec   :  { %p2023_p1 = scmp.ne.s32.totalorder %s2468_s4, %s2022_s7  ;;  %p2026_p2 = scmp.lt.u32.totalorder %s2022_s7, %s2468_s4 }
 0x1ee   :  { %p2028_p3 = pnand %p2026_p2, %p2023_p1 }
 0x1f0   :  { %2031 = shalt.err (!%p2028_p3)
}
 0x1f1   :  { %1420 = dma.vmem_to_hbm [thread:$0]  %s1418_s0, 16, %s2468_s4, [#allocation9]  }
 0x1f2   :  { %2038 = dma.done.wait [#allocation9], 16  }
 0x1f3   :  { %2039 = vsyncadd [#allocation9], 4294967280 }
 0x1f4   :  { %1424 = vsyncpa [#allocation8], 1 }
 0x1f5   :  { %1425 = vsyncpa [#allocation11], 1 }
 0x1f6   :  { %1426 = vsyncpa [#allocation9], 1 }

</bundles_post_ra>
